<compile_context>
chip_gen: v7x
topology: tpu7x:2x2x1
jax: 0.10.0
libtpu: 0.0.40
codegen_flags: <defaults>
</compile_context>

<pallas_src>
import functools

import jax
import jax.numpy as jnp
from jax.experimental import pallas as pl
from jax.experimental.pallas import tpu as pltpu

BN_EPS = 1e-5
FEAT_DIM = 1000          # backbone output width (ResNet50 logits)
FEAT_PAD = 1024          # 1000 padded to a multiple of 128 lanes
HID = 100                # per-head hidden width
HID_PAD = 128            # padded per-head hidden (full lane tile)
OUT_PAD = 128            # packed logits slab width (class | domain | padding)
SUBLANE = 8              # f32 sublane quantum


def _dann_kernel(x_ref, wf_ref, bf_ref, w1_ref, b1_ref, w2_ref, b2_ref,
                 logits_ref, feat_ref):
    k = pl.program_id(0)

    @pl.when(k == 0)
    def _():
        feat_ref[...] = jnp.zeros_like(feat_ref)

    # Backbone Linear(K -> 1024); K streamed tk columns/rows per grid step.
    # Narrow (bf16) operands go straight to the MXU; accumulation is f32,
    # directly into the resident features output block (constant out_spec
    # index across the K axis -> stays in VMEM until the grid ends).
    feat_ref[...] += jnp.dot(x_ref[...], wf_ref[...],
                             preferred_element_type=jnp.float32)

    @pl.when(k == pl.num_programs(0) - 1)
    def _():
        feats = feat_ref[...] + bf_ref[...]          # bias add in f32
        feat_ref[...] = feats

        # GradientReversalFn.forward == identity; eval-mode Dropout == identity.
        f = jnp.maximum(feats, 0.0).astype(w1_ref.dtype)   # shared leading ReLU

        # Fused class|domain first layer; BN already folded into w1/b1.
        h = jnp.dot(f, w1_ref[...],
                    preferred_element_type=jnp.float32) + b1_ref[...]
        h = jnp.maximum(h, 0.0).astype(w2_ref.dtype)

        # Fused block-diagonal second layer -> lane-dense packed logits slab.
        logits_ref[...] = (
            jnp.dot(h, w2_ref[...], preferred_element_type=jnp.float32)
            + b2_ref[...])


def _fold_bn(w, b, gamma, beta, rmean, rvar):
    """Fold eval-mode BatchNorm1d into the preceding Linear (exact affine)."""
    scale = gamma * jax.lax.rsqrt(rvar + BN_EPS)          # (1, HID)
    return w * scale, (b - rmean) * scale + beta


def pack_params(params, num_classes, k_pad, weights_dtype):
    """Pad / fuse / BN-fold the raw parameters into kernel-friendly slabs."""
    in_dim = params["w_feat"].shape[0]

    w_feat = jnp.pad(params["w_feat"],
                     ((0, k_pad - in_dim), (0, FEAT_PAD - FEAT_DIM)))
    b_feat = jnp.pad(params["b_feat"], ((0, 0), (0, FEAT_PAD - FEAT_DIM)))

    wc1, bc1 = _fold_bn(params["wc1"], params["bc1"], params["gc"],
                        params["bbc"], params["rmc"], params["rvc"])
    wd1, bd1 = _fold_bn(params["wd1"], params["bd1"], params["gd"],
                        params["bbd"], params["rmd"], params["rvd"])

    # First-layer fusion: class head -> lanes [0,128), domain -> [128,256).
    w1 = jnp.zeros((FEAT_PAD, 2 * HID_PAD), jnp.float32)
    w1 = w1.at[:FEAT_DIM, :HID].set(wc1)
    w1 = w1.at[:FEAT_DIM, HID_PAD:HID_PAD + HID].set(wd1)
    b1 = jnp.zeros((1, 2 * HID_PAD), jnp.float32)
    b1 = b1.at[:, :HID].set(bc1)
    b1 = b1.at[:, HID_PAD:HID_PAD + HID].set(bd1)

    # Second-layer fusion: block-diagonal (256, 128) -> packed logits slab.
    nc = num_classes
    w2 = jnp.zeros((2 * HID_PAD, OUT_PAD), jnp.float32)
    w2 = w2.at[:HID, :nc].set(params["wc2"])
    w2 = w2.at[HID_PAD:HID_PAD + HID, nc:nc + 2].set(params["wd2"])
    b2 = jnp.zeros((1, OUT_PAD), jnp.float32)
    b2 = b2.at[:, :nc].set(params["bc2"])
    b2 = b2.at[:, nc:nc + 2].set(params["bd2"])

    # Matmul operands in the streaming dtype; biases stay f32 (v5e-safe VPU).
    return (w_feat.astype(weights_dtype), b_feat.astype(jnp.float32),
            w1.astype(weights_dtype), b1.astype(jnp.float32),
            w2.astype(weights_dtype), b2.astype(jnp.float32))


@functools.partial(jax.jit,
                   static_argnames=("num_classes", "tk", "weights_dtype"))
def dann_forward(x_nchw, params, num_classes, *,
                 weights_dtype=jnp.bfloat16, tk=2048):
    """Fused DANN forward. x_nchw: (B, C, H, W) float32.

    weights_dtype: dtype the MXU operands are streamed in (bf16 halves the
    dominant HBM traffic; use f32 for bit-tight validation).
    tk: K-tile width for the backbone weight stream (multiple of 256; on v7x
    with bf16 this can be pushed to 4096 while staying inside 64 MiB VMEM).
    """
    assert num_classes + 2 <= OUT_PAD
    B = x_nchw.shape[0]
    x_flat = x_nchw.reshape(B, -1).astype(jnp.float32)
    in_dim = x_flat.shape[1]

    # Clamp the tile to the (256-rounded) input width so tiny inputs are not
    # over-padded, then pad K to a whole number of tiles.
    tk_eff = min(tk, pl.cdiv(in_dim, 256) * 256)
    k_pad = pl.cdiv(in_dim, tk_eff) * tk_eff
    b_pad = pl.cdiv(B, SUBLANE) * SUBLANE
    n_k = k_pad // tk_eff

    x_p = jnp.pad(x_flat, ((0, b_pad - B), (0, k_pad - in_dim)))
    x_p = x_p.astype(weights_dtype)                    # cast once, in wrapper
    w_feat, b_feat, w1, b1, w2, b2 = pack_params(
        params, num_classes, k_pad, weights_dtype)

    grid_spec = pltpu.PrefetchScalarGridSpec(
        num_scalar_prefetch=0,
        grid=(n_k,),
        in_specs=[
            pl.BlockSpec((b_pad, tk_eff), lambda k: (0, k)),      # x tiles (K)
            pl.BlockSpec((tk_eff, FEAT_PAD), lambda k: (k, 0)),   # w_feat tiles
            # Loop-invariant operands: constant index_map -> fetched once.
            pl.BlockSpec((1, FEAT_PAD), lambda k: (0, 0)),        # b_feat
            pl.BlockSpec((FEAT_PAD, 2 * HID_PAD), lambda k: (0, 0)),
            pl.BlockSpec((1, 2 * HID_PAD), lambda k: (0, 0)),
            pl.BlockSpec((2 * HID_PAD, OUT_PAD), lambda k: (0, 0)),
            pl.BlockSpec((1, OUT_PAD), lambda k: (0, 0)),
        ],
        out_specs=[
            pl.BlockSpec((b_pad, OUT_PAD), lambda k: (0, 0)),     # packed logits
            pl.BlockSpec((b_pad, FEAT_PAD), lambda k: (0, 0)),    # features/acc
        ],
    )

    w_bytes = jnp.dtype(weights_dtype).itemsize
    cost = pl.CostEstimate(
        flops=(2 * b_pad * k_pad * FEAT_PAD
               + 2 * b_pad * FEAT_PAD * 2 * HID_PAD
               + 2 * b_pad * 2 * HID_PAD * OUT_PAD),
        transcendentals=0,
        bytes_accessed=(b_pad * k_pad * w_bytes               # x
                        + k_pad * FEAT_PAD * w_bytes          # w_feat (dominant)
                        + FEAT_PAD * 2 * HID_PAD * w_bytes    # w1
                        + 2 * HID_PAD * OUT_PAD * w_bytes     # w2
                        + (FEAT_PAD + 2 * HID_PAD + OUT_PAD) * 4   # biases
                        + b_pad * (OUT_PAD + FEAT_PAD) * 4))  # outputs
    logits, feats = pl.pallas_call(
        _dann_kernel,
        out_shape=(
            jax.ShapeDtypeStruct((b_pad, OUT_PAD), jnp.float32),
            jax.ShapeDtypeStruct((b_pad, FEAT_PAD), jnp.float32),
        ),
        grid_spec=grid_spec,
        cost_estimate=cost,
        compiler_params=pltpu.CompilerParams(
            dimension_semantics=("arbitrary",),    # K is a reduction axis
            vmem_limit_bytes=48 << 20,             # needed on v5e (16 MiB default
                                                   # scoped); headroom on v7x 64 MiB
        ),
    )(x_p, w_feat, b_feat, w1, b1, w2, b2)

    class_out = logits[:B, :num_classes]
    domain_out = logits[:B, num_classes:num_classes + 2]
    features = feats[:B, :FEAT_DIM]
    return class_out, domain_out, features


def init_params(key, in_dim, num_classes):
    """Deterministic synthetic parameters matching the module's shapes."""
    keys = jax.random.split(key, 8)

    def lin(k, fan_in, fan_out):
        scale = 1.0 / jnp.sqrt(jnp.float32(fan_in))
        kw, kb = jax.random.split(k)
        w = jax.random.uniform(kw, (fan_in, fan_out), jnp.float32, -scale, scale)
        b = jax.random.uniform(kb, (1, fan_out), jnp.float32, -scale, scale)
        return w, b

    w_feat, b_feat = lin(keys[0], in_dim, FEAT_DIM)   # stand-in backbone
    wc1, bc1 = lin(keys[1], FEAT_DIM, HID)            # class head Linear(1000,100)
    wc2, bc2 = lin(keys[2], HID, num_classes)         # class head Linear(100,nc)
    wd1, bd1 = lin(keys[3], FEAT_DIM, HID)            # domain head Linear(1000,100)
    wd2, bd2 = lin(keys[4], HID, 2)                   # domain head Linear(100,2)

    # BatchNorm1d(100) defaults: gamma=1, beta=0, running_mean=0, running_var=1
    ones = jnp.ones((1, HID), jnp.float32)
    zeros = jnp.zeros((1, HID), jnp.float32)

    return dict(
        w_feat=w_feat, b_feat=b_feat,
        wc1=wc1, bc1=bc1, gc=ones, bbc=zeros, rmc=zeros, rvc=ones,
        wc2=wc2, bc2=bc2,
        wd1=wd1, bd1=bd1, gd=ones, bbd=zeros, rmd=zeros, rvd=ones,
        wd2=wd2, bd2=bd2,
    )


def reference_forward(x_nchw, params):
    """Pure-JAX reference of the same eval-mode forward."""
    B = x_nchw.shape[0]
    x = x_nchw.reshape(B, -1).astype(jnp.float32)
    feats = x @ params["w_feat"] + params["b_feat"]
    f = jnp.maximum(feats, 0.0)

    def head(w1, b1, g, bb, rm, rv, w2, b2):
        h = f @ w1 + b1
        h = g * (h - rm) / jnp.sqrt(rv + BN_EPS) + bb
        h = jnp.maximum(h, 0.0)
        return h @ w2 + b2

    c = head(params["wc1"], params["bc1"], params["gc"], params["bbc"],
             params["rmc"], params["rvc"], params["wc2"], params["bc2"])
    d = head(params["wd1"], params["bd1"], params["gd"], params["bbd"],
             params["rmd"], params["rvd"], params["wd2"], params["bd2"])
    return c, d, feats


if __name__ == "__main__":
    B, C, H, W = 2, 3, 16, 16
    NUM_CLASSES = 10

    key = jax.random.PRNGKey(0)
    kx, kp = jax.random.split(key)
    x = jax.random.normal(kx, (B, C, H, W), jnp.float32)
    params = init_params(kp, C * H * W, NUM_CLASSES)

    c_ref, d_ref, f_ref = reference_forward(x, params)

    # 1) f32 validation path: exact semantics, tight tolerance.
    class_out, domain_out, features = dann_forward(
        x, params, NUM_CLASSES, weights_dtype=jnp.float32)
    jax.block_until_ready((class_out, domain_out, features))
    assert class_out.shape == (B, NUM_CLASSES)
    assert domain_out.shape == (B, 2)
    assert features.shape == (B, FEAT_DIM)
    assert jnp.allclose(class_out, c_ref, atol=1e-4, rtol=1e-4)
    assert jnp.allclose(domain_out, d_ref, atol=1e-4, rtol=1e-4)
    assert jnp.allclose(features, f_ref, atol=1e-4, rtol=1e-4)

    # 2) Production path: bf16-streamed weights (half the HBM traffic), f32
    #    accumulation. Looser tolerance, as expected for bf16 operands.
    class_bf, domain_bf, features_bf = dann_forward(x, params, NUM_CLASSES)
    jax.block_until_ready((class_bf, domain_bf, features_bf))
    assert class_bf.shape == (B, NUM_CLASSES)
    assert domain_bf.shape == (B, 2)
    assert features_bf.shape == (B, FEAT_DIM)
    assert jnp.allclose(class_bf, c_ref, atol=1e-1, rtol=1e-1)
    assert jnp.allclose(domain_bf, d_ref, atol=1e-1, rtol=1e-1)
    assert jnp.allclose(features_bf, f_ref, atol=1e-1, rtol=1e-1)

    print("KERNEL_OK")
</pallas_src>

<mosaic_0001>
module attributes {stable_mosaic.version = 11 : i64} {
  func.func @_dann_kernel(%arg0: i32, %arg1: memref<8x768xf32, #tpu.memory_space<vmem>>, %arg2: memref<768x1024xf32, #tpu.memory_space<vmem>>, %arg3: memref<1x1024xf32, #tpu.memory_space<vmem>>, %arg4: memref<1024x256xf32, #tpu.memory_space<vmem>>, %arg5: memref<1x256xf32, #tpu.memory_space<vmem>>, %arg6: memref<256x128xf32, #tpu.memory_space<vmem>>, %arg7: memref<1x128xf32, #tpu.memory_space<vmem>>, %arg8: memref<8x128xf32, #tpu.memory_space<vmem>>, %arg9: memref<8x1024xf32, #tpu.memory_space<vmem>>) attributes {dimension_semantics = [#tpu.dimension_semantics<arbitrary>], iteration_bounds = array<i64: 1>, scalar_prefetch = 0 : i64, scratch_operands = 0 : i64, tpu.core_type = #tpu.core_type<tc>, window_params = [{transform_indices = @transform_0, window_bounds = array<i64: 8, 768>}, {transform_indices = @transform_1, window_bounds = array<i64: 768, 1024>}, {pipeline_mode = #tpu.pipeline_mode<synchronous>, transform_indices = @transform_2, window_bounds = array<i64: 1, 1024>}, {pipeline_mode = #tpu.pipeline_mode<synchronous>, transform_indices = @transform_3, window_bounds = array<i64: 1024, 256>}, {pipeline_mode = #tpu.pipeline_mode<synchronous>, transform_indices = @transform_4, window_bounds = array<i64: 1, 256>}, {pipeline_mode = #tpu.pipeline_mode<synchronous>, transform_indices = @transform_5, window_bounds = array<i64: 256, 128>}, {pipeline_mode = #tpu.pipeline_mode<synchronous>, transform_indices = @transform_6, window_bounds = array<i64: 1, 128>}, {pipeline_mode = #tpu.pipeline_mode<synchronous>, transform_indices = @transform_7, window_bounds = array<i64: 8, 128>}, {pipeline_mode = #tpu.pipeline_mode<synchronous>, transform_indices = @transform_8, window_bounds = array<i64: 8, 1024>}]} {
    %c0_i32 = arith.constant 0 : i32
    %0 = arith.cmpi eq, %arg0, %c0_i32 : i32
    %1 = arith.extui %0 : i1 to i32
    %c0_i32_0 = arith.constant 0 : i32
    %2 = arith.cmpi ne, %1, %c0_i32_0 : i32
    scf.if %2 {
      %cst_10 = arith.constant 0.000000e+00 : f32
      %12 = vector.broadcast %cst_10 : f32 to vector<8x1024xf32>
      %c0_11 = arith.constant 0 : index
      %c0_12 = arith.constant 0 : index
      %13 = vector.load %arg9[%c0_11, %c0_12] : memref<8x1024xf32, #tpu.memory_space<vmem>>, vector<8x1024xf32>
      tpu.vector_store %arg9[%c0_11, %c0_12], %12 {strides = array<i32>} : memref<8x1024xf32, #tpu.memory_space<vmem>>, vector<8x1024xf32>,
    } else {
    }
    %c0 = arith.constant 0 : index
    %c0_1 = arith.constant 0 : index
    %3 = vector.load %arg9[%c0, %c0_1] : memref<8x1024xf32, #tpu.memory_space<vmem>>, vector<8x1024xf32>
    %c0_2 = arith.constant 0 : index
    %c0_3 = arith.constant 0 : index
    %4 = vector.load %arg1[%c0_2, %c0_3] : memref<8x768xf32, #tpu.memory_space<vmem>>, vector<8x768xf32>
    %c0_4 = arith.constant 0 : index
    %c0_5 = arith.constant 0 : index
    %5 = vector.load %arg2[%c0_4, %c0_5] : memref<768x1024xf32, #tpu.memory_space<vmem>>, vector<768x1024xf32>
    %cst = arith.constant dense<0.000000e+00> : vector<8x1024xf32>
    %6 = tpu.matmul %4, %5, %cst {dimension_numbers = #tpu.dot_dimension_numbers<[1], [0], [0], [1], [0, 0, 1, 1], [], []>} : vector<8x768xf32>, vector<768x1024xf32>, vector<8x1024xf32> -> vector<8x1024xf32>
    %7 = arith.addf %3, %6 : vector<8x1024xf32>
    %c0_6 = arith.constant 0 : index
    %c0_7 = arith.constant 0 : index
    %8 = vector.load %arg9[%c0_6, %c0_7] : memref<8x1024xf32, #tpu.memory_space<vmem>>, vector<8x1024xf32>
    tpu.vector_store %arg9[%c0_6, %c0_7], %7 {strides = array<i32>} : memref<8x1024xf32, #tpu.memory_space<vmem>>, vector<8x1024xf32>,
    %c0_i32_8 = arith.constant 0 : i32
    %9 = arith.cmpi eq, %arg0, %c0_i32_8 : i32
    %10 = arith.extui %9 : i1 to i32
    %c0_i32_9 = arith.constant 0 : i32
    %11 = arith.cmpi ne, %10, %c0_i32_9 : i32
    scf.if %11 {
      %c0_10 = arith.constant 0 : index
      %c0_11 = arith.constant 0 : index
      %12 = vector.load %arg9[%c0_10, %c0_11] : memref<8x1024xf32, #tpu.memory_space<vmem>>, vector<8x1024xf32>
      %c0_12 = arith.constant 0 : index
      %c0_13 = arith.constant 0 : index
      %13 = vector.load %arg3[%c0_12, %c0_13] : memref<1x1024xf32, #tpu.memory_space<vmem>>, vector<1x1024xf32>
      %14 = vector.broadcast %13 : vector<1x1024xf32> to vector<8x1024xf32>
      %15 = arith.addf %12, %14 : vector<8x1024xf32>
      %c0_14 = arith.constant 0 : index
      %c0_15 = arith.constant 0 : index
      %16 = vector.load %arg9[%c0_14, %c0_15] : memref<8x1024xf32, #tpu.memory_space<vmem>>, vector<8x1024xf32>
      tpu.vector_store %arg9[%c0_14, %c0_15], %15 {strides = array<i32>} : memref<8x1024xf32, #tpu.memory_space<vmem>>, vector<8x1024xf32>,
      %cst_16 = arith.constant 0.000000e+00 : f32
      %17 = vector.broadcast %cst_16 : f32 to vector<8x1024xf32>
      %18 = arith.maximumf %15, %17 : vector<8x1024xf32>
      %c0_17 = arith.constant 0 : index
      %c0_18 = arith.constant 0 : index
      %19 = vector.load %arg4[%c0_17, %c0_18] : memref<1024x256xf32, #tpu.memory_space<vmem>>, vector<1024x256xf32>
      %cst_19 = arith.constant dense<0.000000e+00> : vector<8x256xf32>
      %20 = tpu.matmul %18, %19, %cst_19 {dimension_numbers = #tpu.dot_dimension_numbers<[1], [0], [0], [1], [0, 0, 1, 1], [], []>} : vector<8x1024xf32>, vector<1024x256xf32>, vector<8x256xf32> -> vector<8x256xf32>
      %c0_20 = arith.constant 0 : index
      %c0_21 = arith.constant 0 : index
      %21 = vector.load %arg5[%c0_20, %c0_21] : memref<1x256xf32, #tpu.memory_space<vmem>>, vector<1x256xf32>
      %22 = vector.broadcast %21 : vector<1x256xf32> to vector<8x256xf32>
      %23 = arith.addf %20, %22 : vector<8x256xf32>
      %cst_22 = arith.constant 0.000000e+00 : f32
      %24 = vector.broadcast %cst_22 : f32 to vector<8x256xf32>
      %25 = arith.maximumf %23, %24 : vector<8x256xf32>
      %c0_23 = arith.constant 0 : index
      %c0_24 = arith.constant 0 : index
      %26 = vector.load %arg6[%c0_23, %c0_24] : memref<256x128xf32, #tpu.memory_space<vmem>>, vector<256x128xf32>
      %cst_25 = arith.constant dense<0.000000e+00> : vector<8x128xf32>
      %27 = tpu.matmul %25, %26, %cst_25 {dimension_numbers = #tpu.dot_dimension_numbers<[1], [0], [0], [1], [0, 0, 1, 1], [], []>} : vector<8x256xf32>, vector<256x128xf32>, vector<8x128xf32> -> vector<8x128xf32>
      %c0_26 = arith.constant 0 : index
      %c0_27 = arith.constant 0 : index
      %28 = vector.load %arg7[%c0_26, %c0_27] : memref<1x128xf32, #tpu.memory_space<vmem>>, vector<1x128xf32>
      %29 = vector.broadcast %28 : vector<1x128xf32> to vector<8x128xf32>
      %30 = arith.addf %27, %29 : vector<8x128xf32>
      %c0_28 = arith.constant 0 : index
      %c0_29 = arith.constant 0 : index
      %31 = vector.load %arg8[%c0_28, %c0_29] : memref<8x128xf32, #tpu.memory_space<vmem>>, vector<8x128xf32>
      tpu.vector_store %arg8[%c0_28, %c0_29], %30 {strides = array<i32>} : memref<8x128xf32, #tpu.memory_space<vmem>>, vector<8x128xf32>,
    } else {
    }
    return
  }
  func.func @transform_0(%arg0: i32) -> (i32, i32) {
    %c0_i32 = arith.constant 0 : i32
    %c0_i32_0 = arith.constant 0 : i32
    return %c0_i32, %arg0 : i32, i32
  }
  func.func @transform_1(%arg0: i32) -> (i32, i32) {
    %c0_i32 = arith.constant 0 : i32
    %c0_i32_0 = arith.constant 0 : i32
    return %arg0, %c0_i32 : i32, i32
  }
  func.func @transform_2(%arg0: i32) -> (i32, i32) {
    %c0_i32 = arith.constant 0 : i32
    %c0_i32_0 = arith.constant 0 : i32
    %c0_i32_1 = arith.constant 0 : i32
    return %c0_i32, %c0_i32_0 : i32, i32
  }
  func.func @transform_3(%arg0: i32) -> (i32, i32) {
    %c0_i32 = arith.constant 0 : i32
    %c0_i32_0 = arith.constant 0 : i32
    %c0_i32_1 = arith.constant 0 : i32
    return %c0_i32, %c0_i32_0 : i32, i32
  }
  func.func @transform_4(%arg0: i32) -> (i32, i32) {
    %c0_i32 = arith.constant 0 : i32
    %c0_i32_0 = arith.constant 0 : i32
    %c0_i32_1 = arith.constant 0 : i32
    return %c0_i32, %c0_i32_0 : i32, i32
  }
  func.func @transform_5(%arg0: i32) -> (i32, i32) {
    %c0_i32 = arith.constant 0 : i32
    %c0_i32_0 = arith.constant 0 : i32
    %c0_i32_1 = arith.constant 0 : i32
    return %c0_i32, %c0_i32_0 : i32, i32
  }
  func.func @transform_6(%arg0: i32) -> (i32, i32) {
    %c0_i32 = arith.constant 0 : i32
    %c0_i32_0 = arith.constant 0 : i32
    %c0_i32_1 = arith.constant 0 : i32
    return %c0_i32, %c0_i32_0 : i32, i32
  }
  func.func @transform_7(%arg0: i32) -> (i32, i32) {
    %c0_i32 = arith.constant 0 : i32
    %c0_i32_0 = arith.constant 0 : i32
    %c0_i32_1 = arith.constant 0 : i32
    return %c0_i32, %c0_i32_0 : i32, i32
  }
  func.func @transform_8(%arg0: i32) -> (i32, i32) {
    %c0_i32 = arith.constant 0 : i32
    %c0_i32_0 = arith.constant 0 : i32
    %c0_i32_1 = arith.constant 0 : i32
    return %c0_i32, %c0_i32_0 : i32, i32
  }
}

</mosaic_0001>

<bundles_post_ra>
// kernel: dann_forward.1
= control target key start
LH: loop header
LB: loop body
LE: loop exit
PB: predicated region body
PF: predicated region fallthrough
CT: control target
= control target key end

     0   :  { %s6933_s1 = inlined_call_operand.vmem [shape: f32[768,1024], index: 1, kind: input, shape index: {}]   ;;  %s6934_s0 = inlined_call_operand.vmem [shape: f32[8,768], index: 0, kind: input, shape index: {}]   ;;  %s6935_s3 = inlined_call_operand.vmem [shape: f32[1024,256], index: 3, kind: input, shape index: {}]   ;;  %s6936_s2 = inlined_call_operand.vmem [shape: f32[1,1024], index: 2, kind: input, shape index: {}]   ;;  %s6937_s8 = inlined_call_operand.vmem [shape: f32[8,1024], index: 8, kind: output, shape index: {1}]   ;;  %s6938_s5 = inlined_call_operand.vmem [shape: f32[256,128], index: 5, kind: input, shape index: {}]   ;;  %s6939_s4 = inlined_call_operand.vmem [shape: f32[1,256], index: 4, kind: input, shape index: {}]   ;;  %s6940_s6 = inlined_call_operand.vmem [shape: f32[1,128], index: 6, kind: input, shape index: {}]   ;;  %s6941_s7 = inlined_call_operand.vmem [shape: f32[8,128], index: 7, kind: output, shape index: {0}]  }
   0x1   :  { %v55_v0 = vld [vmem:[%s6933_s1 + $0x8] sm:$0xff]  ;;  %v54_v2 = vld [vmem:[%s6933_s1] sm:$0xff] }
   0x2   :  { %v63_v1 = vld [vmem:[%s6933_s1 + $0x48] sm:$0xff]  ;;  %v62_v4 = vld [vmem:[%s6933_s1 + $0x40] sm:$0xff] }
   0x3   :  { %v2475_v3 = vpack.c.bf16 %v63_v1, %v55_v0  ;;  %v71_v5 = vld [vmem:[%s6933_s1 + $0x88] sm:$0xff]  ;;  %v2477_v7 = vpack.c.bf16 %v62_v4, %v54_v2  ;;  %v70_v9 = vld [vmem:[%s6933_s1 + $0x80] sm:$0xff] }
   0x4   :  { %v79_v6 = vld [vmem:[%s6933_s1 + $0xc8] sm:$0xff]  ;;  %v78_v10 = vld [vmem:[%s6933_s1 + $0xc0] sm:$0xff] }
   0x5   :  { %v2479_v8 = vpack.c.bf16 %v79_v6, %v71_v5  ;;  %v87_v11 = vld [vmem:[%s6933_s1 + $0x108] sm:$0xff]  ;;  %2476 = vmatprep.subr.bf16.mxu1 %v2475_v3  ;;  %v2481_v13 = vpack.c.bf16 %v78_v10, %v70_v9  ;;  %v86_v15 = vld [vmem:[%s6933_s1 + $0x100] sm:$0xff] }
   0x6   :  { %v95_v12 = vld [vmem:[%s6933_s1 + $0x148] sm:$0xff]  ;;  %2478 = vmatpush1.bf16.msra.mxu1 %v2477_v7  ;;  %v94_v16 = vld [vmem:[%s6933_s1 + $0x140] sm:$0xff] }
   0x7   :  { %2480 = vmatprep.subr.bf16.mxu1 %v2479_v8  ;;  %v2483_v14 = vpack.c.bf16 %v95_v12, %v87_v11  ;;  %v103_v17 = vld [vmem:[%s6933_s1 + $0x188] sm:$0xff]  ;;  %v2485_v19 = vpack.c.bf16 %v94_v16, %v86_v15  ;;  %v102_v21 = vld [vmem:[%s6933_s1 + $0x180] sm:$0xff] }
   0x8   :  { %v111_v18 = vld [vmem:[%s6933_s1 + $0x1c8] sm:$0xff]  ;;  %v110_v22 = vld [vmem:[%s6933_s1 + $0x1c0] sm:$0xff] }
   0x9   :  { %v2487_v20 = vpack.c.bf16 %v111_v18, %v103_v17  ;;  %v119_v23 = vld [vmem:[%s6933_s1 + $0x208] sm:$0xff]  ;;  %v2489_v25 = vpack.c.bf16 %v110_v22, %v102_v21  ;;  %v118_v26 = vld [vmem:[%s6933_s1 + $0x200] sm:$0xff] }
   0xa   :  { %2482 = vmatpush1.bf16.msra.mxu1 %v2481_v13  ;;  %v127_v24 = vld [vmem:[%s6933_s1 + $0x248] sm:$0xff]  ;;  %v126_v27 = vld [vmem:[%s6933_s1 + $0x240] sm:$0xff] }
   0xb   :  { %2484 = vmatprep.subr.bf16.mxu1 %v2483_v14  ;;  %v2491_v28 = vpack.c.bf16 %v127_v24, %v119_v23  ;;  %v135_v29 = vld [vmem:[%s6933_s1 + $0x288] sm:$0xff]  ;;  %v566_v34 = vld [vmem:[%s6933_s1 + $0x1000] sm:$0xff]  ;;  %v2493_v37 = vpack.c.bf16 %v126_v27, %v118_v26 }
   0xc   :  { %v567_v30 = vld [vmem:[%s6933_s1 + $0x1008] sm:$0xff]  ;;  %v574_v35 = vld [vmem:[%s6933_s1 + $0x1040] sm:$0xff] }
   0xd   :  { %v575_v31 = vld [vmem:[%s6933_s1 + $0x1048] sm:$0xff]  ;;  %v2605_v36 = vpack.c.bf16 %v574_v35, %v566_v34  ;;  %v582_v40 = vld [vmem:[%s6933_s1 + $0x1080] sm:$0xff] }
   0xe   :  { %2486 = vmatpush1.bf16.msra.mxu1 %v2485_v19  ;;  %v143_v32 = vld [vmem:[%s6933_s1 + $0x2c8] sm:$0xff]  ;;  %v2603_v33 = vpack.c.bf16 %v575_v31, %v567_v30  ;;  %v134_v42 = vld [vmem:[%s6933_s1 + $0x280] sm:$0xff] }
   0xf   :  { %2488 = vmatprep.subr.bf16.mxu1 %v2487_v20  ;;  %v583_v38 = vld [vmem:[%s6933_s1 + $0x1088] sm:$0xff]  ;;  %v2495_v41 = vpack.c.bf16 %v143_v32, %v135_v29  ;;  %v142_v43 = vld [vmem:[%s6933_s1 + $0x2c0] sm:$0xff] }
  0x10   :  { %2604 = vmatprep.subr.bf16.mxu0 %v2603_v33  ;;  %v591_v39 = vld [vmem:[%s6933_s1 + $0x10c8] sm:$0xff]  ;;  %v590_v45 = vld [vmem:[%s6933_s1 + $0x10c0] sm:$0xff]  ;;  %v2497_v53 = vpack.c.bf16 %v142_v43, %v134_v42 }
  0x11   :  { %2606 = vmatpush1.bf16.msra.mxu0 %v2605_v36  ;;  %v2607_v44 = vpack.c.bf16 %v591_v39, %v583_v38  ;;  %v151_v46 = vld [vmem:[%s6933_s1 + $0x308] sm:$0xff]  ;;  %v2609_v48 = vpack.c.bf16 %v590_v45, %v582_v40  ;;  %v598_v51 = vld [vmem:[%s6933_s1 + $0x1100] sm:$0xff] }
  0x12   :  { %2490 = vmatpush1.bf16.msra.mxu1 %v2489_v25  ;;  %v159_v47 = vld [vmem:[%s6933_s1 + $0x348] sm:$0xff]  ;;  %v606_v52 = vld [vmem:[%s6933_s1 + $0x1140] sm:$0xff] }
  0x13   :  { %2492 = vmatprep.subr.bf16.mxu1 %v2491_v28  ;;  %v599_v49 = vld [vmem:[%s6933_s1 + $0x1108] sm:$0xff]  ;;  %2608 = vmatprep.subr.bf16.mxu0 %v2607_v44  ;;  %v150_v54 = vld [vmem:[%s6933_s1 + $0x300] sm:$0xff]  ;;  %v2499_v57 = vpack.c.bf16 %v159_v47, %v151_v46  ;;  %v2613_v59 = vpack.c.bf16 %v606_v52, %v598_v51 }
  0x14   :  { %v607_v50 = vld [vmem:[%s6933_s1 + $0x1148] sm:$0xff]  ;;  %v158_v55 = vld [vmem:[%s6933_s1 + $0x340] sm:$0xff] }
  0x15   :  { %v2611_v56 = vpack.c.bf16 %v607_v50, %v599_v49  ;;  %v167_v58 = vld [vmem:[%s6933_s1 + $0x388] sm:$0xff]  ;;  %2610 = vmatpush1.bf16.msra.mxu0 %v2609_v48  ;;  %v614_v0 = vld [vmem:[%s6933_s1 + $0x1180] sm:$0xff]  ;;  %v2501_v2 = vpack.c.bf16 %v158_v55, %v150_v54 }
  0x16   :  { %2494 = vmatpush1.bf16.msra.mxu1 %v2493_v37  ;;  %v615_v60 = vld [vmem:[%s6933_s1 + $0x1188] sm:$0xff]  ;;  %v622_v1 = vld [vmem:[%s6933_s1 + $0x11c0] sm:$0xff] }
  0x17   :  { %2496 = vmatprep.subr.bf16.mxu1 %v2495_v41  ;;  %v623_v61 = vld [vmem:[%s6933_s1 + $0x11c8] sm:$0xff]  ;;  %2612 = vmatprep.subr.bf16.mxu0 %v2611_v56  ;;  %v166_v6 = vld [vmem:[%s6933_s1 + $0x380] sm:$0xff]  ;;  %v2617_v9 = vpack.c.bf16 %v622_v1, %v614_v0 }
  0x18   :  { %v175_v62 = vld [vmem:[%s6933_s1 + $0x3c8] sm:$0xff]  ;;  %v2615_v63 = vpack.c.bf16 %v623_v61, %v615_v60  ;;  %v174_v7 = vld [vmem:[%s6933_s1 + $0x3c0] sm:$0xff] }
  0x19   :  { %v631_v3 = vld [vmem:[%s6933_s1 + $0x1208] sm:$0xff]  ;;  %v2503_v5 = vpack.c.bf16 %v175_v62, %v167_v58  ;;  %2614 = vmatpush1.bf16.msra.mxu0 %v2613_v59  ;;  %v630_v12 = vld [vmem:[%s6933_s1 + $0x1200] sm:$0xff]  ;;  %v2505_v16 = vpack.c.bf16 %v174_v7, %v166_v6 }
  0x1a   :  { %2498 = vmatpush1.bf16.msra.mxu1 %v2497_v53  ;;  %v639_v4 = vld [vmem:[%s6933_s1 + $0x1248] sm:$0xff]  ;;  %2616 = vmatprep.subr.bf16.mxu0 %v2615_v63  ;;  %v638_v13 = vld [vmem:[%s6933_s1 + $0x1240] sm:$0xff] }
  0x1b   :  { %2500 = vmatprep.subr.bf16.mxu1 %v2499_v57  ;;  %v183_v8 = vld [vmem:[%s6933_s1 + $0x408] sm:$0xff]  ;;  %v2619_v11 = vpack.c.bf16 %v639_v4, %v631_v3  ;;  %v182_v17 = vld [vmem:[%s6933_s1 + $0x400] sm:$0xff]  ;;  %v2621_v22 = vpack.c.bf16 %v638_v13, %v630_v12 }
  0x1c   :  { %v191_v10 = vld [vmem:[%s6933_s1 + $0x448] sm:$0xff]  ;;  %v190_v19 = vld [vmem:[%s6933_s1 + $0x440] sm:$0xff] }
  0x1d   :  { %v647_v14 = vld [vmem:[%s6933_s1 + $0x1288] sm:$0xff]  ;;  %v2507_v18 = vpack.c.bf16 %v191_v10, %v183_v8  ;;  %2618 = vmatpush1.bf16.msra.mxu0 %v2617_v9  ;;  %v646_v24 = vld [vmem:[%s6933_s1 + $0x1280] sm:$0xff]  ;;  %v2509_v29 = vpack.c.bf16 %v190_v19, %v182_v17 }
  0x1e   :  { %v655_v15 = vld [vmem:[%s6933_s1 + $0x12c8] sm:$0xff]  ;;  %2502 = vmatpush1.bf16.msra.mxu1 %v2501_v2  ;;  %2620 = vmatprep.subr.bf16.mxu0 %v2619_v11  ;;  %v654_v25 = vld [vmem:[%s6933_s1 + $0x12c0] sm:$0xff] }
  0x1f   :  { %2504 = vmatprep.subr.bf16.mxu1 %v2503_v5  ;;  %v199_v20 = vld [vmem:[%s6933_s1 + $0x488] sm:$0xff]  ;;  %v2623_v23 = vpack.c.bf16 %v655_v15, %v647_v14  ;;  %v198_v31 = vld [vmem:[%s6933_s1 + $0x480] sm:$0xff]  ;;  %v2625_v34 = vpack.c.bf16 %v654_v25, %v646_v24 }
  0x20   :  { %v207_v21 = vld [vmem:[%s6933_s1 + $0x4c8] sm:$0xff]  ;;  %v206_v32 = vld [vmem:[%s6933_s1 + $0x4c0] sm:$0xff] }
  0x21   :  { %v3801_v26 = vld [vmem:[%s6934_s0 + $0x8] sm:$0xff]  ;;  %v2511_v30 = vpack.c.bf16 %v207_v21, %v199_v20  ;;  %2622 = vmatpush1.bf16.msra.mxu0 %v2621_v22  ;;  %v662_v37 = vld [vmem:[%s6933_s1 + $0x1300] sm:$0xff]  ;;  %v2513_v41 = vpack.c.bf16 %v206_v32, %v198_v31 }
  0x22   :  { %v663_v27 = vld [vmem:[%s6933_s1 + $0x1308] sm:$0xff]  ;;  %886 = vmatprep.mubr.f32.mxu1 %v3801_v26  ;;  %2506 = vmatpush1.bf16.msra.mxu1 %v2505_v16  ;;  %v670_v38 = vld [vmem:[%s6933_s1 + $0x1340] sm:$0xff] }
  0x23   :  { %v671_v28 = vld [vmem:[%s6933_s1 + $0x1348] sm:$0xff]  ;;  %2508 = vmatprep.subr.bf16.mxu1 %v2507_v18  ;;  %2624 = vmatprep.subr.bf16.mxu0 %v2623_v23  ;;  %v214_v43 = vld [vmem:[%s6933_s1 + $0x500] sm:$0xff]  ;;  %v2629_v46 = vpack.c.bf16 %v670_v38, %v662_v37 }
  0x24   :  { %v215_v33 = vld [vmem:[%s6933_s1 + $0x508] sm:$0xff]  ;;  %v2627_v36 = vpack.c.bf16 %v671_v28, %v663_v27  ;;  %v222_v44 = vld [vmem:[%s6933_s1 + $0x540] sm:$0xff] }
  0x25   :  { %v223_v35 = vld [vmem:[%s6933_s1 + $0x548] sm:$0xff]  ;;  %2626 = vmatpush1.bf16.msra.mxu0 %v2625_v34  ;;  %v678_v49 = vld [vmem:[%s6933_s1 + $0x1380] sm:$0xff]  ;;  %v2517_v53 = vpack.c.bf16 %v222_v44, %v214_v43 }
  0x26   :  { %v679_v39 = vld [vmem:[%s6933_s1 + $0x1388] sm:$0xff]  ;;  %2510 = vmatpush1.bf16.msra.mxu1 %v2509_v29  ;;  %v2515_v42 = vpack.c.bf16 %v223_v35, %v215_v33  ;;  %2628 = vmatprep.subr.bf16.mxu0 %v2627_v36  ;;  %v686_v50 = vld [vmem:[%s6933_s1 + $0x13c0] sm:$0xff] }
  0x27   :  { %v687_v40 = vld [vmem:[%s6933_s1 + $0x13c8] sm:$0xff]  ;;  %2512 = vmatprep.subr.bf16.mxu1 %v2511_v30  ;;  %v230_v55 = vld [vmem:[%s6933_s1 + $0x580] sm:$0xff]  ;;  %v2633_v58 = vpack.c.bf16 %v686_v50, %v678_v49 }
  0x28   :  { %v231_v45 = vld [vmem:[%s6933_s1 + $0x588] sm:$0xff]  ;;  %v2631_v48 = vpack.c.bf16 %v687_v40, %v679_v39  ;;  %v238_v56 = vld [vmem:[%s6933_s1 + $0x5c0] sm:$0xff] }
  0x29   :  { %v239_v47 = vld [vmem:[%s6933_s1 + $0x5c8] sm:$0xff]  ;;  %2630 = vmatpush1.bf16.msra.mxu0 %v2629_v46  ;;  %v694_v61 = vld [vmem:[%s6933_s1 + $0x1400] sm:$0xff]  ;;  %v2521_v1 = vpack.c.bf16 %v238_v56, %v230_v55 }
  0x2a   :  { %v695_v51 = vld [vmem:[%s6933_s1 + $0x1408] sm:$0xff]  ;;  %2514 = vmatpush1.bf16.msra.mxu1 %v2513_v41  ;;  %v2519_v54 = vpack.c.bf16 %v239_v47, %v231_v45  ;;  %2632 = vmatprep.subr.bf16.mxu0 %v2631_v48  ;;  %v702_v62 = vld [vmem:[%s6933_s1 + $0x1440] sm:$0xff] }
  0x2b   :  { %v703_v52 = vld [vmem:[%s6933_s1 + $0x1448] sm:$0xff]  ;;  %2516 = vmatprep.subr.bf16.mxu1 %v2515_v42  ;;  %v246_v3 = vld [vmem:[%s6933_s1 + $0x600] sm:$0xff]  ;;  %v2637_v6 = vpack.c.bf16 %v702_v62, %v694_v61 }
  0x2c   :  { %v247_v57 = vld [vmem:[%s6933_s1 + $0x608] sm:$0xff]  ;;  %v2635_v60 = vpack.c.bf16 %v703_v52, %v695_v51  ;;  %v254_v4 = vld [vmem:[%s6933_s1 + $0x640] sm:$0xff] }
  0x2d   :  { %v255_v59 = vld [vmem:[%s6933_s1 + $0x648] sm:$0xff]  ;;  %2634 = vmatpush1.bf16.msra.mxu0 %v2633_v58  ;;  %v710_v9 = vld [vmem:[%s6933_s1 + $0x1480] sm:$0xff]  ;;  %v2525_v13 = vpack.c.bf16 %v254_v4, %v246_v3 }
  0x2e   :  { %v711_v63 = vld [vmem:[%s6933_s1 + $0x1488] sm:$0xff]  ;;  %2518 = vmatpush1.bf16.msra.mxu1 %v2517_v53  ;;  %v2523_v2 = vpack.c.bf16 %v255_v59, %v247_v57  ;;  %2636 = vmatprep.subr.bf16.mxu0 %v2635_v60  ;;  %v718_v10 = vld [vmem:[%s6933_s1 + $0x14c0] sm:$0xff] }
  0x2f   :  { %v719_v0 = vld [vmem:[%s6933_s1 + $0x14c8] sm:$0xff]  ;;  %2520 = vmatprep.subr.bf16.mxu1 %v2519_v54  ;;  %v262_v15 = vld [vmem:[%s6933_s1 + $0x680] sm:$0xff]  ;;  %v2641_v18 = vpack.c.bf16 %v718_v10, %v710_v9 }
  0x30   :  { %v263_v5 = vld [vmem:[%s6933_s1 + $0x688] sm:$0xff]  ;;  %v2639_v8 = vpack.c.bf16 %v719_v0, %v711_v63  ;;  %v270_v16 = vld [vmem:[%s6933_s1 + $0x6c0] sm:$0xff] }
  0x31   :  { %v271_v7 = vld [vmem:[%s6933_s1 + $0x6c8] sm:$0xff]  ;;  %2638 = vmatpush1.bf16.msra.mxu0 %v2637_v6  ;;  %v726_v21 = vld [vmem:[%s6933_s1 + $0x1500] sm:$0xff]  ;;  %v2529_v25 = vpack.c.bf16 %v270_v16, %v262_v15 }
  0x32   :  { %v727_v11 = vld [vmem:[%s6933_s1 + $0x1508] sm:$0xff]  ;;  %2522 = vmatpush1.bf16.msra.mxu1 %v2521_v1  ;;  %v2527_v14 = vpack.c.bf16 %v271_v7, %v263_v5  ;;  %2640 = vmatprep.subr.bf16.mxu0 %v2639_v8  ;;  %v734_v22 = vld [vmem:[%s6933_s1 + $0x1540] sm:$0xff] }
  0x33   :  { %v735_v12 = vld [vmem:[%s6933_s1 + $0x1548] sm:$0xff]  ;;  %2524 = vmatprep.subr.bf16.mxu1 %v2523_v2  ;;  %v278_v28 = vld [vmem:[%s6933_s1 + $0x700] sm:$0xff]  ;;  %v2645_v31 = vpack.c.bf16 %v734_v22, %v726_v21 }
  0x34   :  { %v279_v17 = vld [vmem:[%s6933_s1 + $0x708] sm:$0xff]  ;;  %v2643_v20 = vpack.c.bf16 %v735_v12, %v727_v11  ;;  %v286_v29 = vld [vmem:[%s6933_s1 + $0x740] sm:$0xff] }
  0x35   :  { %v287_v19 = vld [vmem:[%s6933_s1 + $0x748] sm:$0xff]  ;;  %2642 = vmatpush1.bf16.msra.mxu0 %v2641_v18  ;;  %v742_v34 = vld [vmem:[%s6933_s1 + $0x1580] sm:$0xff]  ;;  %v2533_v38 = vpack.c.bf16 %v286_v29, %v278_v28 }
  0x36   :  { %v743_v23 = vld [vmem:[%s6933_s1 + $0x1588] sm:$0xff]  ;;  %2526 = vmatpush1.bf16.msra.mxu1 %v2525_v13  ;;  %v2531_v27 = vpack.c.bf16 %v287_v19, %v279_v17  ;;  %2644 = vmatprep.subr.bf16.mxu0 %v2643_v20  ;;  %v750_v35 = vld [vmem:[%s6933_s1 + $0x15c0] sm:$0xff] }
  0x37   :  { %v751_v24 = vld [vmem:[%s6933_s1 + $0x15c8] sm:$0xff]  ;;  %2528 = vmatprep.subr.bf16.mxu1 %v2527_v14  ;;  %v294_v41 = vld [vmem:[%s6933_s1 + $0x780] sm:$0xff]  ;;  %v2649_v44 = vpack.c.bf16 %v750_v35, %v742_v34  ;;  %v4080_v35 = vld [vmem:[%s6934_s0 + $0x18] sm:$0xff] }
  0x38   :  { %v295_v30 = vld [vmem:[%s6933_s1 + $0x788] sm:$0xff]  ;;  %v2647_v33 = vpack.c.bf16 %v751_v24, %v743_v23  ;;  %v302_v42 = vld [vmem:[%s6933_s1 + $0x7c0] sm:$0xff] }
  0x39   :  { %v303_v32 = vld [vmem:[%s6933_s1 + $0x7c8] sm:$0xff]  ;;  %2646 = vmatpush1.bf16.msra.mxu0 %v2645_v31  ;;  %v758_v47 = vld [vmem:[%s6933_s1 + $0x1600] sm:$0xff]  ;;  %v2537_v51 = vpack.c.bf16 %v302_v42, %v294_v41 }
  0x3a   :  { %v759_v36 = vld [vmem:[%s6933_s1 + $0x1608] sm:$0xff]  ;;  %2530 = vmatpush1.bf16.msra.mxu1 %v2529_v25  ;;  %v2535_v40 = vpack.c.bf16 %v303_v32, %v295_v30  ;;  %2648 = vmatprep.subr.bf16.mxu0 %v2647_v33  ;;  %v766_v48 = vld [vmem:[%s6933_s1 + $0x1640] sm:$0xff] }
  0x3b   :  { %v767_v37 = vld [vmem:[%s6933_s1 + $0x1648] sm:$0xff]  ;;  %2532 = vmatprep.subr.bf16.mxu1 %v2531_v27  ;;  %v310_v53 = vld [vmem:[%s6933_s1 + $0x800] sm:$0xff]  ;;  %v2653_v56 = vpack.c.bf16 %v766_v48, %v758_v47 }
  0x3c   :  { %v53_v39 = vld [vmem:[%s6934_s0 + $0x28] sm:$0xff]  ;;  %v2651_v46 = vpack.c.bf16 %v767_v37, %v759_v36  ;;  %v318_v54 = vld [vmem:[%s6933_s1 + $0x840] sm:$0xff] }
  0x3d   :  { %v311_v43 = vld [vmem:[%s6933_s1 + $0x808] sm:$0xff]  ;;  %1028 = vmatprep.mubr.f32.mxu0 %v53_v39  ;;  %2650 = vmatpush1.bf16.msra.mxu0 %v2649_v44  ;;  %v774_v59 = vld [vmem:[%s6933_s1 + $0x1680] sm:$0xff]  ;;  %v2541_v0 = vpack.c.bf16 %v318_v54, %v310_v53 }
  0x3e   :  { %v319_v45 = vld [vmem:[%s6933_s1 + $0x848] sm:$0xff]  ;;  %2534 = vmatpush1.bf16.msra.mxu1 %v2533_v38  ;;  %2652 = vmatprep.subr.bf16.mxu0 %v2651_v46  ;;  %v782_v60 = vld [vmem:[%s6933_s1 + $0x16c0] sm:$0xff] }
  0x3f   :  { %v775_v49 = vld [vmem:[%s6933_s1 + $0x1688] sm:$0xff]  ;;  %2536 = vmatprep.subr.bf16.mxu1 %v2535_v40  ;;  %v2539_v52 = vpack.c.bf16 %v319_v45, %v311_v43  ;;  %v4008_v63 = vld [vmem:[%s6934_s0] sm:$0xff]  ;;  %v2657_v5 = vpack.c.bf16 %v782_v60, %v774_v59 }
  0x40   :  { %v783_v50 = vld [vmem:[%s6933_s1 + $0x16c8] sm:$0xff]  ;;  %v326_v2 = vld [vmem:[%s6933_s1 + $0x880] sm:$0xff] }
  0x41   :  { %v327_v55 = vld [vmem:[%s6933_s1 + $0x888] sm:$0xff]  ;;  %v2655_v58 = vpack.c.bf16 %v783_v50, %v775_v49  ;;  %v334_v3 = vld [vmem:[%s6933_s1 + $0x8c0] sm:$0xff]  ;;  %2654 = vmatpush1.bf16.msra.mxu0 %v2653_v56 }
  0x42   :  { %v335_v57 = vld [vmem:[%s6933_s1 + $0x8c8] sm:$0xff]  ;;  %2538 = vmatpush1.bf16.msra.mxu1 %v2537_v51  ;;  %v790_v8 = vld [vmem:[%s6933_s1 + $0x1700] sm:$0xff]  ;;  %v2545_v12 = vpack.c.bf16 %v334_v3, %v326_v2 }
  0x43   :  { %v791_v61 = vld [vmem:[%s6933_s1 + $0x1708] sm:$0xff]  ;;  %2540 = vmatprep.subr.bf16.mxu1 %v2539_v52  ;;  %v2543_v1 = vpack.c.bf16 %v335_v57, %v327_v55  ;;  %2656 = vmatprep.subr.bf16.mxu0 %v2655_v58  ;;  %v798_v9 = vld [vmem:[%s6933_s1 + $0x1740] sm:$0xff] }
  0x44   :  { %v799_v62 = vld [vmem:[%s6933_s1 + $0x1748] sm:$0xff]  ;;  %v342_v14 = vld [vmem:[%s6933_s1 + $0x900] sm:$0xff]  ;;  %v2661_v17 = vpack.c.bf16 %v798_v9, %v790_v8 }
  0x45   :  { %v343_v4 = vld [vmem:[%s6933_s1 + $0x908] sm:$0xff]  ;;  %v2659_v7 = vpack.c.bf16 %v799_v62, %v791_v61  ;;  %887 = vmatmul.mubr.f32.vlgmr.msra.gmra.mrb[0].mxu1 %v4008_v63  ;;  %v350_v15 = vld [vmem:[%s6933_s1 + $0x940] sm:$0xff]  ;;  %2658 = vmatpush1.bf16.msra.mxu0 %v2657_v5 }
  0x46   :  { %v351_v6 = vld [vmem:[%s6933_s1 + $0x948] sm:$0xff]  ;;  %2542 = vmatpush1.bf16.msra.mxu1 %v2541_v0  ;;  %v806_v20 = vld [vmem:[%s6933_s1 + $0x1780] sm:$0xff]  ;;  %v2549_v24 = vpack.c.bf16 %v350_v15, %v342_v14  ;;  %957 = vmatprep.mubr.f32.mxu1 %v4080_v35 }
  0x47   :  { %v807_v10 = vld [vmem:[%s6933_s1 + $0x1788] sm:$0xff]  ;;  %2544 = vmatprep.subr.bf16.mxu1 %v2543_v1  ;;  %v2547_v13 = vpack.c.bf16 %v351_v6, %v343_v4  ;;  %2660 = vmatprep.subr.bf16.mxu0 %v2659_v7  ;;  %v814_v21 = vld [vmem:[%s6933_s1 + $0x17c0] sm:$0xff] }
  0x48   :  { %v815_v11 = vld [vmem:[%s6933_s1 + $0x17c8] sm:$0xff]  ;;  %v358_v25 = vld [vmem:[%s6933_s1 + $0x980] sm:$0xff]  ;;  %v2665_v31 = vpack.c.bf16 %v814_v21, %v806_v20 }
  0x49   :  { %v359_v16 = vld [vmem:[%s6933_s1 + $0x988] sm:$0xff]  ;;  %v2663_v19 = vpack.c.bf16 %v815_v11, %v807_v10  ;;  %v366_v28 = vld [vmem:[%s6933_s1 + $0x9c0] sm:$0xff]  ;;  %2662 = vmatpush1.bf16.msra.mxu0 %v2661_v17 }
  0x4a   :  { %v367_v18 = vld [vmem:[%s6933_s1 + $0x9c8] sm:$0xff]  ;;  %2546 = vmatpush1.bf16.msra.mxu1 %v2545_v12  ;;  %v58_v33 = vld [vmem:[%s6933_s1 + $0x20] sm:$0xff]  ;;  %v2553_v38 = vpack.c.bf16 %v366_v28, %v358_v25 }
  0x4b   :  { %v59_v22 = vld [vmem:[%s6933_s1 + $0x28] sm:$0xff]  ;;  %2548 = vmatprep.subr.bf16.mxu1 %v2547_v13  ;;  %v2551_v27 = vpack.c.bf16 %v367_v18, %v359_v16  ;;  %2664 = vmatprep.subr.bf16.mxu0 %v2663_v19  ;;  %v66_v34 = vld [vmem:[%s6933_s1 + $0x60] sm:$0xff] }
  0x4c   :  { %v67_v23 = vld [vmem:[%s6933_s1 + $0x68] sm:$0xff]  ;;  %v374_v39 = vld [vmem:[%s6933_s1 + $0xa00] sm:$0xff]  ;;  %v2861_v44 = vpack.c.bf16 %v66_v34, %v58_v33 }
  0x4d   :  { %v375_v29 = vld [vmem:[%s6933_s1 + $0xa08] sm:$0xff]  ;;  %v2859_v32 = vpack.c.bf16 %v67_v23, %v59_v22  ;;  %v382_v41 = vld [vmem:[%s6933_s1 + $0xa40] sm:$0xff]  ;;  %2666 = vmatpush1.bf16.msra.mxu0 %v2665_v31 }
  0x4e   :  { %v383_v30 = vld [vmem:[%s6933_s1 + $0xa48] sm:$0xff]  ;;  %2550 = vmatpush1.bf16.msra.mxu1 %v2549_v24  ;;  %v52_v43 = vld [vmem:[%s6934_s0 + $0x20] sm:$0xff]  ;;  %v2557_v51 = vpack.c.bf16 %v382_v41, %v374_v39 }
  0x4f   :  { %v75_v36 = vld [vmem:[%s6933_s1 + $0xa8] sm:$0xff]  ;;  %2552 = vmatprep.subr.bf16.mxu1 %v2551_v27  ;;  %v2555_v40 = vpack.c.bf16 %v383_v30, %v375_v29  ;;  %2860 = vmatprep.subr.bf16.mxu0 %v2859_v32  ;;  %v74_v47 = vld [vmem:[%s6933_s1 + $0xa0] sm:$0xff] }
  0x50   :  { %v83_v37 = vld [vmem:[%s6933_s1 + $0xe8] sm:$0xff]  ;;  %v82_v48 = vld [vmem:[%s6933_s1 + $0xe0] sm:$0xff]  ;;  %1029 = vmatmul.mubr.f32.vlgmr.msra.gmra.mrb[0].mxu0 %v52_v43 }
  0x51   :  { %v391_v42 = vld [vmem:[%s6933_s1 + $0xa88] sm:$0xff]  ;;  %v2863_v46 = vpack.c.bf16 %v83_v37, %v75_v36  ;;  %v390_v53 = vld [vmem:[%s6933_s1 + $0xa80] sm:$0xff]  ;;  %2862 = vmatpush1.bf16.msra.mxu0 %v2861_v44  ;;  %v2865_v56 = vpack.c.bf16 %v82_v48, %v74_v47  ;;  %1312 = vmatprep.mubr.f32.mxu0 %v3801_v26 }
  0x52   :  { %v399_v45 = vld [vmem:[%s6933_s1 + $0xac8] sm:$0xff]  ;;  %2554 = vmatpush1.bf16.msra.mxu1 %v2553_v38  ;;  %v398_v54 = vld [vmem:[%s6933_s1 + $0xac0] sm:$0xff] }
  0x53   :  { %v91_v49 = vld [vmem:[%s6933_s1 + $0x128] sm:$0xff]  ;;  %2556 = vmatprep.subr.bf16.mxu1 %v2555_v40  ;;  %v2559_v52 = vpack.c.bf16 %v399_v45, %v391_v42  ;;  %2864 = vmatprep.subr.bf16.mxu0 %v2863_v46  ;;  %v90_v59 = vld [vmem:[%s6933_s1 + $0x120] sm:$0xff]  ;;  %v2561_v0 = vpack.c.bf16 %v398_v54, %v390_v53 }
  0x54   :  { %v99_v50 = vld [vmem:[%s6933_s1 + $0x168] sm:$0xff]  ;;  %v98_v60 = vld [vmem:[%s6933_s1 + $0x160] sm:$0xff] }
  0x55   :  { %v407_v55 = vld [vmem:[%s6933_s1 + $0xb08] sm:$0xff]  ;;  %v2867_v58 = vpack.c.bf16 %v99_v50, %v91_v49  ;;  %v406_v2 = vld [vmem:[%s6933_s1 + $0xb00] sm:$0xff]  ;;  %2866 = vmatpush1.bf16.msra.mxu0 %v2865_v56  ;;  %v2869_v5 = vpack.c.bf16 %v98_v60, %v90_v59 }
  0x56   :  { %v415_v57 = vld [vmem:[%s6933_s1 + $0xb48] sm:$0xff]  ;;  %2558 = vmatpush1.bf16.msra.mxu1 %v2557_v51  ;;  %v414_v3 = vld [vmem:[%s6933_s1 + $0xb40] sm:$0xff] }
  0x57   :  { %v107_v61 = vld [vmem:[%s6933_s1 + $0x1a8] sm:$0xff]  ;;  %2560 = vmatprep.subr.bf16.mxu1 %v2559_v52  ;;  %v2563_v1 = vpack.c.bf16 %v415_v57, %v407_v55  ;;  %2868 = vmatprep.subr.bf16.mxu0 %v2867_v58  ;;  %v106_v8 = vld [vmem:[%s6933_s1 + $0x1a0] sm:$0xff]  ;;  %v2565_v12 = vpack.c.bf16 %v414_v3, %v406_v2 }
  0x58   :  { %v115_v62 = vld [vmem:[%s6933_s1 + $0x1e8] sm:$0xff]  ;;  %v114_v9 = vld [vmem:[%s6933_s1 + $0x1e0] sm:$0xff] }
  0x59   :  { %v423_v4 = vld [vmem:[%s6933_s1 + $0xb88] sm:$0xff]  ;;  %v2871_v7 = vpack.c.bf16 %v115_v62, %v107_v61  ;;  %v422_v14 = vld [vmem:[%s6933_s1 + $0xb80] sm:$0xff]  ;;  %2870 = vmatpush1.bf16.msra.mxu0 %v2869_v5  ;;  %v2873_v17 = vpack.c.bf16 %v114_v9, %v106_v8 }
  0x5a   :  { %v431_v6 = vld [vmem:[%s6933_s1 + $0xbc8] sm:$0xff]  ;;  %2562 = vmatpush1.bf16.msra.mxu1 %v2561_v0  ;;  %v430_v15 = vld [vmem:[%s6933_s1 + $0xbc0] sm:$0xff] }
  0x5b   :  { %v123_v10 = vld [vmem:[%s6933_s1 + $0x228] sm:$0xff]  ;;  %2564 = vmatprep.subr.bf16.mxu1 %v2563_v1  ;;  %v2567_v13 = vpack.c.bf16 %v431_v6, %v423_v4  ;;  %2872 = vmatprep.subr.bf16.mxu0 %v2871_v7  ;;  %v122_v20 = vld [vmem:[%s6933_s1 + $0x220] sm:$0xff]  ;;  %v2569_v24 = vpack.c.bf16 %v430_v15, %v422_v14 }
  0x5c   :  { %v131_v11 = vld [vmem:[%s6933_s1 + $0x268] sm:$0xff]  ;;  %v130_v21 = vld [vmem:[%s6933_s1 + $0x260] sm:$0xff] }
  0x5d   :  { %v439_v16 = vld [vmem:[%s6933_s1 + $0xc08] sm:$0xff]  ;;  %v2875_v19 = vpack.c.bf16 %v131_v11, %v123_v10  ;;  %v438_v27 = vld [vmem:[%s6933_s1 + $0xc00] sm:$0xff]  ;;  %2874 = vmatpush1.bf16.msra.mxu0 %v2873_v17  ;;  %v2877_v30 = vpack.c.bf16 %v130_v21, %v122_v20 }
  0x5e   :  { %v447_v18 = vld [vmem:[%s6933_s1 + $0xc48] sm:$0xff]  ;;  %2566 = vmatpush1.bf16.msra.mxu1 %v2565_v12  ;;  %v446_v28 = vld [vmem:[%s6933_s1 + $0xc40] sm:$0xff] }
  0x5f   :  { %v139_v22 = vld [vmem:[%s6933_s1 + $0x2a8] sm:$0xff]  ;;  %2568 = vmatprep.subr.bf16.mxu1 %v2567_v13  ;;  %v2571_v25 = vpack.c.bf16 %v447_v18, %v439_v16  ;;  %2876 = vmatprep.subr.bf16.mxu0 %v2875_v19  ;;  %v138_v33 = vld [vmem:[%s6933_s1 + $0x2a0] sm:$0xff]  ;;  %v2573_v38 = vpack.c.bf16 %v446_v28, %v438_v27 }
  0x60   :  { %v147_v23 = vld [vmem:[%s6933_s1 + $0x2e8] sm:$0xff]  ;;  %v146_v34 = vld [vmem:[%s6933_s1 + $0x2e0] sm:$0xff] }
  0x61   :  { %v455_v29 = vld [vmem:[%s6933_s1 + $0xc88] sm:$0xff]  ;;  %v2879_v32 = vpack.c.bf16 %v147_v23, %v139_v22  ;;  %v454_v40 = vld [vmem:[%s6933_s1 + $0xc80] sm:$0xff]  ;;  %2878 = vmatpush1.bf16.msra.mxu0 %v2877_v30  ;;  %v2881_v43 = vpack.c.bf16 %v146_v34, %v138_v33 }
  0x62   :  { %v463_v31 = vld [vmem:[%s6933_s1 + $0xcc8] sm:$0xff]  ;;  %2570 = vmatpush1.bf16.msra.mxu1 %v2569_v24  ;;  %v462_v41 = vld [vmem:[%s6933_s1 + $0xcc0] sm:$0xff] }
  0x63   :  { %v155_v36 = vld [vmem:[%s6933_s1 + $0x328] sm:$0xff]  ;;  %2572 = vmatprep.subr.bf16.mxu1 %v2571_v25  ;;  %v2575_v39 = vpack.c.bf16 %v463_v31, %v455_v29  ;;  %2880 = vmatprep.subr.bf16.mxu0 %v2879_v32  ;;  %v154_v46 = vld [vmem:[%s6933_s1 + $0x320] sm:$0xff]  ;;  %v2577_v50 = vpack.c.bf16 %v462_v41, %v454_v40 }
  0x64   :  { %v163_v37 = vld [vmem:[%s6933_s1 + $0x368] sm:$0xff]  ;;  %v162_v47 = vld [vmem:[%s6933_s1 + $0x360] sm:$0xff] }
  0x65   :  { %v471_v42 = vld [vmem:[%s6933_s1 + $0xd08] sm:$0xff]  ;;  %v2883_v45 = vpack.c.bf16 %v163_v37, %v155_v36  ;;  %v470_v52 = vld [vmem:[%s6933_s1 + $0xd00] sm:$0xff]  ;;  %2882 = vmatpush1.bf16.msra.mxu0 %v2881_v43  ;;  %v2885_v55 = vpack.c.bf16 %v162_v47, %v154_v46 }
  0x66   :  { %v479_v44 = vld [vmem:[%s6933_s1 + $0xd48] sm:$0xff]  ;;  %2574 = vmatpush1.bf16.msra.mxu1 %v2573_v38  ;;  %v478_v53 = vld [vmem:[%s6933_s1 + $0xd40] sm:$0xff] }
  0x67   :  { %v171_v48 = vld [vmem:[%s6933_s1 + $0x3a8] sm:$0xff]  ;;  %2576 = vmatprep.subr.bf16.mxu1 %v2575_v39  ;;  %v2579_v51 = vpack.c.bf16 %v479_v44, %v471_v42  ;;  %2884 = vmatprep.subr.bf16.mxu0 %v2883_v45  ;;  %v170_v58 = vld [vmem:[%s6933_s1 + $0x3a0] sm:$0xff]  ;;  %v2581_v62 = vpack.c.bf16 %v478_v53, %v470_v52  ;;  %v57_v53 = vld [vmem:[%s6933_s1 + $0x18] sm:$0xff] }
  0x68   :  { %v179_v49 = vld [vmem:[%s6933_s1 + $0x3e8] sm:$0xff]  ;;  %v178_v59 = vld [vmem:[%s6933_s1 + $0x3e0] sm:$0xff] }
  0x69   :  { %v487_v54 = vld [vmem:[%s6933_s1 + $0xd88] sm:$0xff]  ;;  %v2887_v57 = vpack.c.bf16 %v179_v49, %v171_v48  ;;  %v486_v1 = vld [vmem:[%s6933_s1 + $0xd80] sm:$0xff]  ;;  %2886 = vmatpush1.bf16.msra.mxu0 %v2885_v55  ;;  %v2889_v4 = vpack.c.bf16 %v178_v59, %v170_v58  ;;  %v65_v55 = vld [vmem:[%s6933_s1 + $0x58] sm:$0xff] }
  0x6a   :  { %v495_v56 = vld [vmem:[%s6933_s1 + $0xdc8] sm:$0xff]  ;;  %2578 = vmatpush1.bf16.msra.mxu1 %v2577_v50  ;;  %v494_v2 = vld [vmem:[%s6933_s1 + $0xdc0] sm:$0xff] }
  0x6b   :  { %v187_v60 = vld [vmem:[%s6933_s1 + $0x428] sm:$0xff]  ;;  %2580 = vmatprep.subr.bf16.mxu1 %v2579_v51  ;;  %v2583_v0 = vpack.c.bf16 %v495_v56, %v487_v54  ;;  %2888 = vmatprep.subr.bf16.mxu0 %v2887_v57  ;;  %v186_v7 = vld [vmem:[%s6933_s1 + $0x420] sm:$0xff]  ;;  %v2585_v11 = vpack.c.bf16 %v494_v2, %v486_v1  ;;  %v64_v1 = vld [vmem:[%s6933_s1 + $0x50] sm:$0xff] }
  0x6c   :  { %v195_v61 = vld [vmem:[%s6933_s1 + $0x468] sm:$0xff]  ;;  %v194_v8 = vld [vmem:[%s6933_s1 + $0x460] sm:$0xff]  ;;  %v73_v2 = vld [vmem:[%s6933_s1 + $0x98] sm:$0xff] }
  0x6d   :  { %v503_v3 = vld [vmem:[%s6933_s1 + $0xe08] sm:$0xff]  ;;  %v2891_v6 = vpack.c.bf16 %v195_v61, %v187_v60  ;;  %v502_v13 = vld [vmem:[%s6933_s1 + $0xe00] sm:$0xff]  ;;  %2890 = vmatpush1.bf16.msra.mxu0 %v2889_v4  ;;  %v2893_v16 = vpack.c.bf16 %v194_v8, %v186_v7  ;;  %v81_v4 = vld [vmem:[%s6933_s1 + $0xd8] sm:$0xff] }
  0x6e   :  { %v511_v5 = vld [vmem:[%s6933_s1 + $0xe48] sm:$0xff]  ;;  %2582 = vmatpush1.bf16.msra.mxu1 %v2581_v62  ;;  %v510_v14 = vld [vmem:[%s6933_s1 + $0xe40] sm:$0xff]  ;;  %v2667_v62 = vpack.c.bf16 %v65_v55, %v57_v53 }
  0x6f   :  { %v203_v9 = vld [vmem:[%s6933_s1 + $0x4a8] sm:$0xff]  ;;  %2584 = vmatprep.subr.bf16.mxu1 %v2583_v0  ;;  %v2587_v12 = vpack.c.bf16 %v511_v5, %v503_v3  ;;  %2892 = vmatprep.subr.bf16.mxu0 %v2891_v6  ;;  %v202_v19 = vld [vmem:[%s6933_s1 + $0x4a0] sm:$0xff]  ;;  %v2589_v23 = vpack.c.bf16 %v510_v14, %v502_v13  ;;  %v56_v0 = vld [vmem:[%s6933_s1 + $0x10] sm:$0xff] }
  0x70   :  { %v211_v10 = vld [vmem:[%s6933_s1 + $0x4e8] sm:$0xff]  ;;  %v210_v20 = vld [vmem:[%s6933_s1 + $0x4e0] sm:$0xff]  ;;  %v72_v13 = vld [vmem:[%s6933_s1 + $0x90] sm:$0xff] }
  0x71   :  { %v519_v15 = vld [vmem:[%s6933_s1 + $0xe88] sm:$0xff]  ;;  %v2895_v18 = vpack.c.bf16 %v211_v10, %v203_v9  ;;  %v518_v25 = vld [vmem:[%s6933_s1 + $0xe80] sm:$0xff]  ;;  %2894 = vmatpush1.bf16.msra.mxu0 %v2893_v16  ;;  %v2897_v29 = vpack.c.bf16 %v210_v20, %v202_v19  ;;  %v4408_v10 = vld [vmem:[%s6934_s0 + $0x10] sm:$0xff] }
  0x72   :  { %v527_v17 = vld [vmem:[%s6933_s1 + $0xec8] sm:$0xff]  ;;  %2586 = vmatpush1.bf16.msra.mxu1 %v2585_v11  ;;  %v526_v27 = vld [vmem:[%s6933_s1 + $0xec0] sm:$0xff]  ;;  %v2669_v11 = vpack.c.bf16 %v64_v1, %v56_v0  ;;  %v80_v14 = vld [vmem:[%s6933_s1 + $0xd0] sm:$0xff] }
  0x73   :  { %v219_v21 = vld [vmem:[%s6933_s1 + $0x528] sm:$0xff]  ;;  %2588 = vmatprep.subr.bf16.mxu1 %v2587_v12  ;;  %v2591_v24 = vpack.c.bf16 %v527_v17, %v519_v15  ;;  %2896 = vmatprep.subr.bf16.mxu0 %v2895_v18  ;;  %v218_v32 = vld [vmem:[%s6933_s1 + $0x520] sm:$0xff]  ;;  %v2593_v37 = vpack.c.bf16 %v526_v27, %v518_v25  ;;  %v2671_v12 = vpack.c.bf16 %v81_v4, %v73_v2  ;;  %v89_v15 = vld [vmem:[%s6933_s1 + $0x118] sm:$0xff] }
  0x74   :  { %v227_v22 = vld [vmem:[%s6933_s1 + $0x568] sm:$0xff]  ;;  %v226_v33 = vld [vmem:[%s6933_s1 + $0x560] sm:$0xff]  ;;  %v97_v17 = vld [vmem:[%s6933_s1 + $0x158] sm:$0xff] }
  0x75   :  { %v535_v28 = vld [vmem:[%s6933_s1 + $0xf08] sm:$0xff]  ;;  %v2899_v31 = vpack.c.bf16 %v227_v22, %v219_v21  ;;  %v534_v39 = vld [vmem:[%s6933_s1 + $0xf00] sm:$0xff]  ;;  %2898 = vmatpush1.bf16.msra.mxu0 %v2897_v29  ;;  %v2901_v42 = vpack.c.bf16 %v226_v33, %v218_v32  ;;  %v88_v25 = vld [vmem:[%s6933_s1 + $0x110] sm:$0xff] }
  0x76   :  { %v543_v30 = vld [vmem:[%s6933_s1 + $0xf48] sm:$0xff]  ;;  %2590 = vmatpush1.bf16.msra.mxu1 %v2589_v23  ;;  %v542_v40 = vld [vmem:[%s6933_s1 + $0xf40] sm:$0xff]  ;;  %v2673_v23 = vpack.c.bf16 %v80_v14, %v72_v13  ;;  %v96_v27 = vld [vmem:[%s6933_s1 + $0x150] sm:$0xff] }
  0x77   :  { %v235_v34 = vld [vmem:[%s6933_s1 + $0x5a8] sm:$0xff]  ;;  %2592 = vmatprep.subr.bf16.mxu1 %v2591_v24  ;;  %v2595_v38 = vpack.c.bf16 %v543_v30, %v535_v28  ;;  %2900 = vmatprep.subr.bf16.mxu0 %v2899_v31  ;;  %v234_v45 = vld [vmem:[%s6933_s1 + $0x5a0] sm:$0xff]  ;;  %v2597_v49 = vpack.c.bf16 %v542_v40, %v534_v39  ;;  %v2675_v24 = vpack.c.bf16 %v97_v17, %v89_v15  ;;  %v105_v28 = vld [vmem:[%s6933_s1 + $0x198] sm:$0xff] }
  0x78   :  { %v243_v36 = vld [vmem:[%s6933_s1 + $0x5e8] sm:$0xff]  ;;  %v242_v46 = vld [vmem:[%s6933_s1 + $0x5e0] sm:$0xff]  ;;  %v112_v39 = vld [vmem:[%s6933_s1 + $0x1d0] sm:$0xff] }
  0x79   :  { %v551_v41 = vld [vmem:[%s6933_s1 + $0xf88] sm:$0xff]  ;;  %v2903_v44 = vpack.c.bf16 %v243_v36, %v235_v34  ;;  %v550_v51 = vld [vmem:[%s6933_s1 + $0xf80] sm:$0xff]  ;;  %2902 = vmatpush1.bf16.msra.mxu0 %v2901_v42  ;;  %v2905_v54 = vpack.c.bf16 %v242_v46, %v234_v45  ;;  %v2677_v36 = vpack.c.bf16 %v96_v27, %v88_v25  ;;  %v121_v40 = vld [vmem:[%s6933_s1 + $0x218] sm:$0xff] }
  0x7a   :  { %v559_v43 = vld [vmem:[%s6933_s1 + $0xfc8] sm:$0xff]  ;;  %2594 = vmatpush1.bf16.msra.mxu1 %v2593_v37  ;;  %v558_v52 = vld [vmem:[%s6933_s1 + $0xfc0] sm:$0xff]  ;;  %v129_v42 = vld [vmem:[%s6933_s1 + $0x258] sm:$0xff] }
  0x7b   :  { %v251_v47 = vld [vmem:[%s6933_s1 + $0x628] sm:$0xff]  ;;  %2596 = vmatprep.subr.bf16.mxu1 %v2595_v38  ;;  %v2599_v50 = vpack.c.bf16 %v559_v43, %v551_v41  ;;  %2904 = vmatprep.subr.bf16.mxu0 %v2903_v44  ;;  %v250_v57 = vld [vmem:[%s6933_s1 + $0x620] sm:$0xff]  ;;  %v2601_v61 = vpack.c.bf16 %v558_v52, %v550_v51  ;;  %v104_v38 = vld [vmem:[%s6933_s1 + $0x190] sm:$0xff] }
  0x7c   :  { %v259_v48 = vld [vmem:[%s6933_s1 + $0x668] sm:$0xff]  ;;  %v258_v58 = vld [vmem:[%s6933_s1 + $0x660] sm:$0xff]  ;;  %v128_v51 = vld [vmem:[%s6933_s1 + $0x250] sm:$0xff] }
  0x7d   :  { %v2907_v56 = vpack.c.bf16 %v259_v48, %v251_v47  ;;  %v267_v59 = vld [vmem:[%s6933_s1 + $0x6a8] sm:$0xff]  ;;  %2906 = vmatpush1.bf16.msra.mxu0 %v2905_v54  ;;  %v2909_v3 = vpack.c.bf16 %v258_v58, %v250_v57  ;;  %v266_v6 = vld [vmem:[%s6933_s1 + $0x6a0] sm:$0xff]  ;;  %v2681_v48 = vpack.c.bf16 %v112_v39, %v104_v38  ;;  %v137_v52 = vld [vmem:[%s6933_s1 + $0x298] sm:$0xff] }
  0x7e   :  { %v275_v60 = vld [vmem:[%s6933_s1 + $0x6e8] sm:$0xff]  ;;  %2598 = vmatpush1.bf16.msra.mxu1 %v2597_v49  ;;  %v274_v7 = vld [vmem:[%s6933_s1 + $0x6e0] sm:$0xff]  ;;  %v2683_v49 = vpack.c.bf16 %v129_v42, %v121_v40  ;;  %v145_v54 = vld [vmem:[%s6933_s1 + $0x2d8] sm:$0xff] }
  0x7f   :  { %2600 = vmatprep.subr.bf16.mxu1 %v2599_v50  ;;  %2908 = vmatprep.subr.bf16.mxu0 %v2907_v56  ;;  %v2911_v5 = vpack.c.bf16 %v275_v60, %v267_v59  ;;  %v283_v8 = vld [vmem:[%s6933_s1 + $0x728] sm:$0xff]  ;;  %v2913_v16 = vpack.c.bf16 %v274_v7, %v266_v6  ;;  %v282_v19 = vld [vmem:[%s6933_s1 + $0x720] sm:$0xff]  ;;  %v120_v50 = vld [vmem:[%s6933_s1 + $0x210] sm:$0xff] }
  0x80   :  { %v291_v9 = vld [vmem:[%s6933_s1 + $0x768] sm:$0xff]  ;;  %v290_v20 = vld [vmem:[%s6933_s1 + $0x760] sm:$0xff]  ;;  %v2685_v60 = vpack.c.bf16 %v128_v51, %v120_v50  ;;  %v144_v0 = vld [vmem:[%s6933_s1 + $0x2d0] sm:$0xff] }
  0x81   :  { %2910 = vmatpush1.bf16.msra.mxu0 %v2909_v3  ;;  %v2915_v18 = vpack.c.bf16 %v291_v9, %v283_v8  ;;  %v299_v21 = vld [vmem:[%s6933_s1 + $0x7a8] sm:$0xff]  ;;  %v2917_v29 = vpack.c.bf16 %v290_v20, %v282_v19  ;;  %v298_v31 = vld [vmem:[%s6933_s1 + $0x7a0] sm:$0xff]  ;;  %v153_v1 = vld [vmem:[%s6933_s1 + $0x318] sm:$0xff] }
  0x82   :  { %2602 = vmatpush1.bf16.msra.mxu1 %v2601_v61  ;;  %2912 = vmatprep.subr.bf16.mxu0 %v2911_v5  ;;  %v307_v22 = vld [vmem:[%s6933_s1 + $0x7e8] sm:$0xff]  ;;  %v306_v32 = vld [vmem:[%s6933_s1 + $0x7e0] sm:$0xff]  ;;  %v2687_v61 = vpack.c.bf16 %v145_v54, %v137_v52  ;;  %v169_v13 = vld [vmem:[%s6933_s1 + $0x398] sm:$0xff] }
  0x83   :  { %2668 = vmatprep.subr.bf16.mxu1 %v2667_v62  ;;  %v2919_v30 = vpack.c.bf16 %v307_v22, %v299_v21  ;;  %v315_v33 = vld [vmem:[%s6933_s1 + $0x828] sm:$0xff]  ;;  %v2921_v41 = vpack.c.bf16 %v306_v32, %v298_v31  ;;  %v314_v44 = vld [vmem:[%s6933_s1 + $0x820] sm:$0xff]  ;;  %v136_v62 = vld [vmem:[%s6933_s1 + $0x290] sm:$0xff] }
  0x84   :  { %v323_v34 = vld [vmem:[%s6933_s1 + $0x868] sm:$0xff]  ;;  %v322_v45 = vld [vmem:[%s6933_s1 + $0x860] sm:$0xff]  ;;  %v2689_v8 = vpack.c.bf16 %v144_v0, %v136_v62  ;;  %v177_v15 = vld [vmem:[%s6933_s1 + $0x3d8] sm:$0xff] }
  0x85   :  { %958 = vmatmul.mubr.f32.vlgmr.msra.gmra.mrb[0].mxu1 %v4408_v10  ;;  %2914 = vmatpush1.bf16.msra.mxu0 %v2913_v16  ;;  %v2923_v43 = vpack.c.bf16 %v323_v34, %v315_v33  ;;  %v331_v46 = vld [vmem:[%s6933_s1 + $0x8a8] sm:$0xff]  ;;  %v2925_v53 = vpack.c.bf16 %v322_v45, %v314_v44  ;;  %v330_v56 = vld [vmem:[%s6933_s1 + $0x8a0] sm:$0xff]  ;;  %v2695_v22 = vpack.c.bf16 %v177_v15, %v169_v13  ;;  %v185_v25 = vld [vmem:[%s6933_s1 + $0x418] sm:$0xff] }
  0x86   :  { %2670 = vmatpush1.bf16.msra.mxu1 %v2669_v11  ;;  %1099 = vmatprep.mubr.f32.mxu1 %v3801_v26  ;;  %v113_v26 = vld [vmem:[%s6933_s1 + $0x1d8] sm:$0xff]  ;;  %v339_v47 = vld [vmem:[%s6933_s1 + $0x8e8] sm:$0xff]  ;;  %v338_v57 = vld [vmem:[%s6933_s1 + $0x8e0] sm:$0xff] }
  0x87   :  { %2672 = vmatprep.subr.bf16.mxu1 %v2671_v12  ;;  %2916 = vmatprep.subr.bf16.mxu0 %v2915_v18  ;;  %v2679_v37 = vpack.c.bf16 %v113_v26, %v105_v28  ;;  %v2927_v55 = vpack.c.bf16 %v339_v47, %v331_v46  ;;  %v347_v58 = vld [vmem:[%s6933_s1 + $0x928] sm:$0xff]  ;;  %v2929_v2 = vpack.c.bf16 %v338_v57, %v330_v56  ;;  %v346_v4 = vld [vmem:[%s6933_s1 + $0x920] sm:$0xff]  ;;  %v152_v11 = vld [vmem:[%s6933_s1 + $0x310] sm:$0xff] }
  0x88   :  { %v355_v59 = vld [vmem:[%s6933_s1 + $0x968] sm:$0xff]  ;;  %v354_v5 = vld [vmem:[%s6933_s1 + $0x960] sm:$0xff]  ;;  %v160_v12 = vld [vmem:[%s6933_s1 + $0x350] sm:$0xff] }
  0x89   :  { %2918 = vmatpush1.bf16.msra.mxu0 %v2917_v29  ;;  %v2931_v3 = vpack.c.bf16 %v355_v59, %v347_v58  ;;  %v363_v6 = vld [vmem:[%s6933_s1 + $0x9a8] sm:$0xff]  ;;  %v2933_v14 = vpack.c.bf16 %v354_v5, %v346_v4  ;;  %v362_v17 = vld [vmem:[%s6933_s1 + $0x9a0] sm:$0xff]  ;;  %v2693_v21 = vpack.c.bf16 %v160_v12, %v152_v11  ;;  %v193_v28 = vld [vmem:[%s6933_s1 + $0x458] sm:$0xff] }
  0x8a   :  { %2674 = vmatpush1.bf16.msra.mxu1 %v2673_v23  ;;  %2920 = vmatprep.subr.bf16.mxu0 %v2919_v30  ;;  %v371_v7 = vld [vmem:[%s6933_s1 + $0x9e8] sm:$0xff]  ;;  %v370_v18 = vld [vmem:[%s6933_s1 + $0x9e0] sm:$0xff]  ;;  %v168_v23 = vld [vmem:[%s6933_s1 + $0x390] sm:$0xff]  ;;  %v2699_v34 = vpack.c.bf16 %v193_v28, %v185_v25 }
  0x8b   :  { %2676 = vmatprep.subr.bf16.mxu1 %v2675_v24  ;;  %v2935_v16 = vpack.c.bf16 %v371_v7, %v363_v6  ;;  %v379_v19 = vld [vmem:[%s6933_s1 + $0xa28] sm:$0xff]  ;;  %v176_v24 = vld [vmem:[%s6933_s1 + $0x3d0] sm:$0xff]  ;;  %v2937_v27 = vpack.c.bf16 %v370_v18, %v362_v17  ;;  %v378_v26 = vld [vmem:[%s6933_s1 + $0xa20] sm:$0xff] }
  0x8c   :  { %v387_v20 = vld [vmem:[%s6933_s1 + $0xa68] sm:$0xff]  ;;  %v386_v30 = vld [vmem:[%s6933_s1 + $0xa60] sm:$0xff]  ;;  %v2697_v33 = vpack.c.bf16 %v176_v24, %v168_v23  ;;  %v201_v38 = vld [vmem:[%s6933_s1 + $0x498] sm:$0xff] }
  0x8d   :  { %2922 = vmatpush1.bf16.msra.mxu0 %v2921_v41  ;;  %v2939_v29 = vpack.c.bf16 %v387_v20, %v379_v19  ;;  %v395_v31 = vld [vmem:[%s6933_s1 + $0xaa8] sm:$0xff]  ;;  %v2941_v39 = vpack.c.bf16 %v386_v30, %v378_v26  ;;  %v209_v40 = vld [vmem:[%s6933_s1 + $0x4d8] sm:$0xff]  ;;  %v394_v42 = vld [vmem:[%s6933_s1 + $0xaa0] sm:$0xff] }
  0x8e   :  { %2678 = vmatpush1.bf16.msra.mxu1 %v2677_v36  ;;  %2924 = vmatprep.subr.bf16.mxu0 %v2923_v43  ;;  %v403_v32 = vld [vmem:[%s6933_s1 + $0xae8] sm:$0xff]  ;;  %v184_v36 = vld [vmem:[%s6933_s1 + $0x410] sm:$0xff]  ;;  %v402_v43 = vld [vmem:[%s6933_s1 + $0xae0] sm:$0xff]  ;;  %v2703_v47 = vpack.c.bf16 %v209_v40, %v201_v38 }
  0x8f   :  { %2680 = vmatprep.subr.bf16.mxu1 %v2679_v37  ;;  %v192_v37 = vld [vmem:[%s6933_s1 + $0x450] sm:$0xff]  ;;  %v2943_v41 = vpack.c.bf16 %v403_v32, %v395_v31  ;;  %v411_v44 = vld [vmem:[%s6933_s1 + $0xb28] sm:$0xff]  ;;  %v217_v50 = vld [vmem:[%s6933_s1 + $0x518] sm:$0xff]  ;;  %v2945_v51 = vpack.c.bf16 %v402_v43, %v394_v42 }
  0x90   :  { %1313 = vmatmul.mubr.f32.vlgmr.msra.gmra.mrb[2].mxu0 %v4008_v63  ;;  %v161_v63 = vld [vmem:[%s6933_s1 + $0x358] sm:$0xff]  ;;  %v419_v45 = vld [vmem:[%s6933_s1 + $0xb68] sm:$0xff]  ;;  %v2701_v46 = vpack.c.bf16 %v192_v37, %v184_v36  ;;  %v410_v54 = vld [vmem:[%s6933_s1 + $0xb20] sm:$0xff] }
  0x91   :  { %2926 = vmatpush1.bf16.msra.mxu0 %v2925_v53  ;;  %1383 = vmatprep.mubr.f32.mxu0 %v4080_v35  ;;  %v2691_v9 = vpack.c.bf16 %v161_v63, %v153_v1  ;;  %v225_v52 = vld [vmem:[%s6933_s1 + $0x558] sm:$0xff]  ;;  %v2947_v53 = vpack.c.bf16 %v419_v45, %v411_v44  ;;  %v427_v56 = vld [vmem:[%s6933_s1 + $0xba8] sm:$0xff]  ;;  %v426_v63 = vld [vmem:[%s6933_s1 + $0xba0] sm:$0xff] }
  0x92   :  { %2682 = vmatpush1.bf16.msra.mxu1 %v2681_v48  ;;  %2928 = vmatprep.subr.bf16.mxu0 %v2927_v55  ;;  %v200_v48 = vld [vmem:[%s6933_s1 + $0x490] sm:$0xff]  ;;  %v418_v55 = vld [vmem:[%s6933_s1 + $0xb60] sm:$0xff]  ;;  %v435_v57 = vld [vmem:[%s6933_s1 + $0xbe8] sm:$0xff]  ;;  %v2707_v59 = vpack.c.bf16 %v225_v52, %v217_v50 }
  0x93   :  { %2684 = vmatprep.subr.bf16.mxu1 %v2683_v49  ;;  %v208_v49 = vld [vmem:[%s6933_s1 + $0x4d0] sm:$0xff]  ;;  %v233_v62 = vld [vmem:[%s6933_s1 + $0x598] sm:$0xff]  ;;  %v2949_v0 = vpack.c.bf16 %v418_v55, %v410_v54  ;;  %v443_v4 = vld [vmem:[%s6933_s1 + $0xc28] sm:$0xff] }
  0x94   :  { %v2705_v58 = vpack.c.bf16 %v208_v49, %v200_v48  ;;  %v241_v1 = vld [vmem:[%s6933_s1 + $0x5d8] sm:$0xff]  ;;  %v451_v5 = vld [vmem:[%s6933_s1 + $0xc68] sm:$0xff]  ;;  %v442_v15 = vld [vmem:[%s6933_s1 + $0xc20] sm:$0xff] }
  0x95   :  { %2930 = vmatpush1.bf16.msra.mxu0 %v2929_v2  ;;  %v2951_v2 = vpack.c.bf16 %v435_v57, %v427_v56  ;;  %v2711_v7 = vpack.c.bf16 %v241_v1, %v233_v62  ;;  %v249_v11 = vld [vmem:[%s6933_s1 + $0x618] sm:$0xff]  ;;  %v459_v17 = vld [vmem:[%s6933_s1 + $0xca8] sm:$0xff]  ;;  %v458_v28 = vld [vmem:[%s6933_s1 + $0xca0] sm:$0xff] }
  0x96   :  { %2686 = vmatpush1.bf16.msra.mxu1 %v2685_v60  ;;  %2932 = vmatprep.subr.bf16.mxu0 %v2931_v3  ;;  %v216_v60 = vld [vmem:[%s6933_s1 + $0x510] sm:$0xff]  ;;  %v434_v3 = vld [vmem:[%s6933_s1 + $0xbe0] sm:$0xff]  ;;  %v257_v13 = vld [vmem:[%s6933_s1 + $0x658] sm:$0xff] }
  0x97   :  { %2688 = vmatprep.subr.bf16.mxu1 %v2687_v61  ;;  %v224_v61 = vld [vmem:[%s6933_s1 + $0x550] sm:$0xff]  ;;  %v2953_v12 = vpack.c.bf16 %v434_v3, %v426_v63  ;;  %v467_v18 = vld [vmem:[%s6933_s1 + $0xce8] sm:$0xff]  ;;  %v2715_v20 = vpack.c.bf16 %v257_v13, %v249_v11  ;;  %v265_v23 = vld [vmem:[%s6933_s1 + $0x698] sm:$0xff] }
  0x98   :  { %v2709_v6 = vpack.c.bf16 %v224_v61, %v216_v60  ;;  %v273_v25 = vld [vmem:[%s6933_s1 + $0x6d8] sm:$0xff]  ;;  %v475_v26 = vld [vmem:[%s6933_s1 + $0xd28] sm:$0xff]  ;;  %v474_v40 = vld [vmem:[%s6933_s1 + $0xd20] sm:$0xff] }
  0x99   :  { %2934 = vmatpush1.bf16.msra.mxu0 %v2933_v14  ;;  %v2955_v14 = vpack.c.bf16 %v451_v5, %v443_v4  ;;  %v483_v30 = vld [vmem:[%s6933_s1 + $0xd68] sm:$0xff]  ;;  %v2719_v32 = vpack.c.bf16 %v273_v25, %v265_v23  ;;  %v281_v36 = vld [vmem:[%s6933_s1 + $0x718] sm:$0xff]  ;;  %v490_v52 = vld [vmem:[%s6933_s1 + $0xda0] sm:$0xff] }
  0x9a   :  { %2690 = vmatpush1.bf16.msra.mxu1 %v2689_v8  ;;  %2936 = vmatprep.subr.bf16.mxu0 %v2935_v16  ;;  %v232_v8 = vld [vmem:[%s6933_s1 + $0x590] sm:$0xff]  ;;  %v450_v16 = vld [vmem:[%s6933_s1 + $0xc60] sm:$0xff]  ;;  %v289_v38 = vld [vmem:[%s6933_s1 + $0x758] sm:$0xff] }
  0x9b   :  { %2692 = vmatprep.subr.bf16.mxu1 %v2691_v9  ;;  %v240_v9 = vld [vmem:[%s6933_s1 + $0x5d0] sm:$0xff]  ;;  %v2957_v24 = vpack.c.bf16 %v450_v16, %v442_v15  ;;  %v491_v42 = vld [vmem:[%s6933_s1 + $0xda8] sm:$0xff]  ;;  %v2723_v45 = vpack.c.bf16 %v289_v38, %v281_v36  ;;  %v297_v48 = vld [vmem:[%s6933_s1 + $0x798] sm:$0xff] }
  0x9c   :  { %v2713_v19 = vpack.c.bf16 %v240_v9, %v232_v8  ;;  %v499_v43 = vld [vmem:[%s6933_s1 + $0xde8] sm:$0xff]  ;;  %v305_v50 = vld [vmem:[%s6933_s1 + $0x7d8] sm:$0xff]  ;;  %v506_v1 = vld [vmem:[%s6933_s1 + $0xe20] sm:$0xff] }
  0x9d   :  { %2938 = vmatpush1.bf16.msra.mxu0 %v2937_v27  ;;  %v2959_v27 = vpack.c.bf16 %v467_v18, %v459_v17  ;;  %v507_v54 = vld [vmem:[%s6933_s1 + $0xe28] sm:$0xff]  ;;  %v2727_v57 = vpack.c.bf16 %v305_v50, %v297_v48  ;;  %v313_v60 = vld [vmem:[%s6933_s1 + $0x818] sm:$0xff]  ;;  %v522_v13 = vld [vmem:[%s6933_s1 + $0xea0] sm:$0xff] }
  0x9e   :  { %2694 = vmatpush1.bf16.msra.mxu1 %v2693_v21  ;;  %2940 = vmatprep.subr.bf16.mxu0 %v2939_v29  ;;  %v248_v21 = vld [vmem:[%s6933_s1 + $0x610] sm:$0xff]  ;;  %v466_v29 = vld [vmem:[%s6933_s1 + $0xce0] sm:$0xff]  ;;  %v515_v55 = vld [vmem:[%s6933_s1 + $0xe68] sm:$0xff] }
  0x9f   :  { %2696 = vmatprep.subr.bf16.mxu1 %v2695_v22  ;;  %v256_v22 = vld [vmem:[%s6933_s1 + $0x650] sm:$0xff]  ;;  %v2961_v37 = vpack.c.bf16 %v466_v29, %v458_v28  ;;  %v321_v62 = vld [vmem:[%s6933_s1 + $0x858] sm:$0xff]  ;;  %v523_v63 = vld [vmem:[%s6933_s1 + $0xea8] sm:$0xff] }
  0xa0   :  { %v2717_v31 = vpack.c.bf16 %v256_v22, %v248_v21  ;;  %v531_v3 = vld [vmem:[%s6933_s1 + $0xee8] sm:$0xff]  ;;  %v2731_v5 = vpack.c.bf16 %v321_v62, %v313_v60  ;;  %v329_v8 = vld [vmem:[%s6933_s1 + $0x898] sm:$0xff]  ;;  %v538_v25 = vld [vmem:[%s6933_s1 + $0xf20] sm:$0xff] }
  0xa1   :  { %2942 = vmatpush1.bf16.msra.mxu0 %v2941_v39  ;;  %v2963_v39 = vpack.c.bf16 %v483_v30, %v475_v26  ;;  %v337_v11 = vld [vmem:[%s6933_s1 + $0x8d8] sm:$0xff]  ;;  %v539_v15 = vld [vmem:[%s6933_s1 + $0xf28] sm:$0xff]  ;;  %v3556_v28 = vld [vmem:[%s6934_s0] sm:$0xff] }
  0xa2   :  { %2698 = vmatpush1.bf16.msra.mxu1 %v2697_v33  ;;  %2944 = vmatprep.subr.bf16.mxu0 %v2943_v41  ;;  %v264_v33 = vld [vmem:[%s6933_s1 + $0x690] sm:$0xff]  ;;  %v482_v41 = vld [vmem:[%s6933_s1 + $0xd60] sm:$0xff]  ;;  %v547_v16 = vld [vmem:[%s6933_s1 + $0xf68] sm:$0xff]  ;;  %v2735_v18 = vpack.c.bf16 %v337_v11, %v329_v8 }
  0xa3   :  { %2700 = vmatprep.subr.bf16.mxu1 %v2699_v34  ;;  %v272_v34 = vld [vmem:[%s6933_s1 + $0x6d0] sm:$0xff]  ;;  %v2965_v49 = vpack.c.bf16 %v482_v41, %v474_v40  ;;  %v345_v21 = vld [vmem:[%s6933_s1 + $0x918] sm:$0xff]  ;;  %v555_v29 = vld [vmem:[%s6933_s1 + $0xfa8] sm:$0xff] }
  0xa4   :  { %v2721_v44 = vpack.c.bf16 %v272_v34, %v264_v33  ;;  %v353_v23 = vld [vmem:[%s6933_s1 + $0x958] sm:$0xff]  ;;  %v563_v26 = vld [vmem:[%s6933_s1 + $0xfe8] sm:$0xff]  ;;  %v352_v33 = vld [vmem:[%s6933_s1 + $0x950] sm:$0xff] }
  0xa5   :  { %2946 = vmatpush1.bf16.msra.mxu0 %v2945_v51  ;;  %v2967_v51 = vpack.c.bf16 %v499_v43, %v491_v42  ;;  %v361_v34 = vld [vmem:[%s6933_s1 + $0x998] sm:$0xff]  ;;  %v554_v38 = vld [vmem:[%s6933_s1 + $0xfa0] sm:$0xff]  ;;  %v571_v40 = vld [vmem:[%s6933_s1 + $0x1028] sm:$0xff] }
  0xa6   :  { %2702 = vmatpush1.bf16.msra.mxu1 %v2701_v46  ;;  %2948 = vmatprep.subr.bf16.mxu0 %v2947_v53  ;;  %v280_v46 = vld [vmem:[%s6933_s1 + $0x710] sm:$0xff]  ;;  %v498_v53 = vld [vmem:[%s6933_s1 + $0xde0] sm:$0xff]  ;;  %v579_v41 = vld [vmem:[%s6933_s1 + $0x1068] sm:$0xff] }
  0xa7   :  { %2704 = vmatprep.subr.bf16.mxu1 %v2703_v47  ;;  %v288_v47 = vld [vmem:[%s6933_s1 + $0x750] sm:$0xff]  ;;  %v2969_v61 = vpack.c.bf16 %v498_v53, %v490_v52  ;;  %v385_v48 = vld [vmem:[%s6933_s1 + $0xa58] sm:$0xff]  ;;  %v570_v50 = vld [vmem:[%s6933_s1 + $0x1020] sm:$0xff] }
  0xa8   :  { %v2725_v56 = vpack.c.bf16 %v288_v47, %v280_v46  ;;  %v377_v46 = vld [vmem:[%s6933_s1 + $0xa18] sm:$0xff]  ;;  %v587_v52 = vld [vmem:[%s6933_s1 + $0x10a8] sm:$0xff]  ;;  %v586_v62 = vld [vmem:[%s6933_s1 + $0x10a0] sm:$0xff] }
  0xa9   :  { %2950 = vmatpush1.bf16.msra.mxu0 %v2949_v0  ;;  %v2971_v0 = vpack.c.bf16 %v515_v55, %v507_v54  ;;  %v595_v53 = vld [vmem:[%s6933_s1 + $0x10e8] sm:$0xff]  ;;  %v2747_v55 = vpack.c.bf16 %v385_v48, %v377_v46  ;;  %v401_v60 = vld [vmem:[%s6933_s1 + $0xad8] sm:$0xff]  ;;  %v610_v11 = vld [vmem:[%s6933_s1 + $0x1160] sm:$0xff] }
  0xaa   :  { %2706 = vmatpush1.bf16.msra.mxu1 %v2705_v58  ;;  %2952 = vmatprep.subr.bf16.mxu0 %v2951_v2  ;;  %v296_v58 = vld [vmem:[%s6933_s1 + $0x790] sm:$0xff]  ;;  %v514_v2 = vld [vmem:[%s6933_s1 + $0xe60] sm:$0xff] }
  0xab   :  { %2708 = vmatprep.subr.bf16.mxu1 %v2707_v59  ;;  %v304_v59 = vld [vmem:[%s6933_s1 + $0x7d0] sm:$0xff]  ;;  %v2973_v9 = vpack.c.bf16 %v514_v2, %v506_v1  ;;  %v603_v1 = vld [vmem:[%s6933_s1 + $0x1128] sm:$0xff]  ;;  %v658_v48 = vld [vmem:[%s6933_s1 + $0x12e0] sm:$0xff] }
  0xac   :  { %v2729_v4 = vpack.c.bf16 %v304_v59, %v296_v58  ;;  %v393_v58 = vld [vmem:[%s6933_s1 + $0xa98] sm:$0xff]  ;;  %v611_v2 = vld [vmem:[%s6933_s1 + $0x1168] sm:$0xff] }
  0xad   :  { %2954 = vmatpush1.bf16.msra.mxu0 %v2953_v12  ;;  %v2975_v12 = vpack.c.bf16 %v531_v3, %v523_v63  ;;  %v2751_v3 = vpack.c.bf16 %v401_v60, %v393_v58  ;;  %v2995_v8 = vpack.c.bf16 %v611_v2, %v603_v1  ;;  %v674_v60 = vld [vmem:[%s6933_s1 + $0x1360] sm:$0xff]  ;;  %v472_v2 = vld [vmem:[%s6933_s1 + $0xd10] sm:$0xff] }
  0xae   :  { %2710 = vmatpush1.bf16.msra.mxu1 %v2709_v6  ;;  %2956 = vmatprep.subr.bf16.mxu0 %v2955_v14  ;;  %v312_v6 = vld [vmem:[%s6933_s1 + $0x810] sm:$0xff]  ;;  %v530_v14 = vld [vmem:[%s6933_s1 + $0xee0] sm:$0xff] }
  0xaf   :  { %2712 = vmatprep.subr.bf16.mxu1 %v2711_v7  ;;  %v320_v7 = vld [vmem:[%s6933_s1 + $0x850] sm:$0xff]  ;;  %v2977_v22 = vpack.c.bf16 %v530_v14, %v522_v13  ;;  %v619_v13 = vld [vmem:[%s6933_s1 + $0x11a8] sm:$0xff] }
  0xb0   :  { %v2733_v17 = vpack.c.bf16 %v320_v7, %v312_v6  ;;  %v409_v6 = vld [vmem:[%s6933_s1 + $0xb18] sm:$0xff]  ;;  %v627_v14 = vld [vmem:[%s6933_s1 + $0x11e8] sm:$0xff] }
  0xb1   :  { %2958 = vmatpush1.bf16.msra.mxu0 %v2957_v24  ;;  %v2979_v24 = vpack.c.bf16 %v547_v16, %v539_v15 }
  0xb2   :  { %2714 = vmatpush1.bf16.msra.mxu1 %v2713_v19  ;;  %2960 = vmatprep.subr.bf16.mxu0 %v2959_v27  ;;  %v328_v19 = vld [vmem:[%s6933_s1 + $0x890] sm:$0xff]  ;;  %v546_v27 = vld [vmem:[%s6933_s1 + $0xf60] sm:$0xff] }
  0xb3   :  { %2716 = vmatprep.subr.bf16.mxu1 %v2715_v20  ;;  %v336_v20 = vld [vmem:[%s6933_s1 + $0x8d0] sm:$0xff]  ;;  %v2981_v36 = vpack.c.bf16 %v546_v27, %v538_v25  ;;  %v635_v25 = vld [vmem:[%s6933_s1 + $0x1228] sm:$0xff] }
  0xb4   :  { %v2737_v30 = vpack.c.bf16 %v336_v20, %v328_v19  ;;  %v425_v19 = vld [vmem:[%s6933_s1 + $0xb98] sm:$0xff]  ;;  %v643_v27 = vld [vmem:[%s6933_s1 + $0x1268] sm:$0xff] }
  0xb5   :  { %2962 = vmatpush1.bf16.msra.mxu0 %v2961_v37  ;;  %v2983_v37 = vpack.c.bf16 %v563_v26, %v555_v29  ;;  %v424_v26 = vld [vmem:[%s6933_s1 + $0xb90] sm:$0xff] }
  0xb6   :  { %2718 = vmatpush1.bf16.msra.mxu1 %v2717_v31  ;;  %2964 = vmatprep.subr.bf16.mxu0 %v2963_v39  ;;  %v2739_v31 = vpack.c.bf16 %v353_v23, %v345_v21  ;;  %v562_v39 = vld [vmem:[%s6933_s1 + $0xfe0] sm:$0xff]  ;;  %v433_v21 = vld [vmem:[%s6933_s1 + $0xbd8] sm:$0xff] }
  0xb7   :  { %2720 = vmatprep.subr.bf16.mxu1 %v2719_v32  ;;  %v344_v32 = vld [vmem:[%s6933_s1 + $0x910] sm:$0xff]  ;;  %v2985_v47 = vpack.c.bf16 %v562_v39, %v554_v38  ;;  %v618_v23 = vld [vmem:[%s6933_s1 + $0x11a0] sm:$0xff]  ;;  %v2759_v29 = vpack.c.bf16 %v433_v21, %v425_v19  ;;  %v659_v38 = vld [vmem:[%s6933_s1 + $0x12e8] sm:$0xff] }
  0xb8   :  { %v2741_v42 = vpack.c.bf16 %v352_v33, %v344_v32  ;;  %v449_v33 = vld [vmem:[%s6933_s1 + $0xc58] sm:$0xff]  ;;  %v706_v21 = vld [vmem:[%s6933_s1 + $0x1460] sm:$0xff] }
  0xb9   :  { %2966 = vmatpush1.bf16.msra.mxu0 %v2965_v49  ;;  %v2987_v49 = vpack.c.bf16 %v579_v41, %v571_v40  ;;  %v440_v41 = vld [vmem:[%s6933_s1 + $0xc10] sm:$0xff] }
  0xba   :  { %2722 = vmatpush1.bf16.msra.mxu1 %v2721_v44  ;;  %2968 = vmatprep.subr.bf16.mxu0 %v2967_v51  ;;  %v360_v44 = vld [vmem:[%s6933_s1 + $0x990] sm:$0xff]  ;;  %v578_v51 = vld [vmem:[%s6933_s1 + $0x1060] sm:$0xff] }
  0xbb   :  { %2724 = vmatprep.subr.bf16.mxu1 %v2723_v45  ;;  %v368_v45 = vld [vmem:[%s6933_s1 + $0x9d0] sm:$0xff]  ;;  %v2989_v59 = vpack.c.bf16 %v578_v51, %v570_v50  ;;  %v675_v50 = vld [vmem:[%s6933_s1 + $0x1368] sm:$0xff] }
  0xbc   :  { %v2745_v54 = vpack.c.bf16 %v368_v45, %v360_v44  ;;  %v465_v45 = vld [vmem:[%s6933_s1 + $0xcd8] sm:$0xff] }
  0xbd   :  { %2970 = vmatpush1.bf16.msra.mxu0 %v2969_v61  ;;  %v2991_v61 = vpack.c.bf16 %v595_v53, %v587_v52  ;;  %v456_v53 = vld [vmem:[%s6933_s1 + $0xc90] sm:$0xff] }
  0xbe   :  { %2726 = vmatpush1.bf16.msra.mxu1 %v2725_v56  ;;  %2972 = vmatprep.subr.bf16.mxu0 %v2971_v0  ;;  %v376_v56 = vld [vmem:[%s6933_s1 + $0xa10] sm:$0xff]  ;;  %v594_v0 = vld [vmem:[%s6933_s1 + $0x10e0] sm:$0xff] }
  0xbf   :  { %2728 = vmatprep.subr.bf16.mxu1 %v2727_v57  ;;  %v384_v57 = vld [vmem:[%s6933_s1 + $0xa50] sm:$0xff]  ;;  %v2993_v7 = vpack.c.bf16 %v594_v0, %v586_v62  ;;  %v691_v62 = vld [vmem:[%s6933_s1 + $0x13e8] sm:$0xff] }
  0xc0   :  { %v2749_v63 = vpack.c.bf16 %v384_v57, %v376_v56  ;;  %v481_v57 = vld [vmem:[%s6933_s1 + $0xd58] sm:$0xff] }
  0xc1   :  { %2974 = vmatpush1.bf16.msra.mxu0 %v2973_v9  ;;  %v602_v9 = vld [vmem:[%s6933_s1 + $0x1120] sm:$0xff] }
  0xc2   :  { %2730 = vmatpush1.bf16.msra.mxu1 %v2729_v4  ;;  %2976 = vmatprep.subr.bf16.mxu0 %v2975_v12  ;;  %v392_v4 = vld [vmem:[%s6933_s1 + $0xa90] sm:$0xff]  ;;  %v4920_v12 = vld [vmem:[%s6934_s0 + $0x28] sm:$0xff]  ;;  %v2997_v20 = vpack.c.bf16 %v610_v11, %v602_v9 }
  0xc3   :  { %2732 = vmatprep.subr.bf16.mxu1 %v2731_v5  ;;  %v400_v5 = vld [vmem:[%s6933_s1 + $0xad0] sm:$0xff]  ;;  %v707_v9 = vld [vmem:[%s6933_s1 + $0x1468] sm:$0xff] }
  0xc4   :  { %v2753_v15 = vpack.c.bf16 %v400_v5, %v392_v4  ;;  %v497_v5 = vld [vmem:[%s6933_s1 + $0xdd8] sm:$0xff] }
  0xc5   :  { %1100 = vmatmul.mubr.f32.vlgmr.msra.gmra.mrb[2].mxu1 %v3556_v28  ;;  %2978 = vmatpush1.bf16.msra.mxu0 %v2977_v22  ;;  %v2999_v22 = vpack.c.bf16 %v627_v14, %v619_v13  ;;  %v488_v14 = vld [vmem:[%s6933_s1 + $0xd90] sm:$0xff] }
  0xc6   :  { %2734 = vmatpush1.bf16.msra.mxu1 %v2733_v17  ;;  %1170 = vmatprep.mubr.f32.mxu1 %v4080_v35  ;;  %v369_v35 = vld [vmem:[%s6933_s1 + $0x9d8] sm:$0xff]  ;;  %v408_v17 = vld [vmem:[%s6933_s1 + $0xb10] sm:$0xff] }
  0xc7   :  { %2736 = vmatprep.subr.bf16.mxu1 %v2735_v18  ;;  %2980 = vmatprep.subr.bf16.mxu0 %v2979_v24  ;;  %v2743_v43 = vpack.c.bf16 %v369_v35, %v361_v34  ;;  %v416_v18 = vld [vmem:[%s6933_s1 + $0xb50] sm:$0xff]  ;;  %v626_v24 = vld [vmem:[%s6933_s1 + $0x11e0] sm:$0xff]  ;;  %v3003_v34 = vpack.c.bf16 %v643_v27, %v635_v25 }
  0xc8   :  { %v2757_v28 = vpack.c.bf16 %v416_v18, %v408_v17  ;;  %v3001_v32 = vpack.c.bf16 %v626_v24, %v618_v23  ;;  %v642_v35 = vld [vmem:[%s6933_s1 + $0x1260] sm:$0xff]  ;;  %v513_v18 = vld [vmem:[%s6933_s1 + $0xe58] sm:$0xff]  ;;  %v723_v23 = vld [vmem:[%s6933_s1 + $0x14e8] sm:$0xff] }
  0xc9   :  { %2982 = vmatpush1.bf16.msra.mxu0 %v2981_v36  ;;  %v634_v36 = vld [vmem:[%s6933_s1 + $0x1220] sm:$0xff]  ;;  %v504_v27 = vld [vmem:[%s6933_s1 + $0xe10] sm:$0xff] }
  0xca   :  { %2738 = vmatpush1.bf16.msra.mxu1 %v2737_v30  ;;  %2984 = vmatprep.subr.bf16.mxu0 %v2983_v37  ;;  %v432_v30 = vld [vmem:[%s6933_s1 + $0xbd0] sm:$0xff]  ;;  %v651_v37 = vld [vmem:[%s6933_s1 + $0x12a8] sm:$0xff]  ;;  %v3005_v44 = vpack.c.bf16 %v642_v35, %v634_v36 }
  0xcb   :  { %2740 = vmatprep.subr.bf16.mxu1 %v2739_v31  ;;  %v441_v31 = vld [vmem:[%s6933_s1 + $0xc18] sm:$0xff]  ;;  %v2761_v39 = vpack.c.bf16 %v432_v30, %v424_v26  ;;  %v3007_v46 = vpack.c.bf16 %v659_v38, %v651_v37  ;;  %v739_v36 = vld [vmem:[%s6933_s1 + $0x1568] sm:$0xff]  ;;  %v520_v38 = vld [vmem:[%s6933_s1 + $0xe90] sm:$0xff] }
  0xcc   :  { %v2763_v40 = vpack.c.bf16 %v449_v33, %v441_v31  ;;  %v529_v30 = vld [vmem:[%s6933_s1 + $0xed8] sm:$0xff]  ;;  %v722_v33 = vld [vmem:[%s6933_s1 + $0x14e0] sm:$0xff] }
  0xcd   :  { %2986 = vmatpush1.bf16.msra.mxu0 %v2985_v47  ;;  %v650_v47 = vld [vmem:[%s6933_s1 + $0x12a0] sm:$0xff] }
  0xce   :  { %2742 = vmatpush1.bf16.msra.mxu1 %v2741_v42  ;;  %2988 = vmatprep.subr.bf16.mxu0 %v2987_v49  ;;  %v448_v42 = vld [vmem:[%s6933_s1 + $0xc50] sm:$0xff]  ;;  %v667_v49 = vld [vmem:[%s6933_s1 + $0x1328] sm:$0xff]  ;;  %v3009_v56 = vpack.c.bf16 %v658_v48, %v650_v47 }
  0xcf   :  { %2744 = vmatprep.subr.bf16.mxu1 %v2743_v43  ;;  %v457_v43 = vld [vmem:[%s6933_s1 + $0xc98] sm:$0xff]  ;;  %v2765_v51 = vpack.c.bf16 %v448_v42, %v440_v41  ;;  %v3011_v58 = vpack.c.bf16 %v675_v50, %v667_v49  ;;  %v755_v47 = vld [vmem:[%s6933_s1 + $0x15e8] sm:$0xff]  ;;  %v536_v50 = vld [vmem:[%s6933_s1 + $0xf10] sm:$0xff] }
  0xd0   :  { %1384 = vmatmul.mubr.f32.vlgmr.msra.gmra.mrb[2].mxu0 %v4408_v10  ;;  %v417_v10 = vld [vmem:[%s6933_s1 + $0xb58] sm:$0xff]  ;;  %v2767_v52 = vpack.c.bf16 %v465_v45, %v457_v43  ;;  %v738_v45 = vld [vmem:[%s6933_s1 + $0x1560] sm:$0xff] }
  0xd1   :  { %2990 = vmatpush1.bf16.msra.mxu0 %v2989_v59  ;;  %1454 = vmatprep.mubr.f32.mxu0 %v4920_v12  ;;  %v2755_v16 = vpack.c.bf16 %v417_v10, %v409_v6  ;;  %v666_v59 = vld [vmem:[%s6933_s1 + $0x1320] sm:$0xff]  ;;  %v545_v42 = vld [vmem:[%s6933_s1 + $0xf58] sm:$0xff] }
  0xd2   :  { %2746 = vmatpush1.bf16.msra.mxu1 %v2745_v54  ;;  %2992 = vmatprep.subr.bf16.mxu0 %v2991_v61  ;;  %v464_v54 = vld [vmem:[%s6933_s1 + $0xcd0] sm:$0xff]  ;;  %v683_v61 = vld [vmem:[%s6933_s1 + $0x13a8] sm:$0xff]  ;;  %v3013_v4 = vpack.c.bf16 %v674_v60, %v666_v59  ;;  %v690_v10 = vld [vmem:[%s6933_s1 + $0x13e0] sm:$0xff] }
  0xd3   :  { %2748 = vmatprep.subr.bf16.mxu1 %v2747_v55  ;;  %v473_v55 = vld [vmem:[%s6933_s1 + $0xd18] sm:$0xff]  ;;  %v2769_v0 = vpack.c.bf16 %v464_v54, %v456_v53  ;;  %v3015_v6 = vpack.c.bf16 %v691_v62, %v683_v61  ;;  %v771_v59 = vld [vmem:[%s6933_s1 + $0x1668] sm:$0xff]  ;;  %v552_v62 = vld [vmem:[%s6933_s1 + $0xf90] sm:$0xff] }
  0xd4   :  { %v2771_v1 = vpack.c.bf16 %v481_v57, %v473_v55  ;;  %v561_v54 = vld [vmem:[%s6933_s1 + $0xfd8] sm:$0xff]  ;;  %v754_v57 = vld [vmem:[%s6933_s1 + $0x15e0] sm:$0xff] }
  0xd5   :  { %2994 = vmatpush1.bf16.msra.mxu0 %v2993_v7  ;;  %v682_v7 = vld [vmem:[%s6933_s1 + $0x13a0] sm:$0xff] }
  0xd6   :  { %2750 = vmatpush1.bf16.msra.mxu1 %v2749_v63  ;;  %2996 = vmatprep.subr.bf16.mxu0 %v2995_v8  ;;  %v480_v63 = vld [vmem:[%s6933_s1 + $0xd50] sm:$0xff]  ;;  %v699_v8 = vld [vmem:[%s6933_s1 + $0x1428] sm:$0xff]  ;;  %v3017_v17 = vpack.c.bf16 %v690_v10, %v682_v7 }
  0xd7   :  { %2752 = vmatprep.subr.bf16.mxu1 %v2751_v3  ;;  %v489_v3 = vld [vmem:[%s6933_s1 + $0xd98] sm:$0xff]  ;;  %v2773_v11 = vpack.c.bf16 %v480_v63, %v472_v2  ;;  %v3019_v19 = vpack.c.bf16 %v707_v9, %v699_v8  ;;  %v787_v7 = vld [vmem:[%s6933_s1 + $0x16e8] sm:$0xff]  ;;  %v568_v9 = vld [vmem:[%s6933_s1 + $0x1010] sm:$0xff] }
  0xd8   :  { %v2775_v13 = vpack.c.bf16 %v497_v5, %v489_v3  ;;  %v577_v63 = vld [vmem:[%s6933_s1 + $0x1058] sm:$0xff]  ;;  %v770_v5 = vld [vmem:[%s6933_s1 + $0x1660] sm:$0xff] }
  0xd9   :  { %2998 = vmatpush1.bf16.msra.mxu0 %v2997_v20  ;;  %v698_v20 = vld [vmem:[%s6933_s1 + $0x1420] sm:$0xff] }
  0xda   :  { %2754 = vmatpush1.bf16.msra.mxu1 %v2753_v15  ;;  %3000 = vmatprep.subr.bf16.mxu0 %v2999_v22  ;;  %v496_v15 = vld [vmem:[%s6933_s1 + $0xdd0] sm:$0xff]  ;;  %v715_v22 = vld [vmem:[%s6933_s1 + $0x14a8] sm:$0xff]  ;;  %v3021_v26 = vpack.c.bf16 %v706_v21, %v698_v20 }
  0xdb   :  { %2756 = vmatprep.subr.bf16.mxu1 %v2755_v16  ;;  %v505_v16 = vld [vmem:[%s6933_s1 + $0xe18] sm:$0xff]  ;;  %v2777_v24 = vpack.c.bf16 %v496_v15, %v488_v14  ;;  %v3023_v31 = vpack.c.bf16 %v723_v23, %v715_v22  ;;  %v803_v20 = vld [vmem:[%s6933_s1 + $0x1768] sm:$0xff]  ;;  %v584_v23 = vld [vmem:[%s6933_s1 + $0x1090] sm:$0xff] }
  0xdc   :  { %v2779_v25 = vpack.c.bf16 %v513_v18, %v505_v16  ;;  %v593_v15 = vld [vmem:[%s6933_s1 + $0x10d8] sm:$0xff]  ;;  %v786_v18 = vld [vmem:[%s6933_s1 + $0x16e0] sm:$0xff] }
  0xdd   :  { %3002 = vmatpush1.bf16.msra.mxu0 %v3001_v32  ;;  %v714_v32 = vld [vmem:[%s6933_s1 + $0x14a0] sm:$0xff] }
  0xde   :  { %2758 = vmatpush1.bf16.msra.mxu1 %v2757_v28  ;;  %3004 = vmatprep.subr.bf16.mxu0 %v3003_v34  ;;  %v512_v28 = vld [vmem:[%s6933_s1 + $0xe50] sm:$0xff]  ;;  %v731_v34 = vld [vmem:[%s6933_s1 + $0x1528] sm:$0xff]  ;;  %v3025_v41 = vpack.c.bf16 %v722_v33, %v714_v32 }
  0xdf   :  { %2760 = vmatprep.subr.bf16.mxu1 %v2759_v29  ;;  %v521_v29 = vld [vmem:[%s6933_s1 + $0xe98] sm:$0xff]  ;;  %v2781_v35 = vpack.c.bf16 %v512_v28, %v504_v27  ;;  %v3027_v43 = vpack.c.bf16 %v739_v36, %v731_v34  ;;  %v811_v32 = vld [vmem:[%s6933_s1 + $0x17a8] sm:$0xff] }
  0xe0   :  { %v2783_v37 = vpack.c.bf16 %v529_v30, %v521_v29  ;;  %v609_v28 = vld [vmem:[%s6933_s1 + $0x1158] sm:$0xff]  ;;  %v802_v30 = vld [vmem:[%s6933_s1 + $0x1760] sm:$0xff]  ;;  %v819_v33 = vld [vmem:[%s6933_s1 + $0x17e8] sm:$0xff] }
  0xe1   :  { %3006 = vmatpush1.bf16.msra.mxu0 %v3005_v44  ;;  %v730_v44 = vld [vmem:[%s6933_s1 + $0x1520] sm:$0xff] }
  0xe2   :  { %2762 = vmatpush1.bf16.msra.mxu1 %v2761_v39  ;;  %3008 = vmatprep.subr.bf16.mxu0 %v3007_v46  ;;  %v528_v39 = vld [vmem:[%s6933_s1 + $0xed0] sm:$0xff]  ;;  %v747_v46 = vld [vmem:[%s6933_s1 + $0x15a8] sm:$0xff]  ;;  %v3029_v53 = vpack.c.bf16 %v738_v45, %v730_v44  ;;  %v1770_v44 = vld [vmem:[%s6935_s3 + $0x18] sm:$0xff] }
  0xe3   :  { %2764 = vmatprep.subr.bf16.mxu1 %v2763_v40  ;;  %v537_v40 = vld [vmem:[%s6933_s1 + $0xf18] sm:$0xff]  ;;  %v2785_v48 = vpack.c.bf16 %v528_v39, %v520_v38  ;;  %v3031_v55 = vpack.c.bf16 %v755_v47, %v747_v46  ;;  %v616_v47 = vld [vmem:[%s6933_s1 + $0x1190] sm:$0xff] }
  0xe4   :  { %v2787_v49 = vpack.c.bf16 %v545_v42, %v537_v40  ;;  %v617_v38 = vld [vmem:[%s6933_s1 + $0x1198] sm:$0xff]  ;;  %v3047_v40 = vpack.c.bf16 %v819_v33, %v811_v32  ;;  %v818_v42 = vld [vmem:[%s6933_s1 + $0x17e0] sm:$0xff]  ;;  %v680_v33 = vld [vmem:[%s6933_s1 + $0x1390] sm:$0xff] }
  0xe5   :  { %3010 = vmatpush1.bf16.msra.mxu0 %v3009_v56  ;;  %v746_v56 = vld [vmem:[%s6933_s1 + $0x15a0] sm:$0xff] }
  0xe6   :  { %2766 = vmatpush1.bf16.msra.mxu1 %v2765_v51  ;;  %3012 = vmatprep.subr.bf16.mxu0 %v3011_v58  ;;  %v544_v51 = vld [vmem:[%s6933_s1 + $0xf50] sm:$0xff]  ;;  %v763_v58 = vld [vmem:[%s6933_s1 + $0x1628] sm:$0xff]  ;;  %v3033_v2 = vpack.c.bf16 %v754_v57, %v746_v56  ;;  %v1774_v56 = vld [vmem:[%s6935_s3 + $0x38] sm:$0xff] }
  0xe7   :  { %2768 = vmatprep.subr.bf16.mxu1 %v2767_v52  ;;  %v553_v52 = vld [vmem:[%s6933_s1 + $0xf98] sm:$0xff]  ;;  %v2789_v60 = vpack.c.bf16 %v544_v51, %v536_v50  ;;  %v3035_v3 = vpack.c.bf16 %v771_v59, %v763_v58  ;;  %v632_v59 = vld [vmem:[%s6933_s1 + $0x1210] sm:$0xff] }
  0xe8   :  { %v2791_v61 = vpack.c.bf16 %v561_v54, %v553_v52  ;;  %v641_v51 = vld [vmem:[%s6933_s1 + $0x1258] sm:$0xff]  ;;  %v1769_v54 = vld [vmem:[%s6935_s3 + $0x10] sm:$0xff] }
  0xe9   :  { %3014 = vmatpush1.bf16.msra.mxu0 %v3013_v4  ;;  %v762_v4 = vld [vmem:[%s6933_s1 + $0x1620] sm:$0xff] }
  0xea   :  { %2770 = vmatpush1.bf16.msra.mxu1 %v2769_v0  ;;  %3016 = vmatprep.subr.bf16.mxu0 %v3015_v6  ;;  %v560_v0 = vld [vmem:[%s6933_s1 + $0xfd0] sm:$0xff]  ;;  %v779_v6 = vld [vmem:[%s6933_s1 + $0x16a8] sm:$0xff]  ;;  %v3037_v14 = vpack.c.bf16 %v770_v5, %v762_v4  ;;  %v1778_v4 = vld [vmem:[%s6935_s3 + $0x58] sm:$0xff] }
  0xeb   :  { %2772 = vmatprep.subr.bf16.mxu1 %v2771_v1  ;;  %v569_v1 = vld [vmem:[%s6933_s1 + $0x1018] sm:$0xff]  ;;  %v2793_v10 = vpack.c.bf16 %v560_v0, %v552_v62  ;;  %v3039_v16 = vpack.c.bf16 %v787_v7, %v779_v6  ;;  %v5296_v6 = vld [vmem:[%s6934_s0 + $0x20] sm:$0xff] }
  0xec   :  { %v2795_v8 = vpack.c.bf16 %v577_v63, %v569_v1  ;;  %v657_v0 = vld [vmem:[%s6933_s1 + $0x12d8] sm:$0xff]  ;;  %v1773_v63 = vld [vmem:[%s6935_s3 + $0x30] sm:$0xff] }
  0xed   :  { %3018 = vmatpush1.bf16.msra.mxu0 %v3017_v17  ;;  %v778_v17 = vld [vmem:[%s6933_s1 + $0x16a0] sm:$0xff] }
  0xee   :  { %2774 = vmatpush1.bf16.msra.mxu1 %v2773_v11  ;;  %3020 = vmatprep.subr.bf16.mxu0 %v3019_v19  ;;  %v576_v11 = vld [vmem:[%s6933_s1 + $0x1050] sm:$0xff]  ;;  %v795_v19 = vld [vmem:[%s6933_s1 + $0x1728] sm:$0xff]  ;;  %v3041_v27 = vpack.c.bf16 %v786_v18, %v778_v17  ;;  %v1782_v18 = vld [vmem:[%s6935_s3 + $0x78] sm:$0xff] }
  0xef   :  { %2776 = vmatprep.subr.bf16.mxu1 %v2775_v13  ;;  %v585_v13 = vld [vmem:[%s6933_s1 + $0x1098] sm:$0xff]  ;;  %v2797_v21 = vpack.c.bf16 %v576_v11, %v568_v9  ;;  %v3043_v29 = vpack.c.bf16 %v803_v20, %v795_v19  ;;  %v1780_v17 = vld [vmem:[%s6935_s3 + $0x68] sm:$0xff] }
  0xf0   :  { %v2799_v22 = vpack.c.bf16 %v593_v15, %v585_v13  ;;  %v665_v9 = vld [vmem:[%s6933_s1 + $0x1318] sm:$0xff]  ;;  %v1775_v15 = vld [vmem:[%s6935_s3 + $0x40] sm:$0xff] }
  0xf1   :  { %3022 = vmatpush1.bf16.msra.mxu0 %v3021_v26  ;;  %v794_v26 = vld [vmem:[%s6933_s1 + $0x1720] sm:$0xff]  ;;  %v673_v13 = vld [vmem:[%s6933_s1 + $0x1358] sm:$0xff] }
  0xf2   :  { %2778 = vmatpush1.bf16.msra.mxu1 %v2777_v24  ;;  %3024 = vmatprep.subr.bf16.mxu0 %v3023_v31  ;;  %v592_v24 = vld [vmem:[%s6933_s1 + $0x10d0] sm:$0xff]  ;;  %v3045_v39 = vpack.c.bf16 %v802_v30, %v794_v26  ;;  %v2819_v20 = vpack.c.bf16 %v673_v13, %v665_v9  ;;  %v1784_v26 = vld [vmem:[%s6935_s3 + $0x88] sm:$0xff]  ;;  %v1786_v30 = vld [vmem:[%s6935_s3 + $0x98] sm:$0xff] }
  0xf3   :  { %2780 = vmatprep.subr.bf16.mxu1 %v2779_v25  ;;  %v601_v25 = vld [vmem:[%s6933_s1 + $0x1118] sm:$0xff]  ;;  %v3558_v31 = vld [vmem:[%s6934_s0 + $0x10] sm:$0xff]  ;;  %v2801_v34 = vpack.c.bf16 %v592_v24, %v584_v23 }
  0xf4   :  { %v2803_v36 = vpack.c.bf16 %v609_v28, %v601_v25  ;;  %v681_v23 = vld [vmem:[%s6933_s1 + $0x1398] sm:$0xff]  ;;  %v1779_v28 = vld [vmem:[%s6935_s3 + $0x60] sm:$0xff] }
  0xf5   :  { %3026 = vmatpush1.bf16.msra.mxu0 %v3025_v41  ;;  %v810_v41 = vld [vmem:[%s6933_s1 + $0x17a0] sm:$0xff]  ;;  %v689_v25 = vld [vmem:[%s6933_s1 + $0x13d8] sm:$0xff] }
  0xf6   :  { %2782 = vmatpush1.bf16.msra.mxu1 %v2781_v35  ;;  %3028 = vmatprep.subr.bf16.mxu0 %v3027_v43  ;;  %v600_v35 = vld [vmem:[%s6933_s1 + $0x1110] sm:$0xff]  ;;  %v1768_v43 = vld [vmem:[%s6935_s3 + $0x8] sm:$0xff]  ;;  %v3049_v50 = vpack.c.bf16 %v818_v42, %v810_v41  ;;  %v2823_v32 = vpack.c.bf16 %v689_v25, %v681_v23  ;;  %v1790_v41 = vld [vmem:[%s6935_s3 + $0xb8] sm:$0xff] }
  0xf7   :  { %2784 = vmatprep.subr.bf16.mxu1 %v2783_v37  ;;  %v608_v37 = vld [vmem:[%s6933_s1 + $0x1150] sm:$0xff]  ;;  %v3243_v52 = vpack.c.bf16 %v1770_v44, %v1768_v43 }
  0xf8   :  { %v2805_v45 = vpack.c.bf16 %v608_v37, %v600_v35  ;;  %v705_v37 = vld [vmem:[%s6933_s1 + $0x1458] sm:$0xff]  ;;  %v696_v44 = vld [vmem:[%s6933_s1 + $0x1410] sm:$0xff] }
  0xf9   :  { %3030 = vmatpush1.bf16.msra.mxu0 %v3029_v53  ;;  %v1767_v53 = vld [vmem:[%s6935_s3] sm:$0xff] }
  0xfa   :  { %2786 = vmatpush1.bf16.msra.mxu1 %v2785_v48  ;;  %3032 = vmatprep.subr.bf16.mxu0 %v3031_v55  ;;  %v624_v48 = vld [vmem:[%s6933_s1 + $0x11d0] sm:$0xff]  ;;  %v1772_v55 = vld [vmem:[%s6935_s3 + $0x28] sm:$0xff]  ;;  %v3245_v62 = vpack.c.bf16 %v1769_v54, %v1767_v53  ;;  %v1794_v53 = vld [vmem:[%s6935_s3 + $0xd8] sm:$0xff] }
  0xfb   :  { %2788 = vmatprep.subr.bf16.mxu1 %v2787_v49  ;;  %v633_v49 = vld [vmem:[%s6933_s1 + $0x1218] sm:$0xff]  ;;  %v2809_v57 = vpack.c.bf16 %v624_v48, %v616_v47  ;;  %v3247_v1 = vpack.c.bf16 %v1774_v56, %v1772_v55  ;;  %v712_v56 = vld [vmem:[%s6933_s1 + $0x1490] sm:$0xff] }
  0xfc   :  { %v2811_v58 = vpack.c.bf16 %v641_v51, %v633_v49  ;;  %v721_v48 = vld [vmem:[%s6933_s1 + $0x14d8] sm:$0xff]  ;;  %v1789_v51 = vld [vmem:[%s6935_s3 + $0xb0] sm:$0xff] }
  0xfd   :  { %3034 = vmatpush1.bf16.msra.mxu0 %v3033_v2  ;;  %v1771_v2 = vld [vmem:[%s6935_s3 + $0x20] sm:$0xff] }
  0xfe   :  { %2790 = vmatpush1.bf16.msra.mxu1 %v2789_v60  ;;  %3036 = vmatprep.subr.bf16.mxu0 %v3035_v3  ;;  %v640_v60 = vld [vmem:[%s6933_s1 + $0x1250] sm:$0xff]  ;;  %v1776_v3 = vld [vmem:[%s6935_s3 + $0x48] sm:$0xff]  ;;  %v3249_v11 = vpack.c.bf16 %v1773_v63, %v1771_v2  ;;  %v1798_v2 = vld [vmem:[%s6935_s3 + $0xf8] sm:$0xff] }
  0xff   :  { %2792 = vmatprep.subr.bf16.mxu1 %v2791_v61  ;;  %v649_v61 = vld [vmem:[%s6933_s1 + $0x1298] sm:$0xff]  ;;  %v2813_v5 = vpack.c.bf16 %v640_v60, %v632_v59 }
 0x100   :  { %v2815_v7 = vpack.c.bf16 %v657_v0, %v649_v61  ;;  %v737_v60 = vld [vmem:[%s6933_s1 + $0x1558] sm:$0xff]  ;;  %v1793_v0 = vld [vmem:[%s6935_s3 + $0xd0] sm:$0xff] }
 0x101   :  { %3038 = vmatpush1.bf16.msra.mxu0 %v3037_v14  ;;  %v3251_v14 = vpack.c.bf16 %v1778_v4, %v1776_v3 }
 0x102   :  { %2794 = vmatpush1.bf16.msra.mxu1 %v2793_v10  ;;  %3040 = vmatprep.subr.bf16.mxu0 %v3039_v16  ;;  %v648_v10 = vld [vmem:[%s6933_s1 + $0x1290] sm:$0xff] }
 0x103   :  { %2796 = vmatprep.subr.bf16.mxu1 %v2795_v8  ;;  %v656_v8 = vld [vmem:[%s6933_s1 + $0x12d0] sm:$0xff] }
 0x104   :  { %v1777_v16 = vld [vmem:[%s6935_s3 + $0x50] sm:$0xff]  ;;  %v2817_v19 = vpack.c.bf16 %v656_v8, %v648_v10  ;;  %v745_v8 = vld [vmem:[%s6933_s1 + $0x1598] sm:$0xff] }
 0x105   :  { %1171 = vmatmul.mubr.f32.vlgmr.msra.gmra.mrb[2].mxu1 %v3558_v31  ;;  %3042 = vmatpush1.bf16.msra.mxu0 %v3041_v27  ;;  %v3253_v24 = vpack.c.bf16 %v1777_v16, %v1775_v15  ;;  %v3255_v27 = vpack.c.bf16 %v1782_v18, %v1780_v17  ;;  %v736_v10 = vld [vmem:[%s6933_s1 + $0x1550] sm:$0xff]  ;;  %v1800_v16 = vld [vmem:[%s6935_s3 + $0x108] sm:$0xff]  ;;  %v1802_v17 = vld [vmem:[%s6935_s3 + $0x118] sm:$0xff] }
 0x106   :  { %2798 = vmatpush1.bf16.msra.mxu1 %v2797_v21  ;;  %1241 = vmatprep.mubr.f32.mxu1 %v4920_v12  ;;  %v625_v12 = vld [vmem:[%s6933_s1 + $0x11d8] sm:$0xff]  ;;  %v664_v21 = vld [vmem:[%s6933_s1 + $0x1310] sm:$0xff]  ;;  %v3275_v25 = vpack.c.bf16 %v1802_v17, %v1800_v16 }
 0x107   :  { %2800 = vmatprep.subr.bf16.mxu1 %v2799_v22  ;;  %3044 = vmatprep.subr.bf16.mxu0 %v3043_v29  ;;  %v2807_v46 = vpack.c.bf16 %v625_v12, %v617_v38  ;;  %v672_v22 = vld [vmem:[%s6933_s1 + $0x1350] sm:$0xff]  ;;  %v3259_v38 = vpack.c.bf16 %v1786_v30, %v1784_v26  ;;  %v1806_v26 = vld [vmem:[%s6935_s3 + $0x138] sm:$0xff] }
 0x108   :  { %v1781_v29 = vld [vmem:[%s6935_s3 + $0x70] sm:$0xff]  ;;  %v2821_v31 = vpack.c.bf16 %v672_v22, %v664_v21  ;;  %v761_v22 = vld [vmem:[%s6933_s1 + $0x1618] sm:$0xff] }
 0x109   :  { %3046 = vmatpush1.bf16.msra.mxu0 %v3045_v39  ;;  %v3257_v35 = vpack.c.bf16 %v1781_v29, %v1779_v28  ;;  %v1783_v39 = vld [vmem:[%s6935_s3 + $0x80] sm:$0xff]  ;;  %v1785_v12 = vld [vmem:[%s6935_s3 + $0x90] sm:$0xff]  ;;  %v1804_v29 = vld [vmem:[%s6935_s3 + $0x128] sm:$0xff] }
 0x10a   :  { %2802 = vmatpush1.bf16.msra.mxu1 %v2801_v34  ;;  %3048 = vmatprep.subr.bf16.mxu0 %v3047_v40  ;;  %v688_v34 = vld [vmem:[%s6933_s1 + $0x13d0] sm:$0xff]  ;;  %v1788_v40 = vld [vmem:[%s6935_s3 + $0xa8] sm:$0xff]  ;;  %v3261_v47 = vpack.c.bf16 %v1785_v12, %v1783_v39  ;;  %v1822_v16 = vld [vmem:[%s6935_s3 + $0x1b8] sm:$0xff] }
 0x10b   :  { %2804 = vmatprep.subr.bf16.mxu1 %v2803_v36  ;;  %v697_v36 = vld [vmem:[%s6933_s1 + $0x1418] sm:$0xff]  ;;  %v2825_v42 = vpack.c.bf16 %v688_v34, %v680_v33  ;;  %v3263_v49 = vpack.c.bf16 %v1790_v41, %v1788_v40  ;;  %v1797_v15 = vld [vmem:[%s6935_s3 + $0xf0] sm:$0xff]  ;;  %v1808_v12 = vld [vmem:[%s6935_s3 + $0x148] sm:$0xff] }
 0x10c   :  { %v2827_v43 = vpack.c.bf16 %v705_v37, %v697_v36  ;;  %v752_v21 = vld [vmem:[%s6933_s1 + $0x15d0] sm:$0xff]  ;;  %v777_v34 = vld [vmem:[%s6933_s1 + $0x1698] sm:$0xff]  ;;  %v3279_v37 = vpack.c.bf16 %v1806_v26, %v1804_v29 }
 0x10d   :  { %3050 = vmatpush1.bf16.msra.mxu0 %v3049_v50  ;;  %v1787_v50 = vld [vmem:[%s6935_s3 + $0xa0] sm:$0xff]  ;;  %v1801_v28 = vld [vmem:[%s6935_s3 + $0x110] sm:$0xff]  ;;  %v1810_v40 = vld [vmem:[%s6935_s3 + $0x158] sm:$0xff] }
 0x10e   :  { %2806 = vmatpush1.bf16.msra.mxu1 %v2805_v45  ;;  %3244 = vmatprep.subr.bf16.mxu0 %v3243_v52  ;;  %v704_v45 = vld [vmem:[%s6933_s1 + $0x1450] sm:$0xff]  ;;  %v1792_v52 = vld [vmem:[%s6935_s3 + $0xc8] sm:$0xff]  ;;  %v3265_v59 = vpack.c.bf16 %v1789_v51, %v1787_v50  ;;  %v1826_v29 = vld [vmem:[%s6935_s3 + $0x1d8] sm:$0xff] }
 0x10f   :  { %2808 = vmatprep.subr.bf16.mxu1 %v2807_v46  ;;  %v713_v46 = vld [vmem:[%s6933_s1 + $0x1498] sm:$0xff]  ;;  %v2829_v54 = vpack.c.bf16 %v704_v45, %v696_v44  ;;  %v3267_v61 = vpack.c.bf16 %v1794_v53, %v1792_v52  ;;  %v768_v33 = vld [vmem:[%s6933_s1 + $0x1650] sm:$0xff]  ;;  %v1812_v51 = vld [vmem:[%s6935_s3 + $0x168] sm:$0xff] }
 0x110   :  { %1455 = vmatmul.mubr.f32.vlgmr.msra.gmra.mrb[2].mxu0 %v5296_v6  ;;  %v2831_v55 = vpack.c.bf16 %v721_v48, %v713_v46  ;;  %v1805_v39 = vld [vmem:[%s6935_s3 + $0x130] sm:$0xff]  ;;  %v793_v45 = vld [vmem:[%s6933_s1 + $0x1718] sm:$0xff]  ;;  %v3283_v48 = vpack.c.bf16 %v1810_v40, %v1808_v12 }
 0x111   :  { %3246 = vmatpush1.bf16.msra.mxu0 %v3245_v62  ;;  %v1791_v62 = vld [vmem:[%s6935_s3 + $0xc0] sm:$0xff]  ;;  %v784_v44 = vld [vmem:[%s6933_s1 + $0x16d0] sm:$0xff]  ;;  %v1814_v52 = vld [vmem:[%s6935_s3 + $0x178] sm:$0xff] }
 0x112   :  { %2810 = vmatpush1.bf16.msra.mxu1 %v2809_v57  ;;  %3248 = vmatprep.subr.bf16.mxu0 %v3247_v1  ;;  %v720_v57 = vld [vmem:[%s6933_s1 + $0x14d0] sm:$0xff]  ;;  %v1796_v1 = vld [vmem:[%s6935_s3 + $0xe8] sm:$0xff]  ;;  %v3269_v9 = vpack.c.bf16 %v1793_v0, %v1791_v62  ;;  %v1830_v12 = vld [vmem:[%s6935_s3 + $0x1f8] sm:$0xff] }
 0x113   :  { %2812 = vmatprep.subr.bf16.mxu1 %v2811_v58  ;;  %v729_v58 = vld [vmem:[%s6933_s1 + $0x1518] sm:$0xff]  ;;  %v2833_v3 = vpack.c.bf16 %v720_v57, %v712_v56  ;;  %v3271_v13 = vpack.c.bf16 %v1798_v2, %v1796_v1  ;;  %v1809_v50 = vld [vmem:[%s6935_s3 + $0x150] sm:$0xff]  ;;  %v1816_v0 = vld [vmem:[%s6935_s3 + $0x188] sm:$0xff] }
 0x114   :  { %v800_v56 = vld [vmem:[%s6933_s1 + $0x1750] sm:$0xff]  ;;  %v809_v57 = vld [vmem:[%s6933_s1 + $0x1798] sm:$0xff] }
 0x115   :  { %3250 = vmatpush1.bf16.msra.mxu0 %v3249_v11  ;;  %v753_v11 = vld [vmem:[%s6933_s1 + $0x15d8] sm:$0xff]  ;;  %v1813_v62 = vld [vmem:[%s6935_s3 + $0x170] sm:$0xff] }
 0x116   :  { %2814 = vmatpush1.bf16.msra.mxu1 %v2813_v5  ;;  %3252 = vmatprep.subr.bf16.mxu0 %v3251_v14  ;;  %v2835_v5 = vpack.c.bf16 %v737_v60, %v729_v58  ;;  %v1795_v14 = vld [vmem:[%s6935_s3 + $0xe0] sm:$0xff]  ;;  %v3287_v60 = vpack.c.bf16 %v1814_v52, %v1812_v51  ;;  %v1818_v1 = vld [vmem:[%s6935_s3 + $0x198] sm:$0xff]  ;;  %v108_v52 = vld [vmem:[%s6933_s1 + $0x1b0] sm:$0xff] }
 0x117   :  { %2816 = vmatprep.subr.bf16.mxu1 %v2815_v7  ;;  %v728_v7 = vld [vmem:[%s6933_s1 + $0x1510] sm:$0xff]  ;;  %v3273_v23 = vpack.c.bf16 %v1797_v15, %v1795_v14  ;;  %v1820_v15 = vld [vmem:[%s6935_s3 + $0x1a8] sm:$0xff] }
 0x118   :  { %v2837_v18 = vpack.c.bf16 %v736_v10, %v728_v7  ;;  %v816_v7 = vld [vmem:[%s6933_s1 + $0x17d0] sm:$0xff]  ;;  %v61_v10 = vld [vmem:[%s6933_s1 + $0x38] sm:$0xff] }
 0x119   :  { %3254 = vmatpush1.bf16.msra.mxu0 %v3253_v24  ;;  %v769_v24 = vld [vmem:[%s6933_s1 + $0x1658] sm:$0xff]  ;;  %v1817_v14 = vld [vmem:[%s6935_s3 + $0x190] sm:$0xff] }
 0x11a   :  { %2818 = vmatpush1.bf16.msra.mxu1 %v2817_v19  ;;  %3256 = vmatprep.subr.bf16.mxu0 %v3255_v27  ;;  %v2839_v19 = vpack.c.bf16 %v753_v11, %v745_v8  ;;  %v1799_v27 = vld [vmem:[%s6935_s3 + $0x100] sm:$0xff]  ;;  %v3291_v11 = vpack.c.bf16 %v1818_v1, %v1816_v0  ;;  %v149_v0 = vld [vmem:[%s6933_s1 + $0x2f8] sm:$0xff] }
 0x11b   :  { %2820 = vmatprep.subr.bf16.mxu1 %v2819_v20  ;;  %v744_v20 = vld [vmem:[%s6933_s1 + $0x1590] sm:$0xff]  ;;  %v3277_v36 = vpack.c.bf16 %v1801_v28, %v1799_v27  ;;  %v1824_v28 = vld [vmem:[%s6935_s3 + $0x1c8] sm:$0xff] }
 0x11c   :  { %v2841_v30 = vpack.c.bf16 %v752_v21, %v744_v20  ;;  %v68_v20 = vld [vmem:[%s6933_s1 + $0x70] sm:$0xff]  ;;  %v77_v21 = vld [vmem:[%s6933_s1 + $0xb8] sm:$0xff] }
 0x11d   :  { %3258 = vmatpush1.bf16.msra.mxu0 %v3257_v35  ;;  %v785_v35 = vld [vmem:[%s6933_s1 + $0x16d8] sm:$0xff]  ;;  %v1821_v27 = vld [vmem:[%s6935_s3 + $0x1b0] sm:$0xff] }
 0x11e   :  { %2822 = vmatpush1.bf16.msra.mxu1 %v2821_v31  ;;  %3260 = vmatprep.subr.bf16.mxu0 %v3259_v38  ;;  %v2843_v31 = vpack.c.bf16 %v769_v24, %v761_v22  ;;  %v1803_v38 = vld [vmem:[%s6935_s3 + $0x120] sm:$0xff]  ;;  %v3295_v24 = vpack.c.bf16 %v1822_v16, %v1820_v15  ;;  %v156_v16 = vld [vmem:[%s6933_s1 + $0x330] sm:$0xff] }
 0x11f   :  { %2824 = vmatprep.subr.bf16.mxu1 %v2823_v32  ;;  %v760_v32 = vld [vmem:[%s6933_s1 + $0x1610] sm:$0xff]  ;;  %v3281_v46 = vpack.c.bf16 %v1805_v39, %v1803_v38  ;;  %v1828_v39 = vld [vmem:[%s6935_s3 + $0x1e8] sm:$0xff] }
 0x120   :  { %v2845_v41 = vpack.c.bf16 %v768_v33, %v760_v32  ;;  %v84_v32 = vld [vmem:[%s6933_s1 + $0xf0] sm:$0xff]  ;;  %v93_v33 = vld [vmem:[%s6933_s1 + $0x138] sm:$0xff] }
 0x121   :  { %3262 = vmatpush1.bf16.msra.mxu0 %v3261_v47  ;;  %v801_v47 = vld [vmem:[%s6933_s1 + $0x1758] sm:$0xff]  ;;  %v1825_v38 = vld [vmem:[%s6935_s3 + $0x1d0] sm:$0xff] }
 0x122   :  { %2826 = vmatpush1.bf16.msra.mxu1 %v2825_v42  ;;  %3264 = vmatprep.subr.bf16.mxu0 %v3263_v49  ;;  %v2847_v42 = vpack.c.bf16 %v785_v35, %v777_v34  ;;  %v1807_v49 = vld [vmem:[%s6935_s3 + $0x140] sm:$0xff]  ;;  %v3299_v35 = vpack.c.bf16 %v1826_v29, %v1824_v28  ;;  %v172_v29 = vld [vmem:[%s6933_s1 + $0x3b0] sm:$0xff] }
 0x123   :  { %2828 = vmatprep.subr.bf16.mxu1 %v2827_v43  ;;  %v5419_v63 = vpop.f32.mrb[0].mxu0  ;;  %v776_v43 = vld [vmem:[%s6933_s1 + $0x1690] sm:$0xff]  ;;  %v3285_v58 = vpack.c.bf16 %v1809_v50, %v1807_v49 }
 0x124   :  { %v5421_v4 = vpop.f32.mrb[1].mxu0  ;;  %v2849_v53 = vpack.c.bf16 %v784_v44, %v776_v43  ;;  %v100_v43 = vld [vmem:[%s6933_s1 + $0x170] sm:$0xff]  ;;  %v109_v44 = vld [vmem:[%s6933_s1 + $0x1b8] sm:$0xff] }
 0x125   :  { %3266 = vmatpush1.bf16.msra.mxu0 %v3265_v59  ;;  %v817_v59 = vld [vmem:[%s6933_s1 + $0x17d8] sm:$0xff]  ;;  %v1829_v49 = vld [vmem:[%s6935_s3 + $0x1f0] sm:$0xff] }
 0x126   :  { %2830 = vmatpush1.bf16.msra.mxu1 %v2829_v54  ;;  %3268 = vmatprep.subr.bf16.mxu0 %v3267_v61  ;;  %v2851_v54 = vpack.c.bf16 %v801_v47, %v793_v45  ;;  %v1811_v61 = vld [vmem:[%s6935_s3 + $0x160] sm:$0xff]  ;;  %v3303_v47 = vpack.c.bf16 %v1830_v12, %v1828_v39  ;;  %v196_v39 = vld [vmem:[%s6933_s1 + $0x470] sm:$0xff] }
 0x127   :  { %2832 = vmatprep.subr.bf16.mxu1 %v2831_v55  ;;  %v792_v55 = vld [vmem:[%s6933_s1 + $0x1710] sm:$0xff]  ;;  %v3289_v8 = vpack.c.bf16 %v1813_v62, %v1811_v61  ;;  %v141_v62 = vld [vmem:[%s6933_s1 + $0x2b8] sm:$0xff] }
 0x128   :  { %v2853_v2 = vpack.c.bf16 %v800_v56, %v792_v55  ;;  %v125_v55 = vld [vmem:[%s6933_s1 + $0x238] sm:$0xff]  ;;  %v132_v61 = vld [vmem:[%s6933_s1 + $0x270] sm:$0xff] }
 0x129   :  { %3270 = vmatpush1.bf16.msra.mxu0 %v3269_v9  ;;  %v69_v9 = vld [vmem:[%s6933_s1 + $0x78] sm:$0xff]  ;;  %v1833_v12 = vld [vmem:[%s6935_s3 + $0x210] sm:$0xff] }
 0x12a   :  { %2834 = vmatpush1.bf16.msra.mxu1 %v2833_v3  ;;  %3272 = vmatprep.subr.bf16.mxu0 %v3271_v13  ;;  %v2855_v3 = vpack.c.bf16 %v817_v59, %v809_v57  ;;  %v1815_v13 = vld [vmem:[%s6935_s3 + $0x180] sm:$0xff]  ;;  %v133_v56 = vld [vmem:[%s6933_s1 + $0x278] sm:$0xff]  ;;  %v1703_v57 = vlaneseq }
 0x12b   :  { %2836 = vmatprep.subr.bf16.mxu1 %v2835_v5  ;;  %v808_v5 = vld [vmem:[%s6933_s1 + $0x1790] sm:$0xff]  ;;  %v3293_v22 = vpack.c.bf16 %v1817_v14, %v1815_v13  ;;  %v3067_v59 = vpack.c.bf16 %v133_v56, %v125_v55  ;;  %v5679_v13 = vld [vmem:[%s6936_s2] sm:$0xff]  ;;  %v1840_v56 = vld [vmem:[%s6935_s3 + $0x248] sm:$0xff] }
 0x12c   :  { %v2857_v17 = vpack.c.bf16 %v816_v7, %v808_v5  ;;  %v5661_v1 = vshrl.u32 %v1703_v57, 7  ;;  %v140_v5 = vld [vmem:[%s6933_s1 + $0x2b0] sm:$0xff]  ;;  %v1842_v57 = vld [vmem:[%s6935_s3 + $0x258] sm:$0xff] }
 0x12d   :  { %3274 = vmatpush1.bf16.msra.mxu0 %v3273_v23  ;;  %v85_v23 = vld [vmem:[%s6933_s1 + $0xf8] sm:$0xff]  ;;  %v148_v7 = vld [vmem:[%s6933_s1 + $0x2f0] sm:$0xff] }
 0x12e   :  { %2838 = vmatpush1.bf16.msra.mxu1 %v2837_v18  ;;  %3276 = vmatprep.subr.bf16.mxu0 %v3275_v25  ;;  %v3051_v18 = vpack.c.bf16 %v69_v9, %v61_v10  ;;  %v1819_v25 = vld [vmem:[%s6935_s3 + $0x1a0] sm:$0xff]  ;;  %v157_v10 = vld [vmem:[%s6933_s1 + $0x338] sm:$0xff]  ;;  %v1705_v9 = vsub.s32 0, %v5661_v1  ;;  %v1709_v14 = vsub.s32 1, %v5661_v1 }
 0x12f   :  { %2840 = vmatprep.subr.bf16.mxu1 %v2839_v19  ;;  %v60_v19 = vld [vmem:[%s6933_s1 + $0x30] sm:$0xff]  ;;  %v3297_v34 = vpack.c.bf16 %v1821_v27, %v1819_v25 }
 0x130   :  { %v3053_v26 = vpack.c.bf16 %v68_v20, %v60_v19  ;;  %v173_v19 = vld [vmem:[%s6933_s1 + $0x3b8] sm:$0xff]  ;;  %v1710_v27 = vrot.slane %v5679_v13, %v1709_v14 }
 0x131   :  { %3278 = vmatpush1.bf16.msra.mxu0 %v3277_v36  ;;  %v101_v36 = vld [vmem:[%s6933_s1 + $0x178] sm:$0xff] }
 0x132   :  { %2842 = vmatpush1.bf16.msra.mxu1 %v2841_v30  ;;  %3280 = vmatprep.subr.bf16.mxu0 %v3279_v37  ;;  %v3055_v30 = vpack.c.bf16 %v85_v23, %v77_v21  ;;  %v1823_v37 = vld [vmem:[%s6935_s3 + $0x1c0] sm:$0xff]  ;;  %v181_v20 = vld [vmem:[%s6933_s1 + $0x3f8] sm:$0xff]  ;;  %v1706_v23 = vrot.slane %v5679_v13, %v1705_v9 }
 0x133   :  { %2844 = vmatprep.subr.bf16.mxu1 %v2843_v31  ;;  %v76_v31 = vld [vmem:[%s6933_s1 + $0xb0] sm:$0xff]  ;;  %v3301_v45 = vpack.c.bf16 %v1825_v38, %v1823_v37  ;;  %v3079_v28 = vpack.c.bf16 %v181_v20, %v173_v19 }
 0x134   :  { %v3057_v40 = vpack.c.bf16 %v84_v32, %v76_v31  ;;  %v1832_v31 = vld [vmem:[%s6935_s3 + $0x208] sm:$0xff]  ;;  %v1834_v32 = vld [vmem:[%s6935_s3 + $0x218] sm:$0xff]  ;;  %v188_v38 = vld [vmem:[%s6933_s1 + $0x430] sm:$0xff] }
 0x135   :  { %3282 = vmatpush1.bf16.msra.mxu0 %v3281_v46  ;;  %v117_v46 = vld [vmem:[%s6933_s1 + $0x1f8] sm:$0xff]  ;;  %v244_v19 = vld [vmem:[%s6933_s1 + $0x5f0] sm:$0xff] }
 0x136   :  { %2846 = vmatpush1.bf16.msra.mxu1 %v2845_v41  ;;  %3284 = vmatprep.subr.bf16.mxu0 %v3283_v48  ;;  %v3560_v41 = vld [vmem:[%s6934_s0 + $0x8] sm:$0xff]  ;;  %v1827_v48 = vld [vmem:[%s6935_s3 + $0x1e0] sm:$0xff]  ;;  %v3063_v51 = vpack.c.bf16 %v117_v46, %v109_v44  ;;  %v3085_v46 = vpack.c.bf16 %v196_v39, %v188_v38  ;;  %v1845_v20 = vld [vmem:[%s6935_s3 + $0x270] sm:$0xff] }
 0x137   :  { %2848 = vmatprep.subr.bf16.mxu1 %v2847_v42  ;;  %v3059_v42 = vpack.c.bf16 %v101_v36, %v93_v33  ;;  %v3307_v36 = vpack.c.bf16 %v1834_v32, %v1832_v31  ;;  %v1836_v44 = vld [vmem:[%s6935_s3 + $0x228] sm:$0xff]  ;;  %v269_v31 = vld [vmem:[%s6933_s1 + $0x6b8] sm:$0xff]  ;;  %v1851_v38 = vld [vmem:[%s6935_s3 + $0x2a0] sm:$0xff] }
 0x138   :  { %v277_v32 = vld [vmem:[%s6933_s1 + $0x6f8] sm:$0xff] }
 0x139   :  { %3286 = vmatpush1.bf16.msra.mxu0 %v3285_v58  ;;  %v3103_v39 = vpack.c.bf16 %v277_v32, %v269_v31  ;;  %v349_v31 = vld [vmem:[%s6933_s1 + $0x938] sm:$0xff] }
 0x13a   :  { %2850 = vmatpush1.bf16.msra.mxu1 %v2849_v53  ;;  %3288 = vmatprep.subr.bf16.mxu0 %v3287_v60  ;;  %v116_v53 = vld [vmem:[%s6933_s1 + $0x1f0] sm:$0xff]  ;;  %v357_v32 = vld [vmem:[%s6933_s1 + $0x978] sm:$0xff] }
 0x13b   :  { %2852 = vmatprep.subr.bf16.mxu1 %v2851_v54  ;;  %v3305_v54 = vpack.c.bf16 %v1829_v49, %v1827_v48  ;;  %v3065_v58 = vpack.c.bf16 %v116_v53, %v108_v52  ;;  %v124_v60 = vld [vmem:[%s6933_s1 + $0x230] sm:$0xff]  ;;  %v1835_v48 = vld [vmem:[%s6935_s3 + $0x220] sm:$0xff]  ;;  %v221_v53 = vld [vmem:[%s6933_s1 + $0x538] sm:$0xff] }
 0x13c   :  { %v1837_v52 = vld [vmem:[%s6935_s3 + $0x230] sm:$0xff] }
 0x13d   :  { %3290 = vmatpush1.bf16.msra.mxu0 %v3289_v8  ;;  %v165_v8 = vld [vmem:[%s6933_s1 + $0x378] sm:$0xff]  ;;  %v3313_v55 = vpack.c.bf16 %v1837_v52, %v1835_v48  ;;  %v1855_v48 = vld [vmem:[%s6935_s3 + $0x2c0] sm:$0xff]  ;;  %v1857_v52 = vld [vmem:[%s6935_s3 + $0x2d0] sm:$0xff] }
 0x13e   :  { %2854 = vmatpush1.bf16.msra.mxu1 %v2853_v2  ;;  %3292 = vmatprep.subr.bf16.mxu0 %v3291_v11  ;;  %v3069_v2 = vpack.c.bf16 %v132_v61, %v124_v60  ;;  %v3073_v11 = vpack.c.bf16 %v148_v7, %v140_v5  ;;  %v3075_v15 = vpack.c.bf16 %v165_v8, %v157_v10  ;;  %v1839_v60 = vld [vmem:[%s6935_s3 + $0x240] sm:$0xff]  ;;  %v245_v5 = vld [vmem:[%s6933_s1 + $0x5f8] sm:$0xff]  ;;  %v1844_v10 = vld [vmem:[%s6935_s3 + $0x268] sm:$0xff] }
 0x13f   :  { %2856 = vmatprep.subr.bf16.mxu1 %v2855_v3  ;;  %v3071_v3 = vpack.c.bf16 %v149_v0, %v141_v62  ;;  %v220_v62 = vld [vmem:[%s6933_s1 + $0x530] sm:$0xff]  ;;  %v1846_v8 = vld [vmem:[%s6935_s3 + $0x278] sm:$0xff] }
 0x140   :  { %v228_v0 = vld [vmem:[%s6933_s1 + $0x570] sm:$0xff] }
 0x141   :  { %3294 = vmatpush1.bf16.msra.mxu0 %v3293_v22 }
 0x142   :  { %2858 = vmatpush1.bf16.msra.mxu1 %v2857_v17  ;;  %3296 = vmatprep.subr.bf16.mxu0 %v3295_v24  ;;  %v164_v17 = vld [vmem:[%s6933_s1 + $0x370] sm:$0xff] }
 0x143   :  { %3052 = vmatprep.subr.bf16.mxu1 %v3051_v18  ;;  %v3077_v25 = vpack.c.bf16 %v164_v17, %v156_v16  ;;  %v1843_v16 = vld [vmem:[%s6935_s3 + $0x260] sm:$0xff] }
 0x145   :  { %1242 = vmatmul.mubr.f32.vlgmr.msra.gmra.mrb[2].mxu1 %v5296_v6  ;;  %v92_v6 = vld [vmem:[%s6933_s1 + $0x130] sm:$0xff]  ;;  %3298 = vmatpush1.bf16.msra.mxu0 %v3297_v34 }
 0x146   :  { %3054 = vmatpush1.bf16.msra.mxu1 %v3053_v26  ;;  %1525 = vmatprep.mubr.f32.mxu1 %v3560_v41  ;;  %v3061_v50 = vpack.c.bf16 %v100_v43, %v92_v6  ;;  %v197_v26 = vld [vmem:[%s6933_s1 + $0x478] sm:$0xff] }
 0x147   :  { %3056 = vmatprep.subr.bf16.mxu1 %v3055_v30  ;;  %3300 = vmatprep.subr.bf16.mxu0 %v3299_v35  ;;  %v1831_v35 = vld [vmem:[%s6935_s3 + $0x200] sm:$0xff]  ;;  %v213_v41 = vld [vmem:[%s6933_s1 + $0x4f8] sm:$0xff] }
 0x148   :  { %v3309_v6 = vpack.c.bf16 %v1833_v12, %v1831_v35  ;;  %v268_v12 = vld [vmem:[%s6933_s1 + $0x6b0] sm:$0xff] }
 0x149   :  { %3302 = vmatpush1.bf16.msra.mxu0 %v3301_v45  ;;  %v1838_v45 = vld [vmem:[%s6935_s3 + $0x238] sm:$0xff] }
 0x14a   :  { %3058 = vmatpush1.bf16.msra.mxu1 %v3057_v40  ;;  %3304 = vmatprep.subr.bf16.mxu0 %v3303_v47  ;;  %v205_v40 = vld [vmem:[%s6933_s1 + $0x4b8] sm:$0xff]  ;;  %v3311_v47 = vpack.c.bf16 %v1838_v45, %v1836_v44  ;;  %v1856_v44 = vld [vmem:[%s6935_s3 + $0x2c8] sm:$0xff] }
 0x14b   :  { %3060 = vmatprep.subr.bf16.mxu1 %v3059_v42  ;;  %v3087_v49 = vpack.c.bf16 %v213_v41, %v205_v40  ;;  %v276_v40 = vld [vmem:[%s6933_s1 + $0x6f0] sm:$0xff]  ;;  %v1858_v45 = vld [vmem:[%s6935_s3 + $0x2d8] sm:$0xff] }
 0x14c   :  { %v1853_v41 = vld [vmem:[%s6935_s3 + $0x2b0] sm:$0xff] }
 0x14d   :  { %3306 = vmatpush1.bf16.msra.mxu0 %v3305_v54  ;;  %v229_v54 = vld [vmem:[%s6933_s1 + $0x578] sm:$0xff] }
 0x14e   :  { %3062 = vmatpush1.bf16.msra.mxu1 %v3061_v50  ;;  %3308 = vmatprep.subr.bf16.mxu0 %v3307_v36  ;;  %v204_v50 = vld [vmem:[%s6933_s1 + $0x4b0] sm:$0xff]  ;;  %v3091_v61 = vpack.c.bf16 %v229_v54, %v221_v53  ;;  %v1854_v36 = vld [vmem:[%s6935_s3 + $0x2b8] sm:$0xff] }
 0x14f   :  { %3064 = vmatprep.subr.bf16.mxu1 %v3063_v51  ;;  %v212_v51 = vld [vmem:[%s6933_s1 + $0x4f0] sm:$0xff]  ;;  %v301_v53 = vld [vmem:[%s6933_s1 + $0x7b8] sm:$0xff] }
 0x150   :  { %v309_v54 = vld [vmem:[%s6933_s1 + $0x7f8] sm:$0xff] }
 0x152   :  { %3066 = vmatpush1.bf16.msra.mxu1 %v3065_v58  ;;  %v3089_v58 = vpack.c.bf16 %v212_v51, %v204_v50  ;;  %v284_v50 = vld [vmem:[%s6933_s1 + $0x730] sm:$0xff] }
 0x153   :  { %3068 = vmatprep.subr.bf16.mxu1 %v3067_v59  ;;  %v3315_v59 = vpack.c.bf16 %v1842_v57, %v1840_v56  ;;  %v292_v51 = vld [vmem:[%s6933_s1 + $0x770] sm:$0xff]  ;;  %v1860_v56 = vld [vmem:[%s6935_s3 + $0x2e8] sm:$0xff]  ;;  %v1862_v57 = vld [vmem:[%s6935_s3 + $0x2f8] sm:$0xff] }
 0x156   :  { %3070 = vmatpush1.bf16.msra.mxu1 %v3069_v2  ;;  %v1841_v2 = vld [vmem:[%s6935_s3 + $0x250] sm:$0xff] }
 0x157   :  { %3072 = vmatprep.subr.bf16.mxu1 %v3071_v3  ;;  %v237_v3 = vld [vmem:[%s6933_s1 + $0x5b8] sm:$0xff]  ;;  %v3317_v7 = vpack.c.bf16 %v1841_v2, %v1839_v60  ;;  %v1859_v60 = vld [vmem:[%s6935_s3 + $0x2e0] sm:$0xff]  ;;  %v1861_v2 = vld [vmem:[%s6935_s3 + $0x2f0] sm:$0xff] }
 0x158   :  { %v959_v18 = vpop.f32.mrb[0].mxu1  ;;  %v3095_v17 = vpack.c.bf16 %v245_v5, %v237_v3  ;;  %v317_v3 = vld [vmem:[%s6933_s1 + $0x838] sm:$0xff] }
 0x159   :  { %v3531_v21 = vadd.f32 %v5419_v63, %v959_v18  ;;  %v961_v22 = vpop.f32.mrb[1].mxu1  ;;  %v180_v63 = vld [vmem:[%s6933_s1 + $0x3f0] sm:$0xff]  ;;  %v325_v5 = vld [vmem:[%s6933_s1 + $0x878] sm:$0xff] }
 0x15a   :  { %v3532_v24 = vadd.f32 %v5421_v4, %v961_v22  ;;  %3074 = vmatpush1.bf16.msra.mxu1 %v3073_v11  ;;  %v189_v4 = vld [vmem:[%s6933_s1 + $0x438] sm:$0xff]  ;;  %v3081_v33 = vpack.c.bf16 %v180_v63, %v172_v29  ;;  %v3093_v11 = vpack.c.bf16 %v228_v0, %v220_v62  ;;  %v236_v18 = vld [vmem:[%s6933_s1 + $0x5b0] sm:$0xff]  ;;  %v1847_v29 = vld [vmem:[%s6935_s3 + $0x280] sm:$0xff] }
 0x15b   :  { %3076 = vmatprep.subr.bf16.mxu1 %v3075_v15  ;;  %v1743_v30 = vadd.f32 %v3531_v21, %v1706_v23  ;;  %v3083_v37 = vpack.c.bf16 %v197_v26, %v189_v4  ;;  %v3319_v15 = vpack.c.bf16 %v1846_v8, %v1844_v10  ;;  %v253_v21 = vld [vmem:[%s6933_s1 + $0x638] sm:$0xff]  ;;  %v3321_v23 = vpack.c.bf16 %v1845_v20, %v1843_v16  ;;  %v252_v4 = vld [vmem:[%s6933_s1 + $0x630] sm:$0xff]  ;;  %v1864_v10 = vld [vmem:[%s6935_s3 + $0x308] sm:$0xff] }
 0x15c   :  { %v1744_v34 = vadd.f32 %v3532_v24, %v1710_v27  ;;  %v261_v22 = vld [vmem:[%s6933_s1 + $0x678] sm:$0xff]  ;;  %v1848_v24 = vld [vmem:[%s6935_s3 + $0x288] sm:$0xff]  ;;  %v3097_v27 = vpack.c.bf16 %v244_v19, %v236_v18  ;;  %v260_v26 = vld [vmem:[%s6933_s1 + $0x670] sm:$0xff] }
 0x15d   :  { %1751 = vst [vmem:[%s6937_s8] sm:$0xff] %v1743_v30  ;;  %v1759_v43 = vmax.f32 %v1743_v30, 0.0  ;;  %v3099_v63 = vpack.c.bf16 %v261_v22, %v253_v21  ;;  %v1849_v30 = vld [vmem:[%s6935_s3 + $0x290] sm:$0xff]  ;;  %v3101_v35 = vpack.c.bf16 %v260_v26, %v252_v4  ;;  %v1866_v8 = vld [vmem:[%s6935_s3 + $0x318] sm:$0xff]  ;;  %v1863_v16 = vld [vmem:[%s6935_s3 + $0x300] sm:$0xff] }
 0x15e   :  { %3078 = vmatpush1.bf16.msra.mxu1 %v3077_v25  ;;  %1752 = vst [vmem:[%s6937_s8 + $0x8] sm:$0xff] %v1744_v34  ;;  %v1760_v42 = vmax.f32 %v1744_v34, 0.0  ;;  %v1850_v25 = vld [vmem:[%s6935_s3 + $0x298] sm:$0xff]  ;;  %v1852_v34 = vld [vmem:[%s6935_s3 + $0x2a8] sm:$0xff]  ;;  %v300_v62 = vld [vmem:[%s6933_s1 + $0x7b0] sm:$0xff] }
 0x15f   :  { %3080 = vmatprep.subr.bf16.mxu1 %v3079_v28  ;;  %v3323_v28 = vpack.c.bf16 %v1850_v25, %v1848_v24  ;;  %v308_v0 = vld [vmem:[%s6933_s1 + $0x7f0] sm:$0xff]  ;;  %v333_v21 = vld [vmem:[%s6933_s1 + $0x8b8] sm:$0xff]  ;;  %v1868_v24 = vld [vmem:[%s6935_s3 + $0x328] sm:$0xff] }
 0x160   :  { %2099 = vmatprep.mubr.f32.mxu0 %v1760_v42  ;;  %v285_v42 = vld [vmem:[%s6933_s1 + $0x738] sm:$0xff]  ;;  %v316_v18 = vld [vmem:[%s6933_s1 + $0x830] sm:$0xff] }
 0x161   :  { %2100 = vmatmul.mubr.f32.vlgmr.msra.gmra.mrb[4].mxu0 %v1759_v43  ;;  %v3329_v43 = vpack.c.bf16 %v1853_v41, %v1851_v38  ;;  %v324_v19 = vld [vmem:[%s6933_s1 + $0x870] sm:$0xff]  ;;  %v341_v22 = vld [vmem:[%s6933_s1 + $0x8f8] sm:$0xff]  ;;  %v1876_v41 = vld [vmem:[%s6935_s3 + $0x368] sm:$0xff] }
 0x162   :  { %3082 = vmatpush1.bf16.msra.mxu1 %v3081_v33  ;;  %3310 = vmatpush1.bf16.msra.mxu0 %v3309_v6  ;;  %v3325_v33 = vpack.c.bf16 %v1849_v30, %v1847_v29  ;;  %v293_v6 = vld [vmem:[%s6933_s1 + $0x778] sm:$0xff]  ;;  %v1865_v20 = vld [vmem:[%s6935_s3 + $0x310] sm:$0xff]  ;;  %v1867_v29 = vld [vmem:[%s6935_s3 + $0x320] sm:$0xff]  ;;  %v3119_v4 = vpack.c.bf16 %v341_v22, %v333_v21 }
 0x163   :  { %3084 = vmatprep.subr.bf16.mxu1 %v3083_v37  ;;  %3312 = vmatprep.subr.bf16.mxu0 %v3311_v47  ;;  %v3327_v37 = vpack.c.bf16 %v1854_v36, %v1852_v34  ;;  %v3331_v47 = vpack.c.bf16 %v1858_v45, %v1856_v44  ;;  %v1870_v25 = vld [vmem:[%s6935_s3 + $0x338] sm:$0xff]  ;;  %v332_v26 = vld [vmem:[%s6933_s1 + $0x8b0] sm:$0xff]  ;;  %v3561_v34 = vld [vmem:[%s6934_s0] sm:$0xff] }
 0x164   :  { %v340_v30 = vld [vmem:[%s6933_s1 + $0x8f0] sm:$0xff]  ;;  %v1872_v36 = vld [vmem:[%s6935_s3 + $0x348] sm:$0xff]  ;;  %v365_v45 = vld [vmem:[%s6933_s1 + $0x9b8] sm:$0xff] }
 0x165   :  { %v3121_v38 = vpack.c.bf16 %v340_v30, %v332_v26  ;;  %v356_v44 = vld [vmem:[%s6933_s1 + $0x970] sm:$0xff] }
 0x166   :  { %3086 = vmatpush1.bf16.msra.mxu1 %v3085_v46  ;;  %3314 = vmatpush1.bf16.msra.mxu0 %v3313_v55  ;;  %v3105_v46 = vpack.c.bf16 %v276_v40, %v268_v12  ;;  %v3333_v55 = vpack.c.bf16 %v1857_v52, %v1855_v48  ;;  %v1873_v40 = vld [vmem:[%s6935_s3 + $0x350] sm:$0xff] }
 0x167   :  { %3088 = vmatprep.subr.bf16.mxu1 %v3087_v49  ;;  %3316 = vmatprep.subr.bf16.mxu0 %v3315_v59  ;;  %v3107_v49 = vpack.c.bf16 %v293_v6, %v285_v42  ;;  %v3335_v59 = vpack.c.bf16 %v1862_v57, %v1860_v56  ;;  %v1878_v42 = vld [vmem:[%s6935_s3 + $0x378] sm:$0xff]  ;;  %v3123_v6 = vpack.c.bf16 %v357_v32, %v349_v31  ;;  %v396_v21 = vld [vmem:[%s6933_s1 + $0xab0] sm:$0xff] }
 0x168   :  { %v3351_v48 = vpack.c.bf16 %v1878_v42, %v1876_v41  ;;  %v389_v56 = vld [vmem:[%s6933_s1 + $0xa78] sm:$0xff]  ;;  %v404_v22 = vld [vmem:[%s6933_s1 + $0xaf0] sm:$0xff] }
 0x169   :  { %v1889_v26 = vld [vmem:[%s6935_s3 + $0x3d0] sm:$0xff] }
 0x16a   :  { %3090 = vmatpush1.bf16.msra.mxu1 %v3089_v58  ;;  %3318 = vmatpush1.bf16.msra.mxu0 %v3317_v7  ;;  %v3109_v58 = vpack.c.bf16 %v292_v51, %v284_v50  ;;  %v3337_v7 = vpack.c.bf16 %v1861_v2, %v1859_v60  ;;  %v1877_v50 = vld [vmem:[%s6935_s3 + $0x370] sm:$0xff] }
 0x16b   :  { %3092 = vmatprep.subr.bf16.mxu1 %v3091_v61  ;;  %3320 = vmatprep.subr.bf16.mxu0 %v3319_v15  ;;  %v3111_v61 = vpack.c.bf16 %v309_v54, %v301_v53  ;;  %v3339_v15 = vpack.c.bf16 %v1866_v8, %v1864_v10  ;;  %v364_v53 = vld [vmem:[%s6933_s1 + $0x9b0] sm:$0xff]  ;;  %v405_v10 = vld [vmem:[%s6933_s1 + $0xaf8] sm:$0xff] }
 0x16c   :  { %v372_v54 = vld [vmem:[%s6933_s1 + $0x9f0] sm:$0xff] }
 0x16d   :  { %v3129_v60 = vpack.c.bf16 %v372_v54, %v364_v53  ;;  %v412_v31 = vld [vmem:[%s6933_s1 + $0xb30] sm:$0xff]  ;;  %v461_v53 = vld [vmem:[%s6933_s1 + $0xcb8] sm:$0xff] }
 0x16e   :  { %3094 = vmatpush1.bf16.msra.mxu1 %v3093_v11  ;;  %3322 = vmatpush1.bf16.msra.mxu0 %v3321_v23  ;;  %v3113_v11 = vpack.c.bf16 %v308_v0, %v300_v62  ;;  %v3341_v23 = vpack.c.bf16 %v1865_v20, %v1863_v16  ;;  %v1879_v62 = vld [vmem:[%s6935_s3 + $0x380] sm:$0xff]  ;;  %v1881_v0 = vld [vmem:[%s6935_s3 + $0x390] sm:$0xff]  ;;  %v469_v54 = vld [vmem:[%s6933_s1 + $0xcf8] sm:$0xff] }
 0x16f   :  { %3096 = vmatprep.subr.bf16.mxu1 %v3095_v17  ;;  %3324 = vmatprep.subr.bf16.mxu0 %v3323_v28  ;;  %v3115_v17 = vpack.c.bf16 %v325_v5, %v317_v3  ;;  %v3343_v28 = vpack.c.bf16 %v1870_v25, %v1868_v24  ;;  %v380_v3 = vld [vmem:[%s6933_s1 + $0xa30] sm:$0xff]  ;;  %v3357_v8 = vpack.c.bf16 %v1881_v0, %v1879_v62  ;;  %v421_v24 = vld [vmem:[%s6933_s1 + $0xb78] sm:$0xff] }
 0x170   :  { %v388_v5 = vld [vmem:[%s6933_s1 + $0xa70] sm:$0xff] }
 0x171   :  { %v3133_v16 = vpack.c.bf16 %v388_v5, %v380_v3  ;;  %v420_v32 = vld [vmem:[%s6933_s1 + $0xb70] sm:$0xff]  ;;  %v493_v3 = vld [vmem:[%s6933_s1 + $0xdb8] sm:$0xff] }
 0x172   :  { %3098 = vmatpush1.bf16.msra.mxu1 %v3097_v27  ;;  %3326 = vmatpush1.bf16.msra.mxu0 %v3325_v33  ;;  %v3117_v27 = vpack.c.bf16 %v324_v19, %v316_v18  ;;  %v1883_v18 = vld [vmem:[%s6935_s3 + $0x3a0] sm:$0xff]  ;;  %v1885_v19 = vld [vmem:[%s6935_s3 + $0x3b0] sm:$0xff]  ;;  %v501_v5 = vld [vmem:[%s6933_s1 + $0xdf8] sm:$0xff] }
 0x173   :  { %3100 = vmatprep.subr.bf16.mxu1 %v3099_v63  ;;  %3328 = vmatprep.subr.bf16.mxu0 %v3327_v37  ;;  %v1869_v63 = vld [vmem:[%s6935_s3 + $0x330] sm:$0xff]  ;;  %v1871_v37 = vld [vmem:[%s6935_s3 + $0x340] sm:$0xff]  ;;  %v3361_v25 = vpack.c.bf16 %v1885_v19, %v1883_v18 }
 0x174   :  { %v3345_v33 = vpack.c.bf16 %v1869_v63, %v1867_v29  ;;  %v3137_v29 = vpack.c.bf16 %v404_v22, %v396_v21  ;;  %v428_v42 = vld [vmem:[%s6933_s1 + $0xbb0] sm:$0xff]  ;;  %v525_v21 = vld [vmem:[%s6933_s1 + $0xeb8] sm:$0xff] }
 0x175   :  { %v476_v0 = vld [vmem:[%s6933_s1 + $0xd30] sm:$0xff]  ;;  %v533_v22 = vld [vmem:[%s6933_s1 + $0xef8] sm:$0xff] }
 0x176   :  { %3102 = vmatpush1.bf16.msra.mxu1 %v3101_v35  ;;  %3330 = vmatpush1.bf16.msra.mxu0 %v3329_v43  ;;  %v1874_v35 = vld [vmem:[%s6935_s3 + $0x358] sm:$0xff]  ;;  %v348_v43 = vld [vmem:[%s6933_s1 + $0x930] sm:$0xff] }
 0x177   :  { %3104 = vmatprep.subr.bf16.mxu1 %v3103_v39  ;;  %3332 = vmatprep.subr.bf16.mxu0 %v3331_v47  ;;  %v3562_v39 = vld [vmem:[%s6934_s0 + $0x18] sm:$0xff]  ;;  %v3347_v12 = vpack.c.bf16 %v1874_v35, %v1872_v36  ;;  %v3349_v47 = vpack.c.bf16 %v1873_v40, %v1871_v37  ;;  %v3125_v51 = vpack.c.bf16 %v356_v44, %v348_v43  ;;  %v1892_v35 = vld [vmem:[%s6935_s3 + $0x3e8] sm:$0xff]  ;;  %v1893_v40 = vld [vmem:[%s6935_s3 + $0x3f0] sm:$0xff] }
 0x178   :  { %v1894_v37 = vld [vmem:[%s6935_s3 + $0x3f8] sm:$0xff]  ;;  %v508_v19 = vld [vmem:[%s6933_s1 + $0xe30] sm:$0xff] }
 0x179   :  { %v445_v43 = vld [vmem:[%s6933_s1 + $0xc38] sm:$0xff] }
 0x17a   :  { %3106 = vmatpush1.bf16.msra.mxu1 %v3105_v46  ;;  %3334 = vmatpush1.bf16.msra.mxu0 %v3333_v55  ;;  %v373_v46 = vld [vmem:[%s6933_s1 + $0x9f8] sm:$0xff] }
 0x17b   :  { %3108 = vmatprep.subr.bf16.mxu1 %v3107_v49  ;;  %3336 = vmatprep.subr.bf16.mxu0 %v3335_v59  ;;  %v1875_v49 = vld [vmem:[%s6935_s3 + $0x360] sm:$0xff]  ;;  %v3127_v52 = vpack.c.bf16 %v373_v46, %v365_v45  ;;  %v381_v55 = vld [vmem:[%s6933_s1 + $0xa38] sm:$0xff]  ;;  %v1896_v46 = vld [vmem:[%s6935_s3 + $0x408] sm:$0xff] }
 0x17c   :  { %v3353_v57 = vpack.c.bf16 %v1877_v50, %v1875_v49  ;;  %v1882_v59 = vld [vmem:[%s6935_s3 + $0x398] sm:$0xff]  ;;  %v3131_v2 = vpack.c.bf16 %v389_v56, %v381_v55  ;;  %v3151_v56 = vpack.c.bf16 %v469_v54, %v461_v53  ;;  %v604_v53 = vld [vmem:[%s6933_s1 + $0x1130] sm:$0xff] }
 0x17d   :  { %v453_v44 = vld [vmem:[%s6933_s1 + $0xc78] sm:$0xff]  ;;  %v612_v54 = vld [vmem:[%s6933_s1 + $0x1170] sm:$0xff] }
 0x17e   :  { %3110 = vmatpush1.bf16.msra.mxu1 %v3109_v58  ;;  %3338 = vmatpush1.bf16.msra.mxu0 %v3337_v7  ;;  %v1880_v58 = vld [vmem:[%s6935_s3 + $0x388] sm:$0xff]  ;;  %v397_v7 = vld [vmem:[%s6933_s1 + $0xab8] sm:$0xff]  ;;  %v3147_v50 = vpack.c.bf16 %v453_v44, %v445_v43 }
 0x17f   :  { %3112 = vmatprep.subr.bf16.mxu1 %v3111_v61  ;;  %3340 = vmatprep.subr.bf16.mxu0 %v3339_v15  ;;  %v3355_v61 = vpack.c.bf16 %v1882_v59, %v1880_v58  ;;  %v1886_v15 = vld [vmem:[%s6935_s3 + $0x3b8] sm:$0xff]  ;;  %v3135_v20 = vpack.c.bf16 %v405_v10, %v397_v7  ;;  %v468_v58 = vld [vmem:[%s6933_s1 + $0xcf0] sm:$0xff]  ;;  %v3159_v10 = vpack.c.bf16 %v501_v5, %v493_v3 }
 0x180   :  { %v477_v59 = vld [vmem:[%s6933_s1 + $0xd38] sm:$0xff]  ;;  %v636_v3 = vld [vmem:[%s6933_s1 + $0x1230] sm:$0xff] }
 0x181   :  { %v644_v5 = vld [vmem:[%s6933_s1 + $0x1270] sm:$0xff] }
 0x182   :  { %3114 = vmatpush1.bf16.msra.mxu1 %v3113_v11  ;;  %3342 = vmatpush1.bf16.msra.mxu0 %v3341_v23  ;;  %v1884_v11 = vld [vmem:[%s6935_s3 + $0x3a8] sm:$0xff]  ;;  %v413_v23 = vld [vmem:[%s6933_s1 + $0xb38] sm:$0xff] }
 0x183   :  { %3116 = vmatprep.subr.bf16.mxu1 %v3115_v17  ;;  %3344 = vmatprep.subr.bf16.mxu0 %v3343_v28  ;;  %v3359_v17 = vpack.c.bf16 %v1886_v15, %v1884_v11  ;;  %v1890_v28 = vld [vmem:[%s6935_s3 + $0x3d8] sm:$0xff]  ;;  %v3139_v30 = vpack.c.bf16 %v421_v24, %v413_v23  ;;  %v500_v11 = vld [vmem:[%s6933_s1 + $0xdf0] sm:$0xff]  ;;  %v3167_v24 = vpack.c.bf16 %v533_v22, %v525_v21 }
 0x184   :  { %v509_v15 = vld [vmem:[%s6933_s1 + $0xe38] sm:$0xff]  ;;  %v668_v21 = vld [vmem:[%s6933_s1 + $0x1330] sm:$0xff] }
 0x185   :  { %1526 = vmatmul.mubr.f32.vlgmr.msra.gmra.mrb[4].mxu1 %v3561_v34  ;;  %v437_v34 = vld [vmem:[%s6933_s1 + $0xbf8] sm:$0xff]  ;;  %v676_v22 = vld [vmem:[%s6933_s1 + $0x1370] sm:$0xff] }
 0x186   :  { %3118 = vmatpush1.bf16.msra.mxu1 %v3117_v27  ;;  %1596 = vmatprep.mubr.f32.mxu1 %v3562_v39  ;;  %v1888_v27 = vld [vmem:[%s6935_s3 + $0x3c8] sm:$0xff]  ;;  %v3367_v39 = vpack.c.bf16 %v1894_v37, %v1892_v35  ;;  %v564_v35 = vld [vmem:[%s6933_s1 + $0xff0] sm:$0xff]  ;;  %v573_v37 = vld [vmem:[%s6933_s1 + $0x1038] sm:$0xff] }
 0x187   :  { %3120 = vmatprep.subr.bf16.mxu1 %v3119_v4  ;;  %3346 = vmatpush1.bf16.msra.mxu0 %v3345_v33  ;;  %v3363_v63 = vpack.c.bf16 %v1890_v28, %v1888_v27  ;;  %v1887_v4 = vld [vmem:[%s6935_s3 + $0x3c0] sm:$0xff]  ;;  %v429_v33 = vld [vmem:[%s6933_s1 + $0xbb8] sm:$0xff]  ;;  %v532_v27 = vld [vmem:[%s6933_s1 + $0xef0] sm:$0xff] }
 0x188   :  { %3348 = vmatprep.subr.bf16.mxu0 %v3347_v12  ;;  %v3365_v36 = vpack.c.bf16 %v1889_v26, %v1887_v4  ;;  %v1891_v12 = vld [vmem:[%s6935_s3 + $0x3e0] sm:$0xff]  ;;  %v3143_v41 = vpack.c.bf16 %v437_v34, %v429_v33  ;;  %v541_v28 = vld [vmem:[%s6933_s1 + $0xf38] sm:$0xff]  ;;  %v540_v26 = vld [vmem:[%s6933_s1 + $0xf30] sm:$0xff] }
 0x189   :  { %v3369_v45 = vpack.c.bf16 %v1893_v40, %v1891_v12  ;;  %v572_v40 = vld [vmem:[%s6933_s1 + $0x1030] sm:$0xff] }
 0x18a   :  { %3122 = vmatpush1.bf16.msra.mxu1 %v3121_v38  ;;  %v3141_v38 = vpack.c.bf16 %v420_v32, %v412_v31  ;;  %v557_v31 = vld [vmem:[%s6933_s1 + $0xfb8] sm:$0xff] }
 0x18b   :  { %3124 = vmatprep.subr.bf16.mxu1 %v3123_v6  ;;  %3350 = vmatpush1.bf16.msra.mxu0 %v3349_v47  ;;  %v436_v6 = vld [vmem:[%s6933_s1 + $0xbf0] sm:$0xff]  ;;  %v1898_v47 = vld [vmem:[%s6935_s3 + $0x418] sm:$0xff] }
 0x18c   :  { %3352 = vmatprep.subr.bf16.mxu0 %v3351_v48  ;;  %v3145_v48 = vpack.c.bf16 %v436_v6, %v428_v42  ;;  %v3371_v49 = vpack.c.bf16 %v1898_v47, %v1896_v46  ;;  %v565_v32 = vld [vmem:[%s6933_s1 + $0xff8] sm:$0xff]  ;;  %v596_v46 = vld [vmem:[%s6933_s1 + $0x10f0] sm:$0xff] }
 0x18d   :  { %v3175_v34 = vpack.c.bf16 %v565_v32, %v557_v31  ;;  %v589_v42 = vld [vmem:[%s6933_s1 + $0x10b8] sm:$0xff]  ;;  %v700_v31 = vld [vmem:[%s6933_s1 + $0x1430] sm:$0xff] }
 0x18e   :  { %3126 = vmatpush1.bf16.msra.mxu1 %v3125_v51  ;;  %v444_v51 = vld [vmem:[%s6933_s1 + $0xc30] sm:$0xff]  ;;  %v597_v6 = vld [vmem:[%s6933_s1 + $0x10f8] sm:$0xff] }
 0x18f   :  { %3128 = vmatprep.subr.bf16.mxu1 %v3127_v52  ;;  %3354 = vmatpush1.bf16.msra.mxu0 %v3353_v57  ;;  %v452_v52 = vld [vmem:[%s6933_s1 + $0xc70] sm:$0xff]  ;;  %v3183_v44 = vpack.c.bf16 %v597_v6, %v589_v42  ;;  %v605_v47 = vld [vmem:[%s6933_s1 + $0x1138] sm:$0xff] }
 0x190   :  { %3356 = vmatprep.subr.bf16.mxu0 %v3355_v61  ;;  %v3149_v55 = vpack.c.bf16 %v452_v52, %v444_v51  ;;  %v460_v57 = vld [vmem:[%s6933_s1 + $0xcb0] sm:$0xff]  ;;  %v3564_v51 = vld [vmem:[%s6934_s0 + $0x28] sm:$0xff] }
 0x191   :  { %v3153_v61 = vpack.c.bf16 %v468_v58, %v460_v57  ;;  %v3189_v57 = vpack.c.bf16 %v612_v54, %v604_v53  ;;  %v708_v32 = vld [vmem:[%s6933_s1 + $0x1470] sm:$0xff] }
 0x192   :  { %3130 = vmatpush1.bf16.msra.mxu1 %v3129_v60  ;;  %v485_v60 = vld [vmem:[%s6933_s1 + $0xd78] sm:$0xff] }
 0x193   :  { %3132 = vmatprep.subr.bf16.mxu1 %v3131_v2  ;;  %3358 = vmatpush1.bf16.msra.mxu0 %v3357_v8  ;;  %v3155_v62 = vpack.c.bf16 %v485_v60, %v477_v59  ;;  %v484_v2 = vld [vmem:[%s6933_s1 + $0xd70] sm:$0xff] }
 0x194   :  { %3360 = vmatprep.subr.bf16.mxu0 %v3359_v17  ;;  %v3157_v7 = vpack.c.bf16 %v484_v2, %v476_v0  ;;  %v492_v8 = vld [vmem:[%s6933_s1 + $0xdb0] sm:$0xff] }
 0x195   :  { %v3161_v17 = vpack.c.bf16 %v500_v11, %v492_v8  ;;  %v620_v59 = vld [vmem:[%s6933_s1 + $0x11b0] sm:$0xff]  ;;  %v3197_v8 = vpack.c.bf16 %v644_v5, %v636_v3 }
 0x196   :  { %3134 = vmatpush1.bf16.msra.mxu1 %v3133_v16  ;;  %v517_v16 = vld [vmem:[%s6933_s1 + $0xe78] sm:$0xff]  ;;  %v628_v60 = vld [vmem:[%s6933_s1 + $0x11f0] sm:$0xff] }
 0x197   :  { %3136 = vmatprep.subr.bf16.mxu1 %v3135_v20  ;;  %3362 = vmatpush1.bf16.msra.mxu0 %v3361_v25  ;;  %v3163_v18 = vpack.c.bf16 %v517_v16, %v509_v15  ;;  %v516_v20 = vld [vmem:[%s6933_s1 + $0xe70] sm:$0xff]  ;;  %v3193_v0 = vpack.c.bf16 %v628_v60, %v620_v59 }
 0x198   :  { %3364 = vmatprep.subr.bf16.mxu0 %v3363_v63  ;;  %v3165_v23 = vpack.c.bf16 %v516_v20, %v508_v19  ;;  %v524_v25 = vld [vmem:[%s6933_s1 + $0xeb0] sm:$0xff] }
 0x199   :  { %v3169_v63 = vpack.c.bf16 %v532_v27, %v524_v25  ;;  %v652_v15 = vld [vmem:[%s6933_s1 + $0x12b0] sm:$0xff]  ;;  %v3205_v25 = vpack.c.bf16 %v676_v22, %v668_v21 }
 0x19a   :  { %3138 = vmatpush1.bf16.msra.mxu1 %v3137_v29  ;;  %v549_v29 = vld [vmem:[%s6933_s1 + $0xf78] sm:$0xff]  ;;  %v660_v16 = vld [vmem:[%s6933_s1 + $0x12f0] sm:$0xff] }
 0x19b   :  { %3140 = vmatprep.subr.bf16.mxu1 %v3139_v30  ;;  %3366 = vmatpush1.bf16.msra.mxu0 %v3365_v36  ;;  %v3171_v4 = vpack.c.bf16 %v549_v29, %v541_v28  ;;  %v548_v30 = vld [vmem:[%s6933_s1 + $0xf70] sm:$0xff]  ;;  %v3201_v19 = vpack.c.bf16 %v660_v16, %v652_v15 }
 0x19c   :  { %3368 = vmatprep.subr.bf16.mxu0 %v3367_v39  ;;  %v3173_v33 = vpack.c.bf16 %v548_v30, %v540_v26  ;;  %v556_v36 = vld [vmem:[%s6933_s1 + $0xfb0] sm:$0xff] }
 0x19d   :  { %v3177_v39 = vpack.c.bf16 %v564_v35, %v556_v36  ;;  %v684_v28 = vld [vmem:[%s6933_s1 + $0x13b0] sm:$0xff]  ;;  %v1721_v36 = vsub.s32 4, %v5661_v1  ;;  %v1725_v35 = vsub.s32 5, %v5661_v1 }
 0x19e   :  { %3142 = vmatpush1.bf16.msra.mxu1 %v3141_v38  ;;  %v581_v38 = vld [vmem:[%s6933_s1 + $0x1078] sm:$0xff]  ;;  %v692_v29 = vld [vmem:[%s6933_s1 + $0x13f0] sm:$0xff] }
 0x19f   :  { %3144 = vmatprep.subr.bf16.mxu1 %v3143_v41  ;;  %3370 = vmatpush1.bf16.msra.mxu0 %v3369_v45  ;;  %v3179_v12 = vpack.c.bf16 %v581_v38, %v573_v37  ;;  %v580_v41 = vld [vmem:[%s6933_s1 + $0x1070] sm:$0xff]  ;;  %v3209_v26 = vpack.c.bf16 %v692_v29, %v684_v28  ;;  %v3213_v37 = vpack.c.bf16 %v708_v32, %v700_v31  ;;  %v1713_v28 = vsub.s32 2, %v5661_v1  ;;  %v1895_v32 = vld [vmem:[%s6935_s3 + $0x400] sm:$0xff] }
 0x1a0   :  { %3372 = vmatprep.subr.bf16.mxu0 %v3371_v49  ;;  %v3181_v43 = vpack.c.bf16 %v580_v41, %v572_v40  ;;  %v588_v45 = vld [vmem:[%s6933_s1 + $0x10b0] sm:$0xff]  ;;  %v733_v40 = vld [vmem:[%s6933_s1 + $0x1538] sm:$0xff]  ;;  %v1722_v42 = vrot.slane %v5679_v13, %v1721_v36  ;;  %v1717_v29 = vsub.s32 3, %v5661_v1  ;;  %v1900_v36 = vld [vmem:[%s6935_s3 + $0x428] sm:$0xff] }
 0x1a1   :  { %v3563_v49 = vld [vmem:[%s6934_s0 + $0x10] sm:$0xff]  ;;  %v741_v41 = vld [vmem:[%s6933_s1 + $0x1578] sm:$0xff] }
 0x1a2   :  { %3146 = vmatpush1.bf16.msra.mxu1 %v3145_v48  ;;  %v613_v48 = vld [vmem:[%s6933_s1 + $0x1178] sm:$0xff] }
 0x1a3   :  { %3148 = vmatprep.subr.bf16.mxu1 %v3147_v50  ;;  %v3185_v50 = vpack.c.bf16 %v596_v46, %v588_v45  ;;  %v3187_v52 = vpack.c.bf16 %v613_v48, %v605_v47  ;;  %v3219_v46 = vpack.c.bf16 %v741_v41, %v733_v40  ;;  %v732_v47 = vld [vmem:[%s6933_s1 + $0x1530] sm:$0xff]  ;;  %v1899_v40 = vld [vmem:[%s6935_s3 + $0x420] sm:$0xff] }
 0x1a4   :  { %v740_v48 = vld [vmem:[%s6933_s1 + $0x1570] sm:$0xff] }
 0x1a5   :  { %v3221_v53 = vpack.c.bf16 %v740_v48, %v732_v47  ;;  %v1901_v41 = vld [vmem:[%s6935_s3 + $0x430] sm:$0xff]  ;;  %v1908_v47 = vld [vmem:[%s6935_s3 + $0x468] sm:$0xff]  ;;  %v1910_v48 = vld [vmem:[%s6935_s3 + $0x478] sm:$0xff] }
 0x1a6   :  { %3150 = vmatpush1.bf16.msra.mxu1 %v3149_v55  ;;  %v621_v55 = vld [vmem:[%s6933_s1 + $0x11b8] sm:$0xff] }
 0x1a7   :  { %3152 = vmatprep.subr.bf16.mxu1 %v3151_v56  ;;  %v629_v56 = vld [vmem:[%s6933_s1 + $0x11f8] sm:$0xff] }
 0x1a8   :  { %v3191_v58 = vpack.c.bf16 %v629_v56, %v621_v55  ;;  %v748_v55 = vld [vmem:[%s6933_s1 + $0x15b0] sm:$0xff] }
 0x1a9   :  { %v756_v56 = vld [vmem:[%s6933_s1 + $0x15f0] sm:$0xff] }
 0x1aa   :  { %3154 = vmatpush1.bf16.msra.mxu1 %v3153_v61  ;;  %v637_v61 = vld [vmem:[%s6933_s1 + $0x1238] sm:$0xff]  ;;  %v3225_v59 = vpack.c.bf16 %v756_v56, %v748_v55 }
 0x1ab   :  { %3156 = vmatprep.subr.bf16.mxu1 %v3155_v62  ;;  %v645_v62 = vld [vmem:[%s6933_s1 + $0x1278] sm:$0xff] }
 0x1ac   :  { %v3195_v2 = vpack.c.bf16 %v645_v62, %v637_v61  ;;  %v764_v61 = vld [vmem:[%s6933_s1 + $0x1630] sm:$0xff]  ;;  %v1914_v55 = vld [vmem:[%s6935_s3 + $0x498] sm:$0xff] }
 0x1ad   :  { %v772_v62 = vld [vmem:[%s6933_s1 + $0x1670] sm:$0xff] }
 0x1ae   :  { %3158 = vmatpush1.bf16.msra.mxu1 %v3157_v7  ;;  %v653_v7 = vld [vmem:[%s6933_s1 + $0x12b8] sm:$0xff]  ;;  %v3229_v3 = vpack.c.bf16 %v772_v62, %v764_v61 }
 0x1af   :  { %3160 = vmatprep.subr.bf16.mxu1 %v3159_v10  ;;  %v661_v10 = vld [vmem:[%s6933_s1 + $0x12f8] sm:$0xff] }
 0x1b0   :  { %v3199_v11 = vpack.c.bf16 %v661_v10, %v653_v7  ;;  %v780_v7 = vld [vmem:[%s6933_s1 + $0x16b0] sm:$0xff]  ;;  %v1918_v61 = vld [vmem:[%s6935_s3 + $0x4b8] sm:$0xff] }
 0x1b1   :  { %v788_v10 = vld [vmem:[%s6933_s1 + $0x16f0] sm:$0xff] }
 0x1b2   :  { %3162 = vmatpush1.bf16.msra.mxu1 %v3161_v17  ;;  %v669_v17 = vld [vmem:[%s6933_s1 + $0x1338] sm:$0xff]  ;;  %v3233_v15 = vpack.c.bf16 %v788_v10, %v780_v7 }
 0x1b3   :  { %3164 = vmatprep.subr.bf16.mxu1 %v3163_v18  ;;  %v677_v18 = vld [vmem:[%s6933_s1 + $0x1378] sm:$0xff] }
 0x1b4   :  { %v3203_v20 = vpack.c.bf16 %v677_v18, %v669_v17  ;;  %v796_v17 = vld [vmem:[%s6933_s1 + $0x1730] sm:$0xff]  ;;  %v1922_v7 = vld [vmem:[%s6935_s3 + $0x4d8] sm:$0xff] }
 0x1b5   :  { %v804_v18 = vld [vmem:[%s6933_s1 + $0x1770] sm:$0xff] }
 0x1b6   :  { %3166 = vmatpush1.bf16.msra.mxu1 %v3165_v23  ;;  %v685_v23 = vld [vmem:[%s6933_s1 + $0x13b8] sm:$0xff]  ;;  %v3237_v21 = vpack.c.bf16 %v804_v18, %v796_v17 }
 0x1b7   :  { %3168 = vmatprep.subr.bf16.mxu1 %v3167_v24  ;;  %v693_v24 = vld [vmem:[%s6933_s1 + $0x13f8] sm:$0xff] }
 0x1b8   :  { %v3207_v27 = vpack.c.bf16 %v693_v24, %v685_v23  ;;  %v812_v23 = vld [vmem:[%s6933_s1 + $0x17b0] sm:$0xff]  ;;  %v1926_v17 = vld [vmem:[%s6935_s3 + $0x4f8] sm:$0xff] }
 0x1b9   :  { %v820_v24 = vld [vmem:[%s6933_s1 + $0x17f0] sm:$0xff] }
 0x1ba   :  { %3170 = vmatpush1.bf16.msra.mxu1 %v3169_v63  ;;  %v701_v63 = vld [vmem:[%s6933_s1 + $0x1438] sm:$0xff] }
 0x1bb   :  { %3172 = vmatprep.subr.bf16.mxu1 %v3171_v4  ;;  %v709_v4 = vld [vmem:[%s6933_s1 + $0x1478] sm:$0xff] }
 0x1bc   :  { %v3211_v30 = vpack.c.bf16 %v709_v4, %v701_v63  ;;  %v1714_v63 = vrot.slane %v5679_v13, %v1713_v28  ;;  %v1929_v28 = vld [vmem:[%s6935_s3 + $0x510] sm:$0xff] }
 0x1be   :  { %3174 = vmatpush1.bf16.msra.mxu1 %v3173_v33  ;;  %v717_v33 = vld [vmem:[%s6933_s1 + $0x14b8] sm:$0xff] }
 0x1bf   :  { %3176 = vmatprep.subr.bf16.mxu1 %v3175_v34  ;;  %v725_v34 = vld [vmem:[%s6933_s1 + $0x14f8] sm:$0xff] }
 0x1c0   :  { %v3215_v38 = vpack.c.bf16 %v725_v34, %v717_v33  ;;  %v1897_v33 = vld [vmem:[%s6935_s3 + $0x410] sm:$0xff] }
 0x1c2   :  { %3178 = vmatpush1.bf16.msra.mxu1 %v3177_v39  ;;  %v716_v39 = vld [vmem:[%s6933_s1 + $0x14b0] sm:$0xff] }
 0x1c3   :  { %3180 = vmatprep.subr.bf16.mxu1 %v3179_v12  ;;  %v724_v12 = vld [vmem:[%s6933_s1 + $0x14f0] sm:$0xff] }
 0x1c5   :  { %1597 = vmatmul.mubr.f32.vlgmr.msra.gmra.mrb[4].mxu1 %v3563_v49  ;;  %v749_v49 = vld [vmem:[%s6933_s1 + $0x15b8] sm:$0xff] }
 0x1c6   :  { %3182 = vmatpush1.bf16.msra.mxu1 %v3181_v43  ;;  %1667 = vmatprep.mubr.f32.mxu1 %v3564_v51  ;;  %v1726_v43 = vrot.slane %v5679_v13, %v1725_v35  ;;  %v1902_v35 = vld [vmem:[%s6935_s3 + $0x438] sm:$0xff] }
 0x1c7   :  { %3184 = vmatprep.subr.bf16.mxu1 %v3183_v44  ;;  %v3217_v44 = vpack.c.bf16 %v724_v12, %v716_v39  ;;  %v3375_v12 = vpack.c.bf16 %v1902_v35, %v1900_v36  ;;  %v1935_v35 = vld [vmem:[%s6935_s3 + $0x540] sm:$0xff] }
 0x1ca   :  { %3186 = vmatpush1.bf16.msra.mxu1 %v3185_v50  ;;  %v757_v50 = vld [vmem:[%s6933_s1 + $0x15f8] sm:$0xff] }
 0x1cb   :  { %3188 = vmatprep.subr.bf16.mxu1 %v3187_v52  ;;  %v3223_v54 = vpack.c.bf16 %v757_v50, %v749_v49  ;;  %v3383_v50 = vpack.c.bf16 %v1910_v48, %v1908_v47  ;;  %v1948_v47 = vld [vmem:[%s6935_s3 + $0x5a8] sm:$0xff]  ;;  %v1950_v48 = vld [vmem:[%s6935_s3 + $0x5b8] sm:$0xff] }
 0x1ce   :  { %3190 = vmatpush1.bf16.msra.mxu1 %v3189_v57  ;;  %v765_v57 = vld [vmem:[%s6933_s1 + $0x1638] sm:$0xff] }
 0x1cf   :  { %3192 = vmatprep.subr.bf16.mxu1 %v3191_v58  ;;  %v773_v58 = vld [vmem:[%s6933_s1 + $0x1678] sm:$0xff] }
 0x1d0   :  { %v3227_v60 = vpack.c.bf16 %v773_v58, %v765_v57  ;;  %v1911_v58 = vld [vmem:[%s6935_s3 + $0x480] sm:$0xff] }
 0x1d2   :  { %3194 = vmatpush1.bf16.msra.mxu1 %v3193_v0  ;;  %v781_v0 = vld [vmem:[%s6933_s1 + $0x16b8] sm:$0xff] }
 0x1d3   :  { %3196 = vmatprep.subr.bf16.mxu1 %v3195_v2  ;;  %v789_v2 = vld [vmem:[%s6933_s1 + $0x16f8] sm:$0xff] }
 0x1d4   :  { %v3231_v5 = vpack.c.bf16 %v789_v2, %v781_v0  ;;  %v1915_v2 = vld [vmem:[%s6935_s3 + $0x4a0] sm:$0xff] }
 0x1d6   :  { %3198 = vmatpush1.bf16.msra.mxu1 %v3197_v8  ;;  %v797_v8 = vld [vmem:[%s6933_s1 + $0x1738] sm:$0xff] }
 0x1d7   :  { %3200 = vmatprep.subr.bf16.mxu1 %v3199_v11  ;;  %v805_v11 = vld [vmem:[%s6933_s1 + $0x1778] sm:$0xff] }
 0x1d8   :  { %v3235_v16 = vpack.c.bf16 %v805_v11, %v797_v8  ;;  %v1919_v11 = vld [vmem:[%s6935_s3 + $0x4c0] sm:$0xff] }
 0x1da   :  { %3202 = vmatpush1.bf16.msra.mxu1 %v3201_v19  ;;  %v813_v19 = vld [vmem:[%s6933_s1 + $0x17b8] sm:$0xff] }
 0x1db   :  { %3204 = vmatprep.subr.bf16.mxu1 %v3203_v20  ;;  %v821_v20 = vld [vmem:[%s6933_s1 + $0x17f8] sm:$0xff] }
 0x1dc   :  { %v3239_v22 = vpack.c.bf16 %v821_v20, %v813_v19  ;;  %v1923_v20 = vld [vmem:[%s6935_s3 + $0x4e0] sm:$0xff] }
 0x1de   :  { %3206 = vmatpush1.bf16.msra.mxu1 %v3205_v25  ;;  %v3241_v25 = vpack.c.bf16 %v820_v24, %v812_v23  ;;  %v1930_v23 = vld [vmem:[%s6935_s3 + $0x518] sm:$0xff] }
 0x1df   :  { %3208 = vmatprep.subr.bf16.mxu1 %v3207_v27  ;;  %v3565_v27 = vld [vmem:[%s6934_s0 + $0x20] sm:$0xff] }
 0x1e2   :  { %3210 = vmatpush1.bf16.msra.mxu1 %v3209_v26  ;;  %v1718_v26 = vrot.slane %v5679_v13, %v1717_v29  ;;  %v1932_v29 = vld [vmem:[%s6935_s3 + $0x528] sm:$0xff] }
 0x1e3   :  { %3212 = vmatprep.subr.bf16.mxu1 %v3211_v30  ;;  %v1456_v6 = vpop.f32.mrb[2].mxu0 }
 0x1e4   :  { %v1458_v45 = vpop.f32.mrb[3].mxu0  ;;  %v6354_v51 = vadd.f32 %v1722_v42, %v1456_v6  ;;  %v1904_v42 = vld [vmem:[%s6935_s3 + $0x448] sm:$0xff]  ;;  %v1906_v6 = vld [vmem:[%s6935_s3 + $0x458] sm:$0xff] }
 0x1e5   :  { %v6356_v52 = vadd.f32 %v1726_v43, %v1458_v45  ;;  %v3377_v43 = vpack.c.bf16 %v1901_v41, %v1899_v40  ;;  %v1903_v45 = vld [vmem:[%s6935_s3 + $0x440] sm:$0xff]  ;;  %v1941_v41 = vld [vmem:[%s6935_s3 + $0x570] sm:$0xff] }
 0x1e6   :  { %3214 = vmatpush1.bf16.msra.mxu1 %v3213_v37  ;;  %1755 = vst [vmem:[%s6937_s8 + $0x20] sm:$0xff] %v6354_v51  ;;  %v3373_v37 = vpack.c.bf16 %v1897_v33, %v1895_v32  ;;  %v1936_v32 = vld [vmem:[%s6935_s3 + $0x548] sm:$0xff]  ;;  %v1938_v33 = vld [vmem:[%s6935_s3 + $0x558] sm:$0xff]  ;;  %v1939_v40 = vld [vmem:[%s6935_s3 + $0x560] sm:$0xff] }
 0x1e7   :  { %3216 = vmatprep.subr.bf16.mxu1 %v3215_v38  ;;  %1756 = vst [vmem:[%s6937_s8 + $0x28] sm:$0xff] %v6356_v52  ;;  %v1764_v38 = vmax.f32 %v6356_v52, 0.0  ;;  %v1907_v52 = vld [vmem:[%s6935_s3 + $0x460] sm:$0xff]  ;;  %v3411_v36 = vpack.c.bf16 %v1938_v33, %v1936_v32  ;;  %v2322_v32 = vld [vmem:[%s6938_s5 + $0x8] sm:$0xff]  ;;  %v2339_v33 = vld [vmem:[%s6938_s5 + $0x90] sm:$0xff] }
 0x1ea   :  { %3218 = vmatpush1.bf16.msra.mxu1 %v3217_v44  ;;  %v3379_v44 = vpack.c.bf16 %v1906_v6, %v1904_v42  ;;  %v1944_v42 = vld [vmem:[%s6935_s3 + $0x588] sm:$0xff]  ;;  %v1946_v6 = vld [vmem:[%s6935_s3 + $0x598] sm:$0xff] }
 0x1eb   :  { %3220 = vmatprep.subr.bf16.mxu1 %v3219_v46  ;;  %v1905_v46 = vld [vmem:[%s6935_s3 + $0x450] sm:$0xff] }
 0x1ec   :  { %v3381_v49 = vpack.c.bf16 %v1905_v46, %v1903_v45  ;;  %v1943_v45 = vld [vmem:[%s6935_s3 + $0x580] sm:$0xff]  ;;  %v1945_v46 = vld [vmem:[%s6935_s3 + $0x590] sm:$0xff] }
 0x1ee   :  { %3222 = vmatpush1.bf16.msra.mxu1 %v3221_v53  ;;  %v1909_v53 = vld [vmem:[%s6935_s3 + $0x470] sm:$0xff] }
 0x1ef   :  { %3224 = vmatprep.subr.bf16.mxu1 %v3223_v54  ;;  %v1912_v54 = vld [vmem:[%s6935_s3 + $0x488] sm:$0xff]  ;;  %v3385_v56 = vpack.c.bf16 %v1909_v53, %v1907_v52  ;;  %v1947_v52 = vld [vmem:[%s6935_s3 + $0x5a0] sm:$0xff]  ;;  %v1949_v53 = vld [vmem:[%s6935_s3 + $0x5b0] sm:$0xff] }
 0x1f0   :  { %v3387_v57 = vpack.c.bf16 %v1914_v55, %v1912_v54  ;;  %v1952_v54 = vld [vmem:[%s6935_s3 + $0x5c8] sm:$0xff]  ;;  %v1954_v55 = vld [vmem:[%s6935_s3 + $0x5d8] sm:$0xff] }
 0x1f2   :  { %3226 = vmatpush1.bf16.msra.mxu1 %v3225_v59  ;;  %v1913_v59 = vld [vmem:[%s6935_s3 + $0x490] sm:$0xff] }
 0x1f3   :  { %3228 = vmatprep.subr.bf16.mxu1 %v3227_v60  ;;  %v1916_v60 = vld [vmem:[%s6935_s3 + $0x4a8] sm:$0xff]  ;;  %v3389_v62 = vpack.c.bf16 %v1913_v59, %v1911_v58  ;;  %v1951_v58 = vld [vmem:[%s6935_s3 + $0x5c0] sm:$0xff]  ;;  %v1953_v59 = vld [vmem:[%s6935_s3 + $0x5d0] sm:$0xff] }
 0x1f4   :  { %v3391_v0 = vpack.c.bf16 %v1918_v61, %v1916_v60  ;;  %v1956_v60 = vld [vmem:[%s6935_s3 + $0x5e8] sm:$0xff]  ;;  %v1958_v61 = vld [vmem:[%s6935_s3 + $0x5f8] sm:$0xff] }
 0x1f6   :  { %3230 = vmatpush1.bf16.msra.mxu1 %v3229_v3  ;;  %v1917_v3 = vld [vmem:[%s6935_s3 + $0x4b0] sm:$0xff] }
 0x1f7   :  { %3232 = vmatprep.subr.bf16.mxu1 %v3231_v5  ;;  %v1920_v5 = vld [vmem:[%s6935_s3 + $0x4c8] sm:$0xff]  ;;  %v3393_v10 = vpack.c.bf16 %v1917_v3, %v1915_v2  ;;  %v1955_v2 = vld [vmem:[%s6935_s3 + $0x5e0] sm:$0xff]  ;;  %v1957_v3 = vld [vmem:[%s6935_s3 + $0x5f0] sm:$0xff] }
 0x1f8   :  { %v3395_v8 = vpack.c.bf16 %v1922_v7, %v1920_v5  ;;  %v1960_v5 = vld [vmem:[%s6935_s3 + $0x608] sm:$0xff]  ;;  %v1962_v7 = vld [vmem:[%s6935_s3 + $0x618] sm:$0xff] }
 0x1fa   :  { %3234 = vmatpush1.bf16.msra.mxu1 %v3233_v15  ;;  %v1921_v15 = vld [vmem:[%s6935_s3 + $0x4d0] sm:$0xff] }
 0x1fb   :  { %3236 = vmatprep.subr.bf16.mxu1 %v3235_v16  ;;  %v1924_v16 = vld [vmem:[%s6935_s3 + $0x4e8] sm:$0xff]  ;;  %v3397_v18 = vpack.c.bf16 %v1921_v15, %v1919_v11  ;;  %v1959_v11 = vld [vmem:[%s6935_s3 + $0x600] sm:$0xff]  ;;  %v1961_v15 = vld [vmem:[%s6935_s3 + $0x610] sm:$0xff] }
 0x1fc   :  { %v3399_v19 = vpack.c.bf16 %v1926_v17, %v1924_v16  ;;  %v1964_v16 = vld [vmem:[%s6935_s3 + $0x628] sm:$0xff]  ;;  %v1966_v17 = vld [vmem:[%s6935_s3 + $0x638] sm:$0xff] }
 0x1fe   :  { %3238 = vmatpush1.bf16.msra.mxu1 %v3237_v21  ;;  %v1925_v21 = vld [vmem:[%s6935_s3 + $0x4f0] sm:$0xff] }
 0x1ff   :  { %3240 = vmatprep.subr.bf16.mxu1 %v3239_v22  ;;  %v1928_v22 = vld [vmem:[%s6935_s3 + $0x508] sm:$0xff]  ;;  %v3401_v24 = vpack.c.bf16 %v1925_v21, %v1923_v20  ;;  %v3439_v20 = vpack.c.bf16 %v1966_v17, %v1964_v16  ;;  %v1963_v21 = vld [vmem:[%s6935_s3 + $0x620] sm:$0xff]  ;;  %v1986_v16 = vld [vmem:[%s6935_s3 + $0x6d8] sm:$0xff] }
 0x200   :  { %v2347_v17 = vld [vmem:[%s6938_s5 + $0xd0] sm:$0xff] }
 0x202   :  { %3242 = vmatpush1.bf16.msra.mxu1 %v3241_v25  ;;  %v3403_v25 = vpack.c.bf16 %v1930_v23, %v1928_v22  ;;  %v1965_v22 = vld [vmem:[%s6935_s3 + $0x630] sm:$0xff]  ;;  %v1968_v23 = vld [vmem:[%s6935_s3 + $0x648] sm:$0xff] }
 0x205   :  { %1668 = vmatmul.mubr.f32.vlgmr.msra.gmra.mrb[4].mxu1 %v3565_v27  ;;  %v1927_v27 = vld [vmem:[%s6935_s3 + $0x500] sm:$0xff] }
 0x218   :  { %v1243_v4 = vpop.f32.mrb[2].mxu1 }
 0x219   :  { %v1245_v30 = vpop.f32.mrb[3].mxu1  ;;  %v1745_v31 = vadd.f32 %v1714_v63, %v1243_v4  ;;  %v1934_v63 = vld [vmem:[%s6935_s3 + $0x538] sm:$0xff]  ;;  %v3405_v4 = vpack.c.bf16 %v1929_v28, %v1927_v27  ;;  %v3441_v27 = vpack.c.bf16 %v1965_v22, %v1963_v21  ;;  %v1972_v28 = vld [vmem:[%s6935_s3 + $0x668] sm:$0xff]  ;;  %v1985_v21 = vld [vmem:[%s6935_s3 + $0x6d0] sm:$0xff] }
 0x21a   :  { %v1746_v34 = vadd.f32 %v1718_v26, %v1245_v30  ;;  %v3407_v26 = vpack.c.bf16 %v1934_v63, %v1932_v29  ;;  %v1931_v30 = vld [vmem:[%s6935_s3 + $0x520] sm:$0xff]  ;;  %v1974_v29 = vld [vmem:[%s6935_s3 + $0x678] sm:$0xff] }
 0x21b   :  { %1753 = vst [vmem:[%s6937_s8 + $0x10] sm:$0xff] %v1745_v31  ;;  %v1761_v39 = vmax.f32 %v1745_v31, 0.0  ;;  %v1933_v31 = vld [vmem:[%s6935_s3 + $0x530] sm:$0xff]  ;;  %v2337_v63 = vld [vmem:[%s6938_s5 + $0x80] sm:$0xff] }
 0x21c   :  { %1754 = vst [vmem:[%s6937_s8 + $0x18] sm:$0xff] %v1746_v34  ;;  %v1762_v13 = vmax.f32 %v1746_v34, 0.0  ;;  %v3409_v34 = vpack.c.bf16 %v1933_v31, %v1931_v30 }
 0x21e   :  { %2170 = vmatprep.mubr.f32.mxu0 %v1762_v13  ;;  %v1937_v13 = vld [vmem:[%s6935_s3 + $0x550] sm:$0xff] }
 0x21f   :  { %2171 = vmatmul.mubr.f32.vlgmr.msra.gmra.mrb[4].mxu0 %v1761_v39  ;;  %v3413_v39 = vpack.c.bf16 %v1937_v13, %v1935_v35  ;;  %v2323_v13 = vld [vmem:[%s6938_s5 + $0x10] sm:$0xff] }
 0x220   :  { %3374 = vmatpush1.bf16.msra.mxu0 %v3373_v37  ;;  %2241 = vmatprep.mubr.f32.mxu0 %v1764_v38  ;;  %v1940_v37 = vld [vmem:[%s6935_s3 + $0x568] sm:$0xff]  ;;  %v1942_v38 = vld [vmem:[%s6935_s3 + $0x578] sm:$0xff] }
 0x221   :  { %3376 = vmatprep.subr.bf16.mxu0 %v3375_v12  ;;  %v3415_v12 = vpack.c.bf16 %v1942_v38, %v1940_v37  ;;  %v2324_v37 = vld [vmem:[%s6938_s5 + $0x18] sm:$0xff]  ;;  %v2341_v38 = vld [vmem:[%s6938_s5 + $0xa0] sm:$0xff] }
 0x224   :  { %3378 = vmatpush1.bf16.msra.mxu0 %v3377_v43  ;;  %v3417_v43 = vpack.c.bf16 %v1941_v41, %v1939_v40  ;;  %v1971_v40 = vld [vmem:[%s6935_s3 + $0x660] sm:$0xff]  ;;  %v1973_v41 = vld [vmem:[%s6935_s3 + $0x670] sm:$0xff] }
 0x225   :  { %3380 = vmatprep.subr.bf16.mxu0 %v3379_v44  ;;  %v3419_v44 = vpack.c.bf16 %v1946_v6, %v1944_v42  ;;  %v3505_v42 = vpack.c.bf16 %v2324_v37, %v2323_v13  ;;  %v3447_v6 = vpack.c.bf16 %v1974_v29, %v1972_v28  ;;  %v1990_v28 = vld [vmem:[%s6935_s3 + $0x6f8] sm:$0xff]  ;;  %v2349_v29 = vld [vmem:[%s6938_s5 + $0xe0] sm:$0xff] }
 0x226   :  { %v1991_v37 = vld [vmem:[%s6935_s3 + $0x700] sm:$0xff] }
 0x228   :  { %3382 = vmatpush1.bf16.msra.mxu0 %v3381_v49  ;;  %v3421_v49 = vpack.c.bf16 %v1945_v46, %v1943_v45  ;;  %v2325_v45 = vld [vmem:[%s6938_s5 + $0x20] sm:$0xff]  ;;  %v2326_v46 = vld [vmem:[%s6938_s5 + $0x28] sm:$0xff] }
 0x229   :  { %3384 = vmatprep.subr.bf16.mxu0 %v3383_v50  ;;  %v3423_v50 = vpack.c.bf16 %v1950_v48, %v1948_v47  ;;  %v1978_v47 = vld [vmem:[%s6935_s3 + $0x698] sm:$0xff]  ;;  %v2343_v48 = vld [vmem:[%s6938_s5 + $0xb0] sm:$0xff] }
 0x22c   :  { %3386 = vmatpush1.bf16.msra.mxu0 %v3385_v56  ;;  %v3425_v56 = vpack.c.bf16 %v1949_v53, %v1947_v52  ;;  %v1975_v52 = vld [vmem:[%s6935_s3 + $0x680] sm:$0xff]  ;;  %v1977_v53 = vld [vmem:[%s6935_s3 + $0x690] sm:$0xff] }
 0x22d   :  { %3388 = vmatprep.subr.bf16.mxu0 %v3387_v57  ;;  %v3427_v57 = vpack.c.bf16 %v1954_v55, %v1952_v54  ;;  %v3509_v54 = vpack.c.bf16 %v2326_v46, %v2325_v45 }
 0x230   :  { %3390 = vmatpush1.bf16.msra.mxu0 %v3389_v62  ;;  %v3429_v62 = vpack.c.bf16 %v1953_v59, %v1951_v58  ;;  %v2327_v58 = vld [vmem:[%s6938_s5 + $0x30] sm:$0xff]  ;;  %v2328_v59 = vld [vmem:[%s6938_s5 + $0x38] sm:$0xff] }
 0x231   :  { %3392 = vmatprep.subr.bf16.mxu0 %v3391_v0  ;;  %v3431_v0 = vpack.c.bf16 %v1958_v61, %v1956_v60  ;;  %v1982_v60 = vld [vmem:[%s6935_s3 + $0x6b8] sm:$0xff]  ;;  %v2345_v61 = vld [vmem:[%s6938_s5 + $0xc0] sm:$0xff] }
 0x234   :  { %3394 = vmatpush1.bf16.msra.mxu0 %v3393_v10  ;;  %v3433_v10 = vpack.c.bf16 %v1957_v3, %v1955_v2  ;;  %v1979_v2 = vld [vmem:[%s6935_s3 + $0x6a0] sm:$0xff]  ;;  %v1981_v3 = vld [vmem:[%s6935_s3 + $0x6b0] sm:$0xff] }
 0x235   :  { %3396 = vmatprep.subr.bf16.mxu0 %v3395_v8  ;;  %v3435_v8 = vpack.c.bf16 %v1962_v7, %v1960_v5  ;;  %v3513_v5 = vpack.c.bf16 %v2328_v59, %v2327_v58 }
 0x238   :  { %3398 = vmatpush1.bf16.msra.mxu0 %v3397_v18  ;;  %v3437_v18 = vpack.c.bf16 %v1961_v15, %v1959_v11  ;;  %v2329_v11 = vld [vmem:[%s6938_s5 + $0x40] sm:$0xff]  ;;  %v2330_v15 = vld [vmem:[%s6938_s5 + $0x48] sm:$0xff] }
 0x239   :  { %3400 = vmatprep.subr.bf16.mxu0 %v3399_v19  ;;  %v1763_v19 = vmax.f32 %v6354_v51, 0.0  ;;  %v1967_v51 = vld [vmem:[%s6935_s3 + $0x640] sm:$0xff]  ;;  %v3517_v22 = vpack.c.bf16 %v2330_v15, %v2329_v11 }
 0x23c   :  { %3402 = vmatpush1.bf16.msra.mxu0 %v3401_v24  ;;  %v1970_v24 = vld [vmem:[%s6935_s3 + $0x658] sm:$0xff] }
 0x23d   :  { %3404 = vmatprep.subr.bf16.mxu0 %v3403_v25  ;;  %v1969_v25 = vld [vmem:[%s6935_s3 + $0x650] sm:$0xff]  ;;  %v3443_v30 = vpack.c.bf16 %v1970_v24, %v1968_v23  ;;  %v1988_v24 = vld [vmem:[%s6935_s3 + $0x6e8] sm:$0xff] }
 0x240   :  { %3406 = vmatpush1.bf16.msra.mxu0 %v3405_v4  ;;  %v2338_v4 = vld [vmem:[%s6938_s5 + $0x88] sm:$0xff] }
 0x241   :  { %3408 = vmatprep.subr.bf16.mxu0 %v3407_v26  ;;  %v2321_v26 = vld [vmem:[%s6938_s5] sm:$0xff]  ;;  %v3499_v31 = vpack.c.bf16 %v2338_v4, %v2337_v63  ;;  %v2350_v63 = vld [vmem:[%s6938_s5 + $0xe8] sm:$0xff] }
 0x243   :  { %3500 = vmatprep.subr.bf16.mxu1 %v3499_v31  ;;  %v1987_v31 = vld [vmem:[%s6935_s3 + $0x6e0] sm:$0xff] }
 0x244   :  { %3410 = vmatpush1.bf16.msra.mxu0 %v3409_v34  ;;  %v2340_v34 = vld [vmem:[%s6938_s5 + $0x98] sm:$0xff] }
 0x245   :  { %3412 = vmatprep.subr.bf16.mxu0 %v3411_v36  ;;  %v3501_v36 = vpack.c.bf16 %v2322_v32, %v2321_v26  ;;  %v3503_v35 = vpack.c.bf16 %v2340_v34, %v2339_v33  ;;  %v1989_v32 = vld [vmem:[%s6935_s3 + $0x6f0] sm:$0xff]  ;;  %v3523_v33 = vpack.c.bf16 %v2350_v63, %v2349_v29  ;;  %v1992_v34 = vld [vmem:[%s6935_s3 + $0x708] sm:$0xff] }
 0x247   :  { %3502 = vmatpush3.bf16.msra.mxu1 %v3501_v36  ;;  %v1994_v36 = vld [vmem:[%s6935_s3 + $0x718] sm:$0xff] }
 0x248   :  { %3414 = vmatpush1.bf16.msra.mxu0 %v3413_v39  ;;  %v2342_v39 = vld [vmem:[%s6938_s5 + $0xa8] sm:$0xff]  ;;  %3504 = vmatprep.subr.bf16.mxu1 %v3503_v35  ;;  %v3465_v35 = vpack.c.bf16 %v1989_v32, %v1987_v31  ;;  %v3467_v13 = vpack.c.bf16 %v1994_v36, %v1992_v34 }
 0x249   :  { %3416 = vmatprep.subr.bf16.mxu0 %v3415_v12  ;;  %v3445_v12 = vpack.c.bf16 %v1969_v25, %v1967_v51  ;;  %v2331_v25 = vld [vmem:[%s6938_s5 + $0x50] sm:$0xff]  ;;  %v2334_v34 = vld [vmem:[%s6938_s5 + $0x68] sm:$0xff] }
 0x24b   :  { %3506 = vmatpush3.bf16.msra.mxu1 %v3505_v42  ;;  %v1995_v42 = vld [vmem:[%s6935_s3 + $0x720] sm:$0xff] }
 0x24c   :  { %3418 = vmatpush1.bf16.msra.mxu0 %v3417_v43  ;;  %v1976_v43 = vld [vmem:[%s6935_s3 + $0x688] sm:$0xff] }
 0x24d   :  { %3420 = vmatprep.subr.bf16.mxu0 %v3419_v44  ;;  %v3507_v44 = vpack.c.bf16 %v2342_v39, %v2341_v38  ;;  %v3451_v55 = vpack.c.bf16 %v1978_v47, %v1976_v43  ;;  %v1993_v38 = vld [vmem:[%s6935_s3 + $0x710] sm:$0xff]  ;;  %v1996_v39 = vld [vmem:[%s6935_s3 + $0x728] sm:$0xff]  ;;  %v1999_v47 = vld [vmem:[%s6935_s3 + $0x740] sm:$0xff] }
 0x24e   :  { %v2000_v43 = vld [vmem:[%s6935_s3 + $0x748] sm:$0xff] }
 0x24f   :  { %3508 = vmatprep.subr.bf16.mxu1 %v3507_v44  ;;  %v2002_v44 = vld [vmem:[%s6935_s3 + $0x758] sm:$0xff] }
 0x250   :  { %3422 = vmatpush1.bf16.msra.mxu0 %v3421_v49  ;;  %v2344_v49 = vld [vmem:[%s6938_s5 + $0xb8] sm:$0xff]  ;;  %3510 = vmatpush3.bf16.msra.mxu1 %v3509_v54  ;;  %v3475_v46 = vpack.c.bf16 %v2002_v44, %v2000_v43  ;;  %v2003_v54 = vld [vmem:[%s6935_s3 + $0x760] sm:$0xff] }
 0x251   :  { %3424 = vmatprep.subr.bf16.mxu0 %v3423_v50  ;;  %v3449_v50 = vpack.c.bf16 %v1973_v41, %v1971_v40  ;;  %v3469_v40 = vpack.c.bf16 %v1993_v38, %v1991_v37  ;;  %v2335_v38 = vld [vmem:[%s6938_s5 + $0x70] sm:$0xff] }
 0x254   :  { %3426 = vmatpush1.bf16.msra.mxu0 %v3425_v56  ;;  %v1980_v56 = vld [vmem:[%s6935_s3 + $0x6a8] sm:$0xff] }
 0x255   :  { %3428 = vmatprep.subr.bf16.mxu0 %v3427_v57  ;;  %v3511_v57 = vpack.c.bf16 %v2344_v49, %v2343_v48  ;;  %v3455_v7 = vpack.c.bf16 %v1982_v60, %v1980_v56  ;;  %v2001_v48 = vld [vmem:[%s6935_s3 + $0x750] sm:$0xff]  ;;  %v2004_v49 = vld [vmem:[%s6935_s3 + $0x768] sm:$0xff]  ;;  %v2007_v60 = vld [vmem:[%s6935_s3 + $0x780] sm:$0xff] }
 0x256   :  { %v2008_v56 = vld [vmem:[%s6935_s3 + $0x788] sm:$0xff] }
 0x257   :  { %3512 = vmatprep.subr.bf16.mxu1 %v3511_v57  ;;  %v2010_v57 = vld [vmem:[%s6935_s3 + $0x798] sm:$0xff] }
 0x258   :  { %3430 = vmatpush1.bf16.msra.mxu0 %v3429_v62  ;;  %v2346_v62 = vld [vmem:[%s6938_s5 + $0xc8] sm:$0xff]  ;;  %3514 = vmatpush3.bf16.msra.mxu1 %v3513_v5  ;;  %v3483_v59 = vpack.c.bf16 %v2010_v57, %v2008_v56  ;;  %v2011_v5 = vld [vmem:[%s6935_s3 + $0x7a0] sm:$0xff] }
 0x259   :  { %3432 = vmatprep.subr.bf16.mxu0 %v3431_v0  ;;  %v3453_v0 = vpack.c.bf16 %v1977_v53, %v1975_v52  ;;  %v3477_v52 = vpack.c.bf16 %v2001_v48, %v1999_v47 }
 0x25c   :  { %3434 = vmatpush1.bf16.msra.mxu0 %v3433_v10  ;;  %v1984_v10 = vld [vmem:[%s6935_s3 + $0x6c8] sm:$0xff] }
 0x25d   :  { %3436 = vmatprep.subr.bf16.mxu0 %v3435_v8  ;;  %v3515_v8 = vpack.c.bf16 %v2346_v62, %v2345_v61  ;;  %v3459_v23 = vpack.c.bf16 %v1986_v16, %v1984_v10  ;;  %v2009_v61 = vld [vmem:[%s6935_s3 + $0x790] sm:$0xff]  ;;  %v2012_v62 = vld [vmem:[%s6935_s3 + $0x7a8] sm:$0xff]  ;;  %v2015_v16 = vld [vmem:[%s6935_s3 + $0x7c0] sm:$0xff] }
 0x25e   :  { %v2016_v10 = vld [vmem:[%s6935_s3 + $0x7c8] sm:$0xff] }
 0x25f   :  { %2242 = vmatmul.mubr.f32.vlgmr.msra.gmra.mrb[4].mxu0 %v1763_v19  ;;  %v3457_v19 = vpack.c.bf16 %v1981_v3, %v1979_v2  ;;  %3516 = vmatprep.subr.bf16.mxu1 %v3515_v8  ;;  %v3485_v2 = vpack.c.bf16 %v2009_v61, %v2007_v60  ;;  %v2018_v8 = vld [vmem:[%s6935_s3 + $0x7d8] sm:$0xff] }
 0x260   :  { %3438 = vmatpush1.bf16.msra.mxu0 %v3437_v18  ;;  %v2348_v18 = vld [vmem:[%s6938_s5 + $0xd8] sm:$0xff]  ;;  %3518 = vmatpush3.bf16.msra.mxu1 %v3517_v22  ;;  %v3491_v15 = vpack.c.bf16 %v2018_v8, %v2016_v10  ;;  %v2019_v22 = vld [vmem:[%s6935_s3 + $0x7e0] sm:$0xff] }
 0x261   :  { %3440 = vmatprep.subr.bf16.mxu0 %v3439_v20  ;;  %v1983_v20 = vld [vmem:[%s6935_s3 + $0x6c0] sm:$0xff]  ;;  %v3519_v51 = vpack.c.bf16 %v2348_v18, %v2347_v17  ;;  %v2017_v17 = vld [vmem:[%s6935_s3 + $0x7d0] sm:$0xff]  ;;  %v2020_v18 = vld [vmem:[%s6935_s3 + $0x7e8] sm:$0xff] }
 0x262   :  { %v3461_v4 = vpack.c.bf16 %v1985_v21, %v1983_v20  ;;  %v3493_v20 = vpack.c.bf16 %v2017_v17, %v2015_v16 }
 0x263   :  { %3520 = vmatprep.subr.bf16.mxu1 %v3519_v51  ;;  %v1729_v51 = vsub.s32 6, %v5661_v1 }
 0x264   :  { %3442 = vmatpush1.bf16.msra.mxu0 %v3441_v27  ;;  %v2332_v27 = vld [vmem:[%s6938_s5 + $0x58] sm:$0xff] }
 0x265   :  { %3444 = vmatprep.subr.bf16.mxu0 %v3443_v30  ;;  %v3521_v26 = vpack.c.bf16 %v2332_v27, %v2331_v25  ;;  %v3463_v30 = vpack.c.bf16 %v1990_v28, %v1988_v24  ;;  %v1733_v25 = vsub.s32 7, %v5661_v1  ;;  %v3566_v27 = vld [vmem:[%s6936_s2] sm:$0xff] }
 0x266   :  { %v1730_v28 = vrot.slane %v3566_v27, %v1729_v51 }
 0x267   :  { %3522 = vmatpush3.bf16.msra.mxu1 %v3521_v26  ;;  %v1734_v63 = vrot.slane %v3566_v27, %v1733_v25 }
 0x268   :  { %3446 = vmatpush1.bf16.msra.mxu0 %v3445_v12  ;;  %3524 = vmatprep.subr.bf16.mxu1 %v3523_v33  ;;  %v1998_v12 = vld [vmem:[%s6935_s3 + $0x738] sm:$0xff]  ;;  %v2333_v33 = vld [vmem:[%s6938_s5 + $0x60] sm:$0xff] }
 0x269   :  { %3448 = vmatprep.subr.bf16.mxu0 %v3447_v6  ;;  %v3471_v41 = vpack.c.bf16 %v1998_v12, %v1996_v39  ;;  %v1997_v6 = vld [vmem:[%s6935_s3 + $0x730] sm:$0xff]  ;;  %v3525_v36 = vpack.c.bf16 %v2334_v34, %v2333_v33  ;;  %v2336_v39 = vld [vmem:[%s6938_s5 + $0x78] sm:$0xff] }
 0x26a   :  { %v3473_v45 = vpack.c.bf16 %v1997_v6, %v1995_v42  ;;  %v3529_v12 = vpack.c.bf16 %v2336_v39, %v2335_v38 }
 0x26b   :  { %3526 = vmatpush3.bf16.msra.mxu1 %v3525_v36 }
 0x26c   :  { %3450 = vmatpush1.bf16.msra.mxu0 %v3449_v50  ;;  %v2006_v50 = vld [vmem:[%s6935_s3 + $0x778] sm:$0xff] }
 0x26d   :  { %3452 = vmatprep.subr.bf16.mxu0 %v3451_v55  ;;  %v3479_v53 = vpack.c.bf16 %v2006_v50, %v2004_v49  ;;  %v2005_v55 = vld [vmem:[%s6935_s3 + $0x770] sm:$0xff]  ;;  %v2439_v49 = vld [vmem:[%s6940_s6] ss:$0 sm:$0xff] }
 0x26e   :  { %v3481_v58 = vpack.c.bf16 %v2005_v55, %v2003_v54 }
 0x270   :  { %3454 = vmatpush1.bf16.msra.mxu0 %v3453_v0  ;;  %v2014_v0 = vld [vmem:[%s6935_s3 + $0x7b8] sm:$0xff] }
 0x271   :  { %3456 = vmatprep.subr.bf16.mxu0 %v3455_v7  ;;  %v3487_v3 = vpack.c.bf16 %v2014_v0, %v2012_v62  ;;  %v2013_v7 = vld [vmem:[%s6935_s3 + $0x7b0] sm:$0xff] }
 0x272   :  { %v3489_v11 = vpack.c.bf16 %v2013_v7, %v2011_v5 }
 0x274   :  { %3458 = vmatpush1.bf16.msra.mxu0 %v3457_v19  ;;  %v2022_v19 = vld [vmem:[%s6935_s3 + $0x7f8] sm:$0xff] }
 0x275   :  { %3460 = vmatprep.subr.bf16.mxu0 %v3459_v23  ;;  %v3495_v21 = vpack.c.bf16 %v2022_v19, %v2020_v18  ;;  %v2021_v23 = vld [vmem:[%s6935_s3 + $0x7f0] sm:$0xff] }
 0x276   :  { %v3497_v24 = vpack.c.bf16 %v2021_v23, %v2019_v22 }
 0x278   :  { %3462 = vmatpush1.bf16.msra.mxu0 %v3461_v4 }
 0x279   :  { %3464 = vmatprep.subr.bf16.mxu0 %v3463_v30 }
 0x27c   :  { %3466 = vmatpush1.bf16.msra.mxu0 %v3465_v35  ;;  %v2351_v35 = vld [vmem:[%s6938_s5 + $0xf0] sm:$0xff] }
 0x27d   :  { %3468 = vmatprep.subr.bf16.mxu0 %v3467_v13  ;;  %v2352_v13 = vld [vmem:[%s6938_s5 + $0xf8] sm:$0xff] }
 0x27e   :  { %v3527_v37 = vpack.c.bf16 %v2352_v13, %v2351_v35 }
 0x280   :  { %3470 = vmatpush1.bf16.msra.mxu0 %v3469_v40  ;;  %3528 = vmatprep.subr.bf16.mxu1 %v3527_v37  ;;  %v2023_v40 = vld [vmem:[%s6939_s4] sm:$0x3] }
 0x281   :  { %3472 = vmatprep.subr.bf16.mxu0 %v3471_v41  ;;  %3530 = vmatpush3.bf16.msra.mxu1 %v3529_v12  ;;  %v2028_v41 = vrot.slane %v2023_v40, %v1705_v9  ;;  %v2032_v42 = vrot.slane %v2023_v40, %v1709_v14 }
 0x284   :  { %3474 = vmatpush1.bf16.msra.mxu0 %v3473_v45 }
 0x285   :  { %3476 = vmatprep.subr.bf16.mxu0 %v3475_v46 }
 0x288   :  { %3478 = vmatpush1.bf16.msra.mxu0 %v3477_v52 }
 0x289   :  { %3480 = vmatprep.subr.bf16.mxu0 %v3479_v53 }
 0x28c   :  { %3482 = vmatpush1.bf16.msra.mxu0 %v3481_v58 }
 0x28d   :  { %3484 = vmatprep.subr.bf16.mxu0 %v3483_v59 }
 0x290   :  { %3486 = vmatpush1.bf16.msra.mxu0 %v3485_v2 }
 0x291   :  { %3488 = vmatprep.subr.bf16.mxu0 %v3487_v3 }
 0x294   :  { %3490 = vmatpush1.bf16.msra.mxu0 %v3489_v11 }
 0x295   :  { %3492 = vmatprep.subr.bf16.mxu0 %v3491_v15 }
 0x298   :  { %3494 = vmatpush1.bf16.msra.mxu0 %v3493_v20 }
 0x299   :  { %3496 = vmatprep.subr.bf16.mxu0 %v3495_v21 }
 0x29c   :  { %3498 = vmatpush1.bf16.msra.mxu0 %v3497_v24 }
 0x2d8   :  { %v1669_v29 = vpop.f32.mrb[4].mxu1 }
 0x2d9   :  { %v1671_v4 = vpop.f32.mrb[5].mxu1  ;;  %v1749_v26 = vadd.f32 %v1730_v28, %v1669_v29 }
 0x2da   :  { %v1750_v30 = vadd.f32 %v1734_v63, %v1671_v4 }
 0x2db   :  { %1757 = vst [vmem:[%s6937_s8 + $0x30] sm:$0xff] %v1749_v26  ;;  %v1765_v32 = vmax.f32 %v1749_v26, 0.0 }
 0x2dc   :  { %1758 = vst [vmem:[%s6937_s8 + $0x38] sm:$0xff] %v1750_v30  ;;  %v1766_v31 = vmax.f32 %v1750_v30, 0.0 }
 0x2de   :  { %2312 = vmatprep.mubr.f32.mxu0 %v1766_v31 }
 0x2df   :  { %2313 = vmatmul.mubr.f32.vlgmr.msra.gmra.mrb[4].mxu0 %v1765_v32 }
 0x3b2   :  { %v2314_v6 = vpop.f32.mrb[4].mxu0 }
 0x3b3   :  { %v3533_v43 = vadd.f32 %v2314_v6, %v2028_v41  ;;  %v2316_v44 = vpop.f32.mrb[5].mxu0 }
 0x3b4   :  { %v3534_v45 = vadd.f32 %v2316_v44, %v2032_v42 }
 0x3b5   :  { %v2319_v47 = vmax.f32 %v3533_v43, 0.0 }
 0x3b6   :  { %v2320_v46 = vmax.f32 %v3534_v45, 0.0 }
 0x3b8   :  { %2424 = vmatprep.mubr.f32.mxu1 %v2320_v46 }
 0x3b9   :  { %2425 = vmatmul.mubr.f32.vlgmr.msra.gmra.mrb[6].mxu1 %v2319_v47 }
 0x48c   :  { %v2472_v48 = vpop.f32.mrb[6].mxu1 }
 0x48d   :  { %v2473_v50 = vpop.f32.mrb[7].mxu1 }
 0x48e   :  { %v2474_v52 = vadd.f32 %v2473_v50, %v2472_v48 }
 0x490   :  { %v2427_v53 = vadd.f32 %v2474_v52, %v2439_v49 }
 0x492   :  { %2430 = vst [vmem:[%s6941_s7] sm:$0xff] %v2427_v53 }

</bundles_post_ra>
